<compile_context>
chip_gen: v7x
topology: tpu7x:2x2x1
jax: 0.10.0
libtpu: 0.0.40
codegen_flags: <defaults>
</compile_context>

<pallas_src>
import jax
import jax.numpy as jnp
from jax.experimental import pallas as pl
from jax.experimental.pallas import tpu as pltpu

NUM_CLASSES = 11


def pooled_fc_kernel(hidden_ref, mask_ref, w_ref, b_ref, out_ref, acc_ref, cnt_ref):
    """Grid = (B // TB, S // TS); seq axis (innermost) is the reduction axis.

    hidden_ref: (TB, TS, H) native activation dtype (e.g. bf16)
    mask_ref:   (TB, TS)    same dtype as hidden, values in {0, 1}
    w_ref:      (H, 11)     f32, nn.Linear weight pre-transposed
    b_ref:      (1, 11)     f32
    out_ref:    (TB, 11)    f32  (written only on the last seq step)
    acc_ref:    (TB, H)     f32 VMEM scratch -- running masked sum
    cnt_ref:    (TB, 1)     f32 VMEM scratch -- running attended-token count
    """
    si = pl.program_id(1)

    @pl.when(si == 0)
    def _init():
        acc_ref[...] = jnp.zeros_like(acc_ref)
        cnt_ref[...] = jnp.zeros_like(cnt_ref)

    hidden = hidden_ref[...]                       # (TB, TS, H)
    mask = mask_ref[...]                           # (TB, TS)

    # mask is {0,1}, so the bf16 product is exact; accumulate in f32 scratch.
    masked = hidden * mask[:, :, None]
    acc_ref[...] += jnp.sum(masked.astype(jnp.float32), axis=1)
    cnt_ref[...] += jnp.sum(mask.astype(jnp.float32), axis=1, keepdims=True)

    @pl.when(si == pl.num_programs(1) - 1)
    def _finalize():
        # NOTE: matches PyTorch semantics -- a fully padded row divides by zero.
        feature = acc_ref[...] / cnt_ref[...]                         # (TB, H)  f32
        logits = jnp.dot(feature, w_ref[...],
                         preferred_element_type=jnp.float32)          # (TB, 11) f32
        out_ref[...] = logits + b_ref[...]


def prepare_fc_params(fc_weight, fc_bias):
    """One-time prep (hoisted out of the per-call path): transpose the nn.Linear
    weight (11, H) -> (H, 11) and reshape the bias to (1, 11)."""
    w_t = jnp.asarray(fc_weight, jnp.float32).T
    b = jnp.asarray(fc_bias, jnp.float32).reshape(1, NUM_CLASSES)
    return w_t, b


def _pick_tiles(B, S, H, itemsize):
    # Batch tile: 8 (sublane-friendly) when it divides B, else the whole batch.
    TB = 8 if (B % 8 == 0) else B
    # Seq tile: largest of {512, 256, 128} (lane-aligned for the mask block) that
    # divides S and keeps the double-buffered hidden tile under ~24 MiB (v7x-safe).
    budget = 24 * 1024 * 1024
    ts_candidates = [c for c in (512, 256, 128) if S % c == 0]
    TS = S
    for c in ts_candidates:
        if 2 * TB * c * H * itemsize <= budget:
            TS = c
            break
    else:
        if ts_candidates:
            TS = ts_candidates[-1]
    return TB, TS


@jax.jit
def custom_model_forward(last_hidden_states, attention_mask, w_t, b):
    """last_hidden_states: [B, S, H]  (kept in its native dtype, e.g. bf16)
       attention_mask:     [B, S]     (any int/bool dtype)
       w_t:                [H, 11]    f32 (pre-transposed fc weight)
       b:                  [1, 11]    f32
       returns:            [B, 11]    f32
    """
    B, S, H = last_hidden_states.shape
    dt = last_hidden_states.dtype
    mask = attention_mask.astype(dt)               # tiny [B, S] cast, done in XLA

    TB, TS = _pick_tiles(B, S, H, jnp.dtype(dt).itemsize)
    grid = (B // TB, S // TS)

    return pl.pallas_call(
        pooled_fc_kernel,
        out_shape=jax.ShapeDtypeStruct((B, NUM_CLASSES), jnp.float32),
        grid_spec=pltpu.PrefetchScalarGridSpec(
            num_scalar_prefetch=0,
            grid=grid,
            in_specs=[
                pl.BlockSpec((TB, TS, H), lambda bi, si: (bi, si, 0)),
                pl.BlockSpec((TB, TS), lambda bi, si: (bi, si)),
                pl.BlockSpec((H, NUM_CLASSES), lambda bi, si: (0, 0)),
                pl.BlockSpec((1, NUM_CLASSES), lambda bi, si: (0, 0)),
            ],
            out_specs=pl.BlockSpec((TB, NUM_CLASSES), lambda bi, si: (bi, 0)),
            scratch_shapes=[
                pltpu.VMEM((TB, H), jnp.float32),   # masked-sum accumulator
                pltpu.VMEM((TB, 1), jnp.float32),   # token-count accumulator
            ],
        ),
        compiler_params=pltpu.CompilerParams(
            dimension_semantics=("parallel", "arbitrary"),
            vmem_limit_bytes=48 * 1024 * 1024,
        ),
    )(last_hidden_states, mask, w_t, b)


if __name__ == "__main__":
    # Small, but big enough to exercise both grid axes: tiles (8, 512) -> grid (2, 2).
    B, S, H = 16, 1024, 128
    key = jax.random.PRNGKey(0)
    k_h, k_w, k_b = jax.random.split(key, 3)

    # Backbone output kept in bf16 (native activation dtype) -> half the HBM traffic.
    last_hidden = jax.random.normal(k_h, (B, S, H), dtype=jnp.float32).astype(jnp.bfloat16)

    # Ragged attention mask: row i attends to the first (S - 37*i) tokens.
    lengths = jnp.maximum(S - 37 * jnp.arange(B), 1)
    attention_mask = (jnp.arange(S)[None, :] < lengths[:, None]).astype(jnp.int32)

    # Deterministic nn.Linear(H, 11) parameters (PyTorch layout: weight is (11, H)).
    fc_weight = jax.random.normal(k_w, (NUM_CLASSES, H), dtype=jnp.float32)
    fc_bias = jax.random.normal(k_b, (NUM_CLASSES,), dtype=jnp.float32)

    w_t, b2 = prepare_fc_params(fc_weight, fc_bias)     # hoisted one-time prep
    out = custom_model_forward(last_hidden, attention_mask, w_t, b2)
    out = jax.block_until_ready(out)

    # Pure-JAX reference (same math as the PyTorch module).
    mask_f = attention_mask.astype(jnp.float32)
    h32 = last_hidden.astype(jnp.float32)
    feat = (h32 * mask_f[:, :, None]).sum(axis=1) / mask_f.sum(axis=1, keepdims=True)
    ref = feat @ fc_weight.T + fc_bias

    assert out.shape == (B, NUM_CLASSES)
    assert jnp.allclose(out, ref, atol=1e-2, rtol=1e-2), (
        "mismatch vs reference", float(jnp.max(jnp.abs(out - ref))))
    print("KERNEL_OK")
</pallas_src>

<mosaic_0001>
module attributes {stable_mosaic.version = 11 : i64} {
  func.func @pooled_fc_kernel(%arg0: i32, %arg1: i32, %arg2: memref<8x512x128xbf16, #tpu.memory_space<vmem>>, %arg3: memref<8x512xbf16, #tpu.memory_space<vmem>>, %arg4: memref<128x11xf32, #tpu.memory_space<vmem>>, %arg5: memref<1x11xf32, #tpu.memory_space<vmem>>, %arg6: memref<8x11xf32, #tpu.memory_space<vmem>>, %arg7: memref<8x128xf32, #tpu.memory_space<vmem>>, %arg8: memref<8x1xf32, #tpu.memory_space<vmem>>) attributes {dimension_semantics = [#tpu.dimension_semantics<parallel>, #tpu.dimension_semantics<arbitrary>], iteration_bounds = array<i64: 2, 2>, scalar_prefetch = 0 : i64, scratch_operands = 2 : i64, tpu.core_type = #tpu.core_type<tc>, window_params = [{transform_indices = @transform_0, window_bounds = array<i64: 8, 512, 128>}, {transform_indices = @transform_1, window_bounds = array<i64: 8, 512>}, {pipeline_mode = #tpu.pipeline_mode<synchronous>, transform_indices = @transform_2, window_bounds = array<i64: 128, 11>}, {pipeline_mode = #tpu.pipeline_mode<synchronous>, transform_indices = @transform_3, window_bounds = array<i64: 1, 11>}, {transform_indices = @transform_4, window_bounds = array<i64: 8, 11>}]} {
    %c0_i32 = arith.constant 0 : i32
    %0 = arith.cmpi eq, %arg1, %c0_i32 : i32
    %1 = arith.extui %0 : i1 to i32
    %c0_i32_0 = arith.constant 0 : i32
    %2 = arith.cmpi ne, %1, %c0_i32_0 : i32
    scf.if %2 {
      %cst_15 = arith.constant 0.000000e+00 : f32
      %22 = vector.broadcast %cst_15 : f32 to vector<8x128xf32>
      %c0_16 = arith.constant 0 : index
      %c0_17 = arith.constant 0 : index
      %23 = vector.load %arg7[%c0_16, %c0_17] : memref<8x128xf32, #tpu.memory_space<vmem>>, vector<8x128xf32>
      tpu.vector_store %arg7[%c0_16, %c0_17], %22 {strides = array<i32>} : memref<8x128xf32, #tpu.memory_space<vmem>>, vector<8x128xf32>,
      %cst_18 = arith.constant 0.000000e+00 : f32
      %24 = vector.broadcast %cst_18 : f32 to vector<8x1xf32>
      %c0_19 = arith.constant 0 : index
      %c0_20 = arith.constant 0 : index
      %25 = vector.load %arg8[%c0_19, %c0_20] : memref<8x1xf32, #tpu.memory_space<vmem>>, vector<8x1xf32>
      tpu.vector_store %arg8[%c0_19, %c0_20], %24 {strides = array<i32>} : memref<8x1xf32, #tpu.memory_space<vmem>>, vector<8x1xf32>,
    } else {
    }
    %c0 = arith.constant 0 : index
    %c0_1 = arith.constant 0 : index
    %c0_2 = arith.constant 0 : index
    %3 = vector.load %arg2[%c0, %c0_1, %c0_2] : memref<8x512x128xbf16, #tpu.memory_space<vmem>>, vector<8x512x128xbf16>
    %c0_3 = arith.constant 0 : index
    %c0_4 = arith.constant 0 : index
    %4 = vector.load %arg3[%c0_3, %c0_4] : memref<8x512xbf16, #tpu.memory_space<vmem>>, vector<8x512xbf16>
    %5 = vector.shape_cast %4 : vector<8x512xbf16> to vector<8x512x1xbf16>
    %6 = vector.broadcast %5 : vector<8x512x1xbf16> to vector<8x512x128xbf16>
    %7 = arith.mulf %3, %6 : vector<8x512x128xbf16>
    %c0_5 = arith.constant 0 : index
    %c0_6 = arith.constant 0 : index
    %8 = vector.load %arg7[%c0_5, %c0_6] : memref<8x128xf32, #tpu.memory_space<vmem>>, vector<8x128xf32>
    %9 = arith.extf %7 : vector<8x512x128xbf16> to vector<8x512x128xf32>
    %cst = arith.constant dense<0.000000e+00> : vector<8x128xf32>
    %10 = vector.multi_reduction <add>, %9, %cst [1] : vector<8x512x128xf32> to vector<8x128xf32>
    %11 = arith.addf %8, %10 : vector<8x128xf32>
    %c0_7 = arith.constant 0 : index
    %c0_8 = arith.constant 0 : index
    %12 = vector.load %arg7[%c0_7, %c0_8] : memref<8x128xf32, #tpu.memory_space<vmem>>, vector<8x128xf32>
    tpu.vector_store %arg7[%c0_7, %c0_8], %11 {strides = array<i32>} : memref<8x128xf32, #tpu.memory_space<vmem>>, vector<8x128xf32>,
    %c0_9 = arith.constant 0 : index
    %c0_10 = arith.constant 0 : index
    %13 = vector.load %arg8[%c0_9, %c0_10] : memref<8x1xf32, #tpu.memory_space<vmem>>, vector<8x1xf32>
    %14 = arith.extf %4 : vector<8x512xbf16> to vector<8x512xf32>
    %cst_11 = arith.constant dense<0.000000e+00> : vector<8xf32>
    %15 = vector.multi_reduction <add>, %14, %cst_11 [1] : vector<8x512xf32> to vector<8xf32>
    %16 = vector.shape_cast %15 : vector<8xf32> to vector<8x1xf32>
    %17 = arith.addf %13, %16 : vector<8x1xf32>
    %c0_12 = arith.constant 0 : index
    %c0_13 = arith.constant 0 : index
    %18 = vector.load %arg8[%c0_12, %c0_13] : memref<8x1xf32, #tpu.memory_space<vmem>>, vector<8x1xf32>
    tpu.vector_store %arg8[%c0_12, %c0_13], %17 {strides = array<i32>} : memref<8x1xf32, #tpu.memory_space<vmem>>, vector<8x1xf32>,
    %c1_i32 = arith.constant 1 : i32
    %19 = arith.cmpi eq, %arg1, %c1_i32 : i32
    %20 = arith.extui %19 : i1 to i32
    %c0_i32_14 = arith.constant 0 : i32
    %21 = arith.cmpi ne, %20, %c0_i32_14 : i32
    scf.if %21 {
      %c0_15 = arith.constant 0 : index
      %c0_16 = arith.constant 0 : index
      %22 = vector.load %arg7[%c0_15, %c0_16] : memref<8x128xf32, #tpu.memory_space<vmem>>, vector<8x128xf32>
      %c0_17 = arith.constant 0 : index
      %c0_18 = arith.constant 0 : index
      %23 = vector.load %arg8[%c0_17, %c0_18] : memref<8x1xf32, #tpu.memory_space<vmem>>, vector<8x1xf32>
      %24 = vector.broadcast %23 : vector<8x1xf32> to vector<8x128xf32>
      %25 = arith.divf %22, %24 : vector<8x128xf32>
      %c0_19 = arith.constant 0 : index
      %c0_20 = arith.constant 0 : index
      %26 = vector.load %arg4[%c0_19, %c0_20] : memref<128x11xf32, #tpu.memory_space<vmem>>, vector<128x11xf32>
      %cst_21 = arith.constant dense<0.000000e+00> : vector<8x11xf32>
      %27 = tpu.matmul %25, %26, %cst_21 {dimension_numbers = #tpu.dot_dimension_numbers<[1], [0], [0], [1], [0, 0, 1, 1], [], []>} : vector<8x128xf32>, vector<128x11xf32>, vector<8x11xf32> -> vector<8x11xf32>
      %c0_22 = arith.constant 0 : index
      %c0_23 = arith.constant 0 : index
      %28 = vector.load %arg5[%c0_22, %c0_23] : memref<1x11xf32, #tpu.memory_space<vmem>>, vector<1x11xf32>
      %29 = vector.broadcast %28 : vector<1x11xf32> to vector<8x11xf32>
      %30 = arith.addf %27, %29 : vector<8x11xf32>
      %c0_24 = arith.constant 0 : index
      %c0_25 = arith.constant 0 : index
      %31 = vector.load %arg6[%c0_24, %c0_25] : memref<8x11xf32, #tpu.memory_space<vmem>>, vector<8x11xf32>
      tpu.vector_store %arg6[%c0_24, %c0_25], %30 {strides = array<i32>} : memref<8x11xf32, #tpu.memory_space<vmem>>, vector<8x11xf32>,
    } else {
    }
    return
  }
  func.func @transform_0(%arg0: i32, %arg1: i32) -> (i32, i32, i32) {
    %c0_i32 = arith.constant 0 : i32
    %c0_i32_0 = arith.constant 0 : i32
    return %arg0, %arg1, %c0_i32 : i32, i32, i32
  }
  func.func @transform_1(%arg0: i32, %arg1: i32) -> (i32, i32) {
    %c0_i32 = arith.constant 0 : i32
    return %arg0, %arg1 : i32, i32
  }
  func.func @transform_2(%arg0: i32, %arg1: i32) -> (i32, i32) {
    %c0_i32 = arith.constant 0 : i32
    %c0_i32_0 = arith.constant 0 : i32
    %c0_i32_1 = arith.constant 0 : i32
    return %c0_i32, %c0_i32_0 : i32, i32
  }
  func.func @transform_3(%arg0: i32, %arg1: i32) -> (i32, i32) {
    %c0_i32 = arith.constant 0 : i32
    %c0_i32_0 = arith.constant 0 : i32
    %c0_i32_1 = arith.constant 0 : i32
    return %c0_i32, %c0_i32_0 : i32, i32
  }
  func.func @transform_4(%arg0: i32, %arg1: i32) -> (i32, i32) {
    %c0_i32 = arith.constant 0 : i32
    %c0_i32_0 = arith.constant 0 : i32
    return %arg0, %c0_i32 : i32, i32
  }
}

</mosaic_0001>

<bundles_post_ra>
// kernel: custom_model_forward.1
= control target key start
LH: loop header
LB: loop body
LE: loop exit
PB: predicated region body
PF: predicated region fallthrough
CT: control target
= control target key end

     0   :  { %s12165_s0 = inlined_call_operand.hbm [shape: bf16[16,1024,128], index: 0, kind: input, shape index: {}]   ;;  %s12166_s1 = inlined_call_operand.vmem [shape: bf16[16,1024], index: 1, kind: input, shape index: {}]   ;;  %s12167_s2 = inlined_call_operand.vmem [shape: f32[128,11], index: 2, kind: input, shape index: {}]   ;;  %s12168_s3 = inlined_call_operand.hbm [shape: f32[1,11], index: 3, kind: input, shape index: {}]   ;;  %s12169_s4 = inlined_call_operand.hbm [shape: f32[16,11], index: 4, kind: output, shape index: {}]  }
   0x1   :  { %12209 = sst [smem:[#allocation37_spill]] %s12168_s3 }
   0x2   :  { %9 = vsyncpa [#allocation5], 0 }
   0x3   :  { %11 = vsyncpa [#allocation5 + $0x1], 0 }
   0x4   :  { %12 = vsyncpa [#allocation8], 0 }
   0x5   :  { %13 = vsyncpa [#allocation6], 0 }
   0x6   :  { %15 = vsyncpa [#allocation6 + $0x1], 0  ;;  %s8623_s15 = smov 0   ;;  %s8625_s16 = smov 0  }
   0x7   :  { %s8627_s17 = smov 0   ;;  %s8629_s18 = smov 0  }
   0x8   :  { %s8631_s19 = smov 0   ;;  %s8633_s20 = smov 0  }
   0x9   :  { %s8635_s21 = smov 0   ;;  %s8637_s22 = smov 0  }
   0xa   :  { %s8639_s23 = smov 0   ;;  %s8641_s24 = smov 0  }
   0xb   :  { %s8643_s25 = smov 0  }
   0xc LB: > { %12210 = sst [smem:[#allocation16_spill]] %s8550_s17  ;;  %s8185_s26 = sadd.s32 4294967295, %s8582_s25   ;;  %s8582_s25 = sphi %s8643_s25, %s21_s25   ;;  %s8578_s24 = sphi %s8641_s24, %s12466_s24   ;;  %s8574_s23 = sphi %s8639_s23, %s12472_s23   ;;  %s8570_s22 = sphi %s8637_s22, %s12464_s22   ;;  %s8566_s21 = sphi %s8635_s21, %s12471_s21   ;;  %s8562_s20 = sphi %s8633_s20, %s12463_s20   ;;  %s8558_s19 = sphi %s8631_s19, %s12470_s19   ;;  %s8554_s18 = sphi %s8629_s18, %s12469_s18   ;;  %s8550_s17 = sphi %s8627_s17, %s12461_s17   ;;  %s8546_s16 = sphi %s8625_s16, %s12468_s16   ;;  %s8542_s15 = sphi %s8623_s15, %s12467_s15  }
   0xd   : > { %12211 = sst [smem:[#allocation17_spill]] %s8562_s20  ;;  %s8186_s27 = sadd.s32 4294967294, %s8582_s25  }
   0xe   : > { %12212 = sst [smem:[#allocation18_spill]] %s8578_s24  ;;  %s30_s28 = sadd.s32 1, %s8574_s23 }
   0xf   : > { %s33_s29 = sadd.s32 1, %s8578_s24  ;;  %p31_p0 = scmp.ge.s32.totalorder %s30_s28, 2 }
  0x10   : > { %s42_s30 = sadd.s32 1, %s8562_s20  ;;  %p49_p1 = scmp.ne.s32.totalorder %s8562_s20, %s8558_s19 }
  0x11   : > { %p50_p2 = scmp.eq.s32.totalorder %s8582_s25, 0  ;;  %s12474_s28 = smov (%p31_p0, %s30_s28), 0 }
  0x12   : > { %12213 = sst [smem:[#allocation19_spill]] %s12474_s28  ;;  %s12476_s29 = smov (!%p31_p0, %s33_s29), %s8578_s24 }
  0x13   : > { %s38_s5 = ssub.s32 %s8574_s23, %s12474_s28  ;;  %p8689_p3 = por %p50_p2, %p49_p1 }
  0x14   : > { %p35_p4 = scmp.ge.s32.totalorder %s12476_s29, 2  ;;  %p55_p5 = scmp.ne.s32.totalorder %s8558_s19, %s8554_s18 }
  0x15   : > { %s12214_s6 = scalar_select %p8689_p3, 1, 0 }
  0x16   : > { %p8694_p6 = scmp.eq.s32.totalorder %s8185_s26, 0  ;;  %s138_s8 = sadd.s32 1, %s8550_s17 }
  0x17   : > { %s12478_s29 = smov (%p35_p4, %s12476_s29), 0  ;;  %p148_p8 = scmp.ne.s32.totalorder %s8550_s17, %s8546_s16 }
  0x18   : > { %s12215_s7 = scalar_select %p8694_p6, 1, 0 }
  0x19   : > { %12216 = sst [smem:[#allocation20_spill]] %s12478_s29  ;;  %p8703_p7 = por %p8694_p6, %p55_p5 }
  0x1a   : > { %s37_s10 = ssub.s32 %s8578_s24, %s12478_s29  ;;  %p149_p9 = scmp.eq.s32.totalorder %s8185_s26, 3 }
  0x1b   : > { %s12217_s9 = scalar_select %p8703_p7, 1, 0 }
  0x1c   : > { %s39_s11 = sor.u32 %s38_s5, %s37_s10  ;;  %p136_p10 = scmp.eq.s32.totalorder %s37_s10, 0 }
  0x1d   : > { %p40_p11 = scmp.eq.s32.totalorder %s39_s11, 0  ;;  %p8711_p12 = por %p149_p9, %p148_p8 }
  0x1e   : > { %s8716_s13 = scalar_select %p136_p10, %s8550_s17, %s138_s8  }
  0x1f   : > { %s12218_s12 = scalar_select %p8711_p12, 1, 0 }
  0x20   : > { %12219 = sst [smem:[#allocation21_spill]] %s8716_s13  ;;  %p154_p13 = scmp.ne.s32.totalorder %s8546_s16, %s8542_s15 }
  0x21   : > { %s8719_s14 = scalar_select %p40_p11, %s8562_s20, %s42_s30  }
  0x22   : > { %p155_p0 = scmp.eq.s32.totalorder %s8186_s27, 3  ;;  %p8187_p1 = scmp.ge.s32.totalorder %s8582_s25, 1 }
  0x23   : > { %12220 = sst [smem:[#allocation22_spill]] %s8719_s14  ;;  %p162_p2 = scmp.lt.s32.totalorder %s8582_s25, 5 }
  0x24   : > { %p8725_p4 = por %p155_p0, %p154_p13  ;;  %s8584_s5 = smov [#allocation7]  }
  0x25   : > { %p8729_p5 = pnand %p8187_p1, %p162_p2  ;;  %s178_s10 = sshll.u32 %s8584_s5, 4  ;;  %s179_s10 = int_to_ptr.vmem [resolvable:$true] %s178_s10 }
  0x26   : > { %s12221_s18 = scalar_select %p8725_p4, 1, 0 }
  0x27   : > { %s12222_s26 = scalar_select %p8729_p5, 1, 0 }
  0x28   : > { %p8307_p8 = pneg %p8729_p5  ;;  %s12224_s3 = sld [smem:[#allocation37_spill]] }
  0x2a   : > { %p8737_p9 = pnand %p8307_p8, %p8694_p6 }
  0x2c   : > { %p8430_p11 = pneg %p8737_p9 }
  0x2e   : > { %s8428_s11 = scalar_lea.hbm %s12224_s3, 16 }
  0x2f   : > { %p8429_p10 = scmp.ne.s32.totalorder %s12224_s3, %s8428_s11  ;;  %p8435_p1 = scmp.lt.u32.totalorder %s8428_s11, %s12224_s3 }
  0x31   : > { %p8431_p13 = pnand %p8430_p11, %p8429_p10 }
  0x33   : > { %p8432_p0 = pneg %p8431_p13 }
  0x35   : > { %p8437_p2 = pnand %p8435_p1, %p8432_p0 }
  0x37   : > { %8440 = shalt.err (!%p8437_p2)
}
  0x38   : > { %s8441_s13 = scalar_lea.vmem %s179_s10, 16  ;;  %s8448_s27 = scalar_lea.vmem %s179_s10, 32 }
  0x39   : > { %p8442_p8 = scmp.ne.s32.totalorder %s179_s10, %s8441_s13  ;;  %p8449_p6 = scmp.lt.s32.totalorder %s179_s10, %s179_s10 }
  0x3a   : > { %p8450_p7 = scmp.lt.s32.totalorder %s8448_s27, %s8441_s13 }
  0x3b   : > { %p8444_p4 = pnand %p8442_p8, %p8430_p11 }
  0x3c   : > { %p8451_p5 = por %p8450_p7, %p8449_p6 }
  0x3d   : > { %p8445_p12 = pneg %p8444_p4 }
  0x3f   : > { %p8452_p3 = pnand %p8451_p5, %p8445_p12 }
  0x41   : > { %8455 = shalt.err (!%p8452_p3)
}
  0x42   : > { %8310 = dma.hbm_to_vmem [thread:$0]  (!%p8737_p9), %s12224_s3, 16, %s179_s10, [#allocation8]  }
  0x43   : > { %p8189_p10 = scmp.ge.s32.totalorder %s8582_s25, 4 }
  0x45   : > { %185 = sbr.rel (%p8189_p10) target bundleno = 92 (0x5c), region = 24 }
  0x4c   : > { %s189_s13 = sand.u32 1, %s8562_s20   ;;  %s8192_s8 = sshll.u32 %s8574_s23, 6 }
  0x4d   : > { %s8190_s14 = sshll.u32 %s189_s13, 11  ;;  %s8215_s11 = sshll.u32 %s8578_s24, 10 }
  0x4e   : > { %s200_s30 = sadd.s32 %s8215_s11, %s8192_s8  ;;  %s193_s5 = scalar_lea.vmem [#allocation4], %s8190_s14 }
  0x4f   : > { %s215_s10 = sshll.u32 %s193_s5, 4  ;;  %p12225_p3 = scmp.ne.s32.totalorder %s12214_s6, 0  ;;  %s216_s10 = int_to_ptr.vmem [resolvable:$true] %s215_s10 }
  0x50   : > { %s8585_s28 = smov 8192   ;;  %s8586_s3 = smov 4096  }
  0x51   : > { %s8294_s27 = scalar_select %p12225_p3, [#allocation0], [#allocation12] }
  0x52   : > { %8295 = sst [smem:[#allocation11]] (%p12225_p3), %s8585_s28  ;;  %s8194_s20 = sshll.u32 %s200_s30, 6 }
  0x53   : > { %s207_s29 = sld [smem:[%s8294_s27]]   ;;  %s8587_s17 = smov 64  }
  0x54   : > { %8296 = sst [smem:[#allocation11 + $0x1]] (%p12225_p3), %s8586_s3  ;;  %s202_s11 = scalar_lea.hbm %s12165_s0, %s8194_s20 }
  0x55   : > { %8297 = sst [smem:[#allocation11 + $0x2]] (%p12225_p3), %s8587_s17  ;;  %s8588_s5 = smov 4  }
  0x56   : > { %8298 = sst [smem:[#allocation11 + $0x3]] (%p12225_p3), %s8587_s17  ;;  %s190_s24 = scalar_lea.sflag [#allocation5], %s189_s13 }
  0x57   : > { %8299 = sst [smem:[#allocation11 + $0x4]] (%p12225_p3), %s8587_s17  ;;  %s8589_s3 = smov [#allocation10]  }
  0x58   : > { %8300 = sst [smem:[#allocation11 + $0x5]] (%p12225_p3), %s8588_s5 }
  0x59   : > { %s8195_s27 = sshll.u32 %s207_s29, 26 }
  0x5a   : > { %s8196_s28 = sadd.s32 134217728, %s8195_s27 }
  0x5b   : > { %8301 = dma.general (%p12225_p3), %s202_s11, 32768, %s216_s10, %s190_s24, %s8589_s3, [#allocation11], %s8196_s28, 0  }
  0x5c PF: > { %p12226_p6 = scmp.ne.s32.totalorder %s12222_s26, 0 }
  0x5e   : > { %253 = sbr.rel (%p12226_p6) target bundleno = 1240 (0x4d8), region = 36 }
  0x65   : > { %s255_s30 = sand.u32 1, %s8558_s19   ;;  %p12227_p7 = scmp.ne.s32.totalorder %s12217_s9, 0 }
  0x66   : > { %s8198_s14 = sshll.u32 %s255_s30, 11  ;;  %s256_s20 = scalar_lea.sflag [#allocation5], %s255_s30 }
  0x67   : > { %s8783_s8 = scalar_lea.vmem [#allocation4], %s8198_s14 }
  0x68   : > { %8529 = dma.done.wait (%p12227_p7), %s256_s20, 32768  }
  0x69   : > { %8531 = vsyncadd (%p12227_p7), %s256_s20, 4294934528  ;;  %p12228_p12 = scmp.ne.s32.totalorder %s12215_s7, 0 }
  0x6b   : > { %8533 = dma.done.wait (%p12228_p12), [#allocation8], 16  }
  0x6c   : > { %8535 = vsyncadd (%p12228_p12), [#allocation8], 4294967280  ;;  %s294_s17 = sand.u32 1, %s8546_s16   ;;  %s8201_s24 = sshll.u32 %s8566_s21, 2 }
  0x6d   : > { %s8797_s6 = sshll.u32 %s294_s17, 3  ;;  %p300_p4 = scmp.lt.s32.totalorder %s8570_s22, 1 }
  0x6e   : > { %p302_p5 = scmp.lt.s32.totalorder %s8201_s24, 7  ;;  %s296_s5 = scalar_lea.vmem [#allocation9], %s8797_s6 }
  0x6f   : > { %s301_s9 = scalar_select %p300_p4, %s8570_s22, 1 }
  0x70   : > { %s12480_s24 = smov (!%p302_p5, %s8201_s24), 7  ;;  %p8204_p9 = scmp.ne.s32.totalorder %s8566_s21, 0 }
  0x71   : > { %s8202_s26 = sshll.u32 %s301_s9, 3  ;;  %vm314_vm0 = vcmask (!%p8204_p9), 7168   ;;  %v8590_v0 = vmov (!%p8204_p9), 0.0  }
  0x72   : > { %s305_s13 = sadd.s32 %s8202_s26, %s12480_s24  ;;  %312 = sbr.rel (%p8204_p9) target bundleno = 121 (0x79), region = 48  ;;  %313 = vst [vmem:[#allocation2] sm:$0xff] (!%p8204_p9), %v8590_v0  ;;  %315 = vst.msk [vmem:[#allocation3] sm:$0xff] (!%p8204_p9), %vm314_vm0, %v8590_v0 }
  0x73   : > { %s8203_s10 = sshll.u32 %s305_s13, 2 }
  0x74   : > { %s8804_s11 = scalar_lea.vmem %s12166_s1, %s8203_s10 }
  0x79 PF: > { %v828_v1 = vld [vmem:[%s8804_s11] sm:$0xff]  ;;  %v843_v2 = vlaneseq  ;;  %v829_v11 = vld [vmem:[%s8804_s11 + $0x8] sm:$0xff]  ;;  %v8591_v28 = vmov 839922192   ;;  %v8592_v30 = vmov 1985246804  }
  0x7a   : > { %v8205_v3 = vcombine.low %v828_v1, %v828_v1  ;;  %v8206_v8 = vcombine.high %v828_v1, %v828_v1  ;;  %v8207_v12 = vcombine.low %v829_v11, %v829_v11  ;;  %v8208_v15 = vcombine.high %v829_v11, %v829_v11  ;;  %v316_v40 = vld [vmem:[%s8783_s8] sm:$0xf]  ;;  %v317_v41 = vld [vmem:[%s8783_s8 + $0x4] sm:$0xf]  ;;  %v320_v46 = vld [vmem:[%s8783_s8 + $0x10] sm:$0xf] }
  0x7b   : > { %v8809_v4 = vshrl.u32 %v843_v2, 7  ;;  %v2241_v29 = vunpack.c.l.s4 %v8591_v28  ;;  %v2248_v31 = vunpack.c.l.s4 %v8592_v30  ;;  %v318_v51 = vld [vmem:[%s8783_s8 + $0x8] sm:$0xf]  ;;  %v319_v52 = vld [vmem:[%s8783_s8 + $0xc] sm:$0xf]  ;;  %vm7921_vm1 = vcmask 1041409  }
  0x7c   : > { %v8811_v5 = vpack.i.b16 %v8205_v3, %v8205_v3  ;;  %v8818_v9 = vpack.i.b16 %v8206_v8, %v8206_v8  ;;  %v8823_v13 = vpack.i.b16 %v8207_v12, %v8207_v12  ;;  %v8827_v16 = vpack.i.b16 %v8208_v15, %v8208_v15  ;;  %v321_v58 = vld [vmem:[%s8783_s8 + $0x14] sm:$0xf]  ;;  %v322_v1 = vld [vmem:[%s8783_s8 + $0x18] sm:$0xf]  ;;  %v326_v30 = vld [vmem:[%s8783_s8 + $0x28] sm:$0xf] }
  0x7d   : > { %12229 = vst [vmem:[#allocation23_spill] sm:$0xff] %v8809_v4  ;;  %v8814_v6 = vsub.s32 0, %v8809_v4  ;;  %v992_v18 = vshrl.u32 %v8205_v3, 16  ;;  %v1030_v21 = vshrl.u32 %v8206_v8, 16  ;;  %v1068_v24 = vshrl.u32 %v8207_v12, 16  ;;  %p8209_p11 = scmp.ne.s32.totalorder %s8566_s21, 1 }
  0x7e   : > { %12230 = vst [vmem:[#allocation24_spill] sm:$0xff] %v8811_v5  ;;  %12231 = vst [vmem:[#allocation25_spill] sm:$0xff] %v8818_v9  ;;  %v1106_v27 = vshrl.u32 %v8208_v15, 16  ;;  %v2242_v33 = vunpack.c.0.s8 %v2241_v29  ;;  %v2249_v34 = vunpack.c.0.s8 %v2248_v31  ;;  %v8863_v53 = vsub.s32 1, %v8809_v4 }
  0x7f   : > { %v846_v7 = vrot.slane %v8811_v5, %v8814_v6  ;;  %v884_v10 = vrot.slane %v8818_v9, %v8814_v6  ;;  %12232 = vst [vmem:[#allocation26_spill] sm:$0xff] %v8823_v13  ;;  %v922_v14 = vrot.slane %v8823_v13, %v8814_v6  ;;  %12233 = vst [vmem:[#allocation27_spill] sm:$0xff] %v8827_v16  ;;  %vm7923_vm2 = vcmask 1042434  }
  0x80   : > { %v960_v17 = vrot.slane %v8827_v16, %v8814_v6  ;;  %v8831_v19 = vpack.i.b16 %v992_v18, %v992_v18  ;;  %v8835_v22 = vpack.i.b16 %v1030_v21, %v1030_v21  ;;  %v8839_v25 = vpack.i.b16 %v1068_v24, %v1068_v24 }
  0x81   : > { %856 = vbcast.lane.c.b16.xlu1 %v846_v7, 288  ;;  %848 = vbcast.lane.c.b16.xlu0 %v846_v7, 256  ;;  %v8843_v32 = vpack.i.b16 %v1106_v27, %v1106_v27  ;;  %v8848_v36 = vsub.s32 %v2242_v33, %v8809_v4  ;;  %v8851_v37 = vsub.s32 %v2249_v34, %v8809_v4  ;;  %v324_v27 = vld [vmem:[%s8783_s8 + $0x20] sm:$0xf]  ;;  %vm7925_vm3 = vcmask 1043459  }
  0x82   : > { %12234 = vst [vmem:[#allocation28_spill] sm:$0xff] %v8831_v19  ;;  %v998_v20 = vrot.slane %v8831_v19, %v8814_v6  ;;  %12235 = vst [vmem:[#allocation29_spill] sm:$0xff] %v8835_v22  ;;  %v1036_v23 = vrot.slane %v8835_v22, %v8814_v6  ;;  %v1074_v26 = vrot.slane %v8839_v25, %v8814_v6  ;;  %vm7927_vm4 = vcmask 1044484  }
  0x83   : > { %12236 = vst [vmem:[#allocation30_spill] sm:$0xff] %v8839_v25  ;;  %12237 = vst [vmem:[#allocation31_spill] sm:$0xff] %v8843_v32  ;;  %v1112_v35 = vrot.slane %v8843_v32, %v8814_v6  ;;  %v8872_v2 = vrot.slane %v8811_v5, %v8863_v53  ;;  %vm7929_vm5 = vcmask 1045509   ;;  %vm7931_vm6 = vcmask 1046534  }
  0x84   : > { %vm7933_vm7 = vcmask 1047559   ;;  %vm7949_vm8 = vcmask 7168   ;;  %vm8595_vm9 = vmmov (!%p8209_p11), 0   ;;  %vm8057_vm10 = vcmask (!%p8209_p11), 89088  }
  0x85   : > { %860 = vbcast.lane.c.b16.xlu1 %v846_v7, 304  ;;  %852 = vbcast.lane.c.b16.xlu0 %v846_v7, 272 }
  0x89   : > { %868 = vbcast.lane.c.b16.xlu1 %v846_v7, 336  ;;  %864 = vbcast.lane.c.b16.xlu0 %v846_v7, 320 }
  0x8d   : > { %876 = vbcast.lane.c.b16.xlu1 %v846_v7, 368  ;;  %872 = vbcast.lane.c.b16.xlu0 %v846_v7, 352 }
  0x91   : > { %890 = vbcast.lane.c.b16.xlu1 %v884_v10, 272  ;;  %886 = vbcast.lane.c.b16.xlu0 %v884_v10, 256 }
  0x95   : > { %898 = vbcast.lane.c.b16.xlu1 %v884_v10, 304  ;;  %894 = vbcast.lane.c.b16.xlu0 %v884_v10, 288 }
  0x99   : > { %906 = vbcast.lane.c.b16.xlu1 %v884_v10, 336  ;;  %902 = vbcast.lane.c.b16.xlu0 %v884_v10, 320 }
  0x9d   : > { %914 = vbcast.lane.c.b16.xlu1 %v884_v10, 368  ;;  %910 = vbcast.lane.c.b16.xlu0 %v884_v10, 352  ;;  %v323_v10 = vld [vmem:[%s8783_s8 + $0x1c] sm:$0xf] }
  0xa1   : > { %928 = vbcast.lane.c.b16.xlu1 %v922_v14, 272  ;;  %924 = vbcast.lane.c.b16.xlu0 %v922_v14, 256 }
  0xa5   : > { %936 = vbcast.lane.c.b16.xlu1 %v922_v14, 304  ;;  %932 = vbcast.lane.c.b16.xlu0 %v922_v14, 288 }
  0xa9   : > { %944 = vbcast.lane.c.b16.xlu1 %v922_v14, 336  ;;  %940 = vbcast.lane.c.b16.xlu0 %v922_v14, 320 }
  0xad   : > { %952 = vbcast.lane.c.b16.xlu1 %v922_v14, 368  ;;  %948 = vbcast.lane.c.b16.xlu0 %v922_v14, 352 }
  0xb1   : > { %966 = vbcast.lane.c.b16.xlu1 %v960_v17, 272  ;;  %962 = vbcast.lane.c.b16.xlu0 %v960_v17, 256 }
  0xb5   : > { %974 = vbcast.lane.c.b16.xlu1 %v960_v17, 304  ;;  %970 = vbcast.lane.c.b16.xlu0 %v960_v17, 288 }
  0xb9   : > { %982 = vbcast.lane.c.b16.xlu1 %v960_v17, 336  ;;  %978 = vbcast.lane.c.b16.xlu0 %v960_v17, 320 }
  0xbd   : > { %990 = vbcast.lane.c.b16.xlu1 %v960_v17, 368  ;;  %986 = vbcast.lane.c.b16.xlu0 %v960_v17, 352 }
  0xc1   : > { %1004 = vbcast.lane.c.b16.xlu1 %v998_v20, 272  ;;  %1000 = vbcast.lane.c.b16.xlu0 %v998_v20, 256 }
  0xc5   : > { %1012 = vbcast.lane.c.b16.xlu1 %v998_v20, 304  ;;  %1008 = vbcast.lane.c.b16.xlu0 %v998_v20, 288 }
  0xc9   : > { %1020 = vbcast.lane.c.b16.xlu1 %v998_v20, 336  ;;  %1016 = vbcast.lane.c.b16.xlu0 %v998_v20, 320 }
  0xcd   : > { %1028 = vbcast.lane.c.b16.xlu1 %v998_v20, 368  ;;  %1024 = vbcast.lane.c.b16.xlu0 %v998_v20, 352 }
  0xd1   : > { %1042 = vbcast.lane.c.b16.xlu1 %v1036_v23, 272  ;;  %1038 = vbcast.lane.c.b16.xlu0 %v1036_v23, 256 }
  0xd5   : > { %1050 = vbcast.lane.c.b16.xlu1 %v1036_v23, 304  ;;  %1046 = vbcast.lane.c.b16.xlu0 %v1036_v23, 288 }
  0xd9   : > { %1058 = vbcast.lane.c.b16.xlu1 %v1036_v23, 336  ;;  %1054 = vbcast.lane.c.b16.xlu0 %v1036_v23, 320 }
  0xdd   : > { %1066 = vbcast.lane.c.b16.xlu1 %v1036_v23, 368  ;;  %1062 = vbcast.lane.c.b16.xlu0 %v1036_v23, 352 }
  0xe1   : > { %1080 = vbcast.lane.c.b16.xlu1 %v1074_v26, 272  ;;  %1076 = vbcast.lane.c.b16.xlu0 %v1074_v26, 256 }
  0xe5   : > { %1088 = vbcast.lane.c.b16.xlu1 %v1074_v26, 304  ;;  %1084 = vbcast.lane.c.b16.xlu0 %v1074_v26, 288 }
  0xe9   : > { %1096 = vbcast.lane.c.b16.xlu1 %v1074_v26, 336  ;;  %1092 = vbcast.lane.c.b16.xlu0 %v1074_v26, 320 }
  0xed   : > { %1104 = vbcast.lane.c.b16.xlu1 %v1074_v26, 368  ;;  %1100 = vbcast.lane.c.b16.xlu0 %v1074_v26, 352 }
  0xf1   : > { %1118 = vbcast.lane.c.b16.xlu1 %v1112_v35, 272  ;;  %1114 = vbcast.lane.c.b16.xlu0 %v1112_v35, 256 }
  0xf3   : > { %v857_v38 = vpop.permute.xlu1 %856  ;;  %v849_v39 = vpop.permute.xlu0 %848 }
  0xf4   : > { %v2246_v42 = vrot.slane %v849_v39, %v8848_v36  ;;  %v2253_v43 = vrot.slane %v849_v39, %v8851_v37  ;;  %v2274_v47 = vrot.slane %v857_v38, %v8848_v36  ;;  %v2281_v50 = vrot.slane %v857_v38, %v8851_v37 }
  0xf5   : > { %1126 = vbcast.lane.c.b16.xlu1 %v1112_v35, 304  ;;  %1122 = vbcast.lane.c.b16.xlu0 %v1112_v35, 288 }
  0xf6   : > { %v6336_v44 = vmul.bf16 %v2246_v42, %v316_v40  ;;  %v6337_v45 = vmul.bf16 %v2253_v43, %v317_v41  ;;  %v6340_v59 = vmul.bf16 %v2274_v47, %v320_v46  ;;  %v6341_v3 = vmul.bf16 %v2281_v50, %v321_v58  ;;  %v327_v42 = vld [vmem:[%s8783_s8 + $0x2c] sm:$0xf] }
  0xf7   : > { %v861_v48 = vpop.permute.xlu1 %860  ;;  %v853_v49 = vpop.permute.xlu0 %852 }
  0xf8   : > { %v6849_v54 = vunpack.c.l.bf16 %v6336_v44  ;;  %v6850_v55 = vunpack.c.l.bf16 %v6337_v45  ;;  %v2260_v56 = vrot.slane %v853_v49, %v8848_v36  ;;  %v2267_v57 = vrot.slane %v853_v49, %v8851_v37 }
  0xf9   : > { %1134 = vbcast.lane.c.b16.xlu1 %v1112_v35, 336  ;;  %1130 = vbcast.lane.c.b16.xlu0 %v1112_v35, 320  ;;  %v2288_v60 = vrot.slane %v861_v48, %v8848_v36  ;;  %v2295_v7 = vrot.slane %v861_v48, %v8851_v37  ;;  %v6853_v11 = vunpack.c.l.bf16 %v6340_v59  ;;  %v6854_v20 = vunpack.c.l.bf16 %v6341_v3 }
  0xfa   : > { %v6338_v61 = vmul.bf16 %v2260_v56, %v318_v51  ;;  %v6339_v62 = vmul.bf16 %v2267_v57, %v319_v52  ;;  %v7361_v6 = vadd.f32 %v6850_v55, %v6849_v54  ;;  %v328_v54 = vld [vmem:[%s8783_s8 + $0x30] sm:$0xf] }
  0xfb   : > { %v869_v63 = vpop.permute.xlu1 %868  ;;  %v865_v0 = vpop.permute.xlu0 %864  ;;  %v6342_v12 = vmul.bf16 %v2288_v60, %v322_v1  ;;  %v6343_v21 = vmul.bf16 %v2295_v7, %v323_v10  ;;  %v331_v7 = vld [vmem:[%s8783_s8 + $0x3c] sm:$0xf] }
  0xfc   : > { %v6851_v8 = vunpack.c.l.bf16 %v6338_v61  ;;  %v6852_v14 = vunpack.c.l.bf16 %v6339_v62  ;;  %v2302_v24 = vrot.slane %v865_v0, %v8848_v36  ;;  %v2316_v26 = vrot.slane %v869_v63, %v8848_v36  ;;  %v330_v61 = vld [vmem:[%s8783_s8 + $0x38] sm:$0xf]  ;;  %v329_v62 = vld [vmem:[%s8783_s8 + $0x34] sm:$0xf] }
  0xfd   : > { %1142 = vbcast.lane.c.b16.xlu1 %v1112_v35, 368  ;;  %1138 = vbcast.lane.c.b16.xlu0 %v1112_v35, 352  ;;  %v6855_v28 = vunpack.c.l.bf16 %v6342_v12  ;;  %v2309_v31 = vrot.slane %v865_v0, %v8851_v37  ;;  %v325_v35 = vld [vmem:[%s8783_s8 + $0x24] sm:$0xf]  ;;  %v6856_v38 = vunpack.c.l.bf16 %v6343_v21  ;;  %v2323_v40 = vrot.slane %v869_v63, %v8851_v37 }
  0xfe   : > { %v7362_v15 = vadd.f32 %v7361_v6, %v6851_v8  ;;  %v6344_v41 = vmul.bf16 %v2302_v24, %v324_v27  ;;  %v6346_v43 = vmul.bf16 %v2316_v26, %v326_v30  ;;  %v8910_v63 = vrot.slane %v8818_v9, %v8863_v53 }
  0xff   : > { %v877_v17 = vpop.permute.xlu1 %876  ;;  %v873_v18 = vpop.permute.xlu0 %872  ;;  %v6345_v44 = vmul.bf16 %v2309_v31, %v325_v35  ;;  %v6347_v48 = vmul.bf16 %v2323_v40, %v327_v42  ;;  %v8929_v24 = vrot.slane %v8823_v13, %v8863_v53 }
 0x100   : > { %v7363_v23 = vadd.f32 %v7362_v15, %v6852_v14  ;;  %v6857_v49 = vunpack.c.l.bf16 %v6344_v41  ;;  %v2330_v51 = vrot.slane %v873_v18, %v8848_v36  ;;  %v6859_v52 = vunpack.c.l.bf16 %v6346_v43  ;;  %v338_v43 = vld [vmem:[%s8783_s8 + $0x58] sm:$0xf] }
 0x101   : > { %1153 = vbcast.lane.c.b16.xlu1 %v8872_v2, 272  ;;  %1149 = vbcast.lane.c.b16.xlu0 %v8872_v2, 256  ;;  %v6858_v55 = vunpack.c.l.bf16 %v6345_v44  ;;  %v2344_v57 = vrot.slane %v877_v17, %v8848_v36  ;;  %v2337_v58 = vrot.slane %v873_v18, %v8851_v37  ;;  %v6860_v0 = vunpack.c.l.bf16 %v6347_v48 }
 0x102   : > { %v7364_v29 = vadd.f32 %v7363_v23, %v6853_v11  ;;  %v2351_v3 = vrot.slane %v877_v17, %v8851_v37  ;;  %v6348_v6 = vmul.bf16 %v2330_v51, %v328_v54  ;;  %v334_v23 = vld [vmem:[%s8783_s8 + $0x48] sm:$0xf] }
 0x103   : > { %v8883_v33 = vpop.permute.xlu1 %890  ;;  %v8885_v34 = vpop.permute.xlu0 %886  ;;  %v6350_v10 = vmul.bf16 %v2344_v57, %v330_v61  ;;  %v6349_v11 = vmul.bf16 %v2337_v58, %v329_v62  ;;  %v8976_v57 = vrot.slane %v8839_v25, %v8863_v53  ;;  %v337_v62 = vld [vmem:[%s8783_s8 + $0x54] sm:$0xf]  ;;  %v367_v25 = vld [vmem:[%s8783_s8 + $0xcc] sm:$0xf] }
 0x104   : > { %v7365_v39 = vadd.f32 %v7364_v29, %v6854_v20  ;;  %v2372_v15 = vrot.slane %v8883_v33, %v8848_v36  ;;  %v2358_v17 = vrot.slane %v8885_v34, %v8848_v36  ;;  %v6351_v18 = vmul.bf16 %v2351_v3, %v331_v7 }
 0x105   : > { %1161 = vbcast.lane.c.b16.xlu1 %v8872_v2, 304  ;;  %1157 = vbcast.lane.c.b16.xlu0 %v8872_v2, 288  ;;  %v6861_v20 = vunpack.c.l.bf16 %v6348_v6  ;;  %v2379_v26 = vrot.slane %v8883_v33, %v8851_v37  ;;  %v2365_v27 = vrot.slane %v8885_v34, %v8851_v37  ;;  %v8942_v29 = vrot.slane %v8831_v19, %v8863_v53 }
 0x106   : > { %v7366_v45 = vadd.f32 %v7365_v39, %v6855_v28  ;;  %v8938_v28 = vrot.slane %v8827_v16, %v8863_v53  ;;  %v6863_v30 = vunpack.c.l.bf16 %v6350_v10  ;;  %v6862_v31 = vunpack.c.l.bf16 %v6349_v11  ;;  %v333_v39 = vld [vmem:[%s8783_s8 + $0x44] sm:$0xf]  ;;  %v342_v10 = vld [vmem:[%s8783_s8 + $0x68] sm:$0xf] }
 0x107   : > { %v8892_v46 = vpop.permute.xlu1 %898  ;;  %v8894_v47 = vpop.permute.xlu0 %894  ;;  %v8952_v41 = vmul.bf16 %v2372_v15, %v334_v23  ;;  %v6864_v48 = vunpack.c.l.bf16 %v6351_v18 }
 0x108   : > { %v7367_v50 = vadd.f32 %v7366_v45, %v6856_v38  ;;  %v335_v38 = vld [vmem:[%s8783_s8 + $0x4c] sm:$0xf]  ;;  %v2400_v33 = vrot.slane %v8892_v46, %v8848_v36  ;;  %v2407_v44 = vrot.slane %v8892_v46, %v8851_v37  ;;  %v8958_v45 = vsub.s32 2, %v8809_v4 }
 0x109   : > { %1169 = vbcast.lane.c.b16.xlu1 %v8872_v2, 336  ;;  %1165 = vbcast.lane.c.b16.xlu0 %v8872_v2, 320  ;;  %v2386_v51 = vrot.slane %v8894_v47, %v8848_v36  ;;  %v8968_v54 = vmul.bf16 %v2379_v26, %v335_v38  ;;  %v6353_v46 = vmul.bf16 %v2365_v27, %v333_v39  ;;  %v6867_v6 = vunpack.c.l.bf16 %v8952_v41  ;;  %v340_v26 = vld [vmem:[%s8783_s8 + $0x60] sm:$0xf] }
 0x10a   : > { %v7368_v56 = vadd.f32 %v7367_v50, %v6857_v49  ;;  %v339_v50 = vld [vmem:[%s8783_s8 + $0x5c] sm:$0xf]  ;;  %v8978_v61 = vmul.bf16 %v2400_v33, %v338_v43  ;;  %v8997_v11 = vrot.slane %v8811_v5, %v8958_v45  ;;  %v344_v43 = vld [vmem:[%s8783_s8 + $0x70] sm:$0xf] }
 0x10b   : > { %v8902_v59 = vpop.permute.xlu1 %906  ;;  %v8904_v60 = vpop.permute.xlu0 %902 }
 0x10c   : > { %v7369_v1 = vadd.f32 %v7368_v56, %v6858_v55  ;;  %v336_v55 = vld [vmem:[%s8783_s8 + $0x50] sm:$0xf]  ;;  %v2393_v56 = vrot.slane %v8894_v47, %v8851_v37  ;;  %v8989_v47 = vrot.slane %v8843_v32, %v8863_v53  ;;  %12239 = vst [vmem:[#allocation33_spill] sm:$0xff] %v8997_v11  ;;  %v2435_v18 = vrot.slane %v8902_v59, %v8851_v37 }
 0x10d   : > { %1177 = vbcast.lane.c.b16.xlu1 %v8872_v2, 368  ;;  %1173 = vbcast.lane.c.b16.xlu0 %v8872_v2, 352  ;;  %v332_v2 = vld [vmem:[%s8783_s8 + $0x40] sm:$0xf]  ;;  %v2421_v27 = vrot.slane %v8904_v60, %v8851_v37 }
 0x10e   : > { %v7370_v8 = vadd.f32 %v7369_v1, %v6859_v52  ;;  %v6352_v42 = vmul.bf16 %v2358_v17, %v332_v2  ;;  %v8966_v52 = vrot.slane %v8835_v22, %v8863_v53  ;;  %12238 = vst [vmem:[#allocation32_spill] sm:$0xff] %v8989_v47  ;;  %v6356_v17 = vmul.bf16 %v2386_v51, %v336_v55  ;;  %v343_v2 = vld [vmem:[%s8783_s8 + $0x6c] sm:$0xf]  ;;  %v345_v55 = vld [vmem:[%s8783_s8 + $0x74] sm:$0xf] }
 0x10f   : > { %v8916_v12 = vpop.permute.xlu1 %914  ;;  %v8918_v14 = vpop.permute.xlu0 %910  ;;  %v2414_v53 = vrot.slane %v8904_v60, %v8848_v36  ;;  %v9005_v23 = vmul.bf16 %v2393_v56, %v337_v62  ;;  %v346_v60 = vld [vmem:[%s8783_s8 + $0x78] sm:$0xf]  ;;  %v9031_v51 = vmul.bf16 %v2435_v18, %v343_v2  ;;  %v387_v47 = vld [vmem:[%s8783_s8 + $0x11c] sm:$0xf] }
 0x110   : > { %v7371_v21 = vadd.f32 %v7370_v8, %v6860_v0  ;;  %v2428_v0 = vrot.slane %v8902_v59, %v8848_v36  ;;  %v6865_v7 = vunpack.c.l.bf16 %v6352_v42  ;;  %v8992_v8 = vmul.bf16 %v2407_v44, %v339_v50 }
 0x111   : > { %1188 = vbcast.lane.c.b16.xlu1 %v8910_v63, 272  ;;  %1184 = vbcast.lane.c.b16.xlu0 %v8910_v63, 256  ;;  %v2456_v38 = vrot.slane %v8916_v12, %v8848_v36  ;;  %v2463_v42 = vrot.slane %v8916_v12, %v8851_v37  ;;  %v2442_v44 = vrot.slane %v8918_v14, %v8848_v36  ;;  %v6869_v50 = vunpack.c.l.bf16 %v6356_v17 }
 0x112   : > { %v7372_v35 = vadd.f32 %v7371_v21, %v6861_v20  ;;  %v6868_v20 = vunpack.c.l.bf16 %v8968_v54  ;;  %v6866_v21 = vunpack.c.l.bf16 %v6353_v46  ;;  %v6872_v41 = vunpack.c.l.bf16 %v8992_v8  ;;  %v347_v46 = vld [vmem:[%s8783_s8 + $0x7c] sm:$0xf] }
 0x113   : > { %v8948_v34 = vpop.permute.xlu1 %928  ;;  %v8950_v40 = vpop.permute.xlu0 %924  ;;  %v9033_v54 = vmul.bf16 %v2414_v53, %v340_v26  ;;  %v6870_v12 = vunpack.c.l.bf16 %v9005_v23  ;;  %v363_v8 = vld [vmem:[%s8783_s8 + $0xbc] sm:$0xf] }
 0x114   : > { %v7373_v49 = vadd.f32 %v7372_v35, %v6862_v31  ;;  %v9013_v31 = vmul.bf16 %v2428_v0, %v342_v10  ;;  %v341_v35 = vld [vmem:[%s8783_s8 + $0x64] sm:$0xf]  ;;  %v350_v10 = vld [vmem:[%s8783_s8 + $0x88] sm:$0xf]  ;;  %v2470_v17 = vrot.slane %v8950_v40, %v8848_v36  ;;  %v2477_v23 = vrot.slane %v8950_v40, %v8851_v37  ;;  %v354_v40 = vld [vmem:[%s8783_s8 + $0x98] sm:$0xf] }
 0x115   : > { %1196 = vbcast.lane.c.b16.xlu1 %v8910_v63, 304  ;;  %1192 = vbcast.lane.c.b16.xlu0 %v8910_v63, 288  ;;  %v9039_v56 = vmul.bf16 %v2421_v27, %v341_v35  ;;  %v6873_v27 = vunpack.c.l.bf16 %v9033_v54 }
 0x116   : > { %v7374_v58 = vadd.f32 %v7373_v49, %v6863_v30  ;;  %v6871_v30 = vunpack.c.l.bf16 %v8978_v61  ;;  %v356_v61 = vld [vmem:[%s8783_s8 + $0xa0] sm:$0xf] }
 0x117   : > { %v8983_v1 = vpop.permute.xlu1 %936  ;;  %v8985_v3 = vpop.permute.xlu0 %932 }
 0x118   : > { %v7375_v15 = vadd.f32 %v7374_v58, %v6864_v48  ;;  %v2449_v48 = vrot.slane %v8918_v14, %v8851_v37  ;;  %v2484_v14 = vrot.slane %v8948_v34, %v8848_v36  ;;  %v2491_v58 = vrot.slane %v8948_v34, %v8851_v37 }
 0x119   : > { %1204 = vbcast.lane.c.b16.xlu1 %v8910_v63, 336  ;;  %1200 = vbcast.lane.c.b16.xlu0 %v8910_v63, 320  ;;  %v9059_v34 = vmul.bf16 %v2442_v44, %v344_v43  ;;  %v2512_v35 = vrot.slane %v8983_v1, %v8848_v36  ;;  %v2498_v54 = vrot.slane %v8985_v3, %v8848_v36  ;;  %v359_v44 = vld [vmem:[%s8783_s8 + $0xac] sm:$0xf] }
 0x11a   : > { %v7376_v59 = vadd.f32 %v7375_v15, %v6865_v7  ;;  %v9047_v7 = vmul.bf16 %v2456_v38, %v346_v60  ;;  %v351_v15 = vld [vmem:[%s8783_s8 + $0x8c] sm:$0xf]  ;;  %v9073_v60 = vmul.bf16 %v2484_v14, %v350_v10  ;;  %v357_v14 = vld [vmem:[%s8783_s8 + $0xa4] sm:$0xf] }
 0x11b   : > { %v9018_v39 = vpop.permute.xlu1 %944  ;;  %v9020_v33 = vpop.permute.xlu0 %940 }
 0x11c   : > { %v7377_v49 = vadd.f32 %v7376_v59, %v6866_v21  ;;  %v9057_v21 = vmul.bf16 %v2463_v42, %v347_v46  ;;  %v349_v59 = vld [vmem:[%s8783_s8 + $0x84] sm:$0xf]  ;;  %v9075_v42 = vmul.bf16 %v2491_v58, %v351_v15  ;;  %v9097_v15 = vmul.bf16 %v2512_v35, %v354_v40  ;;  %v362_v58 = vld [vmem:[%s8783_s8 + $0xb8] sm:$0xf] }
 0x11d   : > { %1212 = vbcast.lane.c.b16.xlu1 %v8910_v63, 368  ;;  %1208 = vbcast.lane.c.b16.xlu0 %v8910_v63, 352  ;;  %v9061_v63 = vmul.bf16 %v2449_v48, %v345_v55  ;;  %v2540_v35 = vrot.slane %v9018_v39, %v8848_v36 }
 0x11e   : > { %v7378_v62 = vadd.f32 %v7377_v49, %v6867_v6  ;;  %v348_v6 = vld [vmem:[%s8783_s8 + $0x80] sm:$0xf]  ;;  %v355_v49 = vld [vmem:[%s8783_s8 + $0x9c] sm:$0xf] }
 0x11f   : > { %v9053_v18 = vpop.permute.xlu1 %952  ;;  %v9055_v53 = vpop.permute.xlu0 %948  ;;  %v9082_v48 = vmul.bf16 %v2470_v17, %v348_v6  ;;  %v2505_v17 = vrot.slane %v8985_v3, %v8851_v37  ;;  %v9104_v6 = vrot.slane %v8818_v9, %v8958_v45  ;;  %v381_v9 = vld [vmem:[%s8783_s8 + $0x104] sm:$0xf] }
 0x120   : > { %v7379_v2 = vadd.f32 %v7378_v62, %v6868_v20  ;;  %v2519_v20 = vrot.slane %v8983_v1, %v8851_v37  ;;  %v352_v62 = vld [vmem:[%s8783_s8 + $0x90] sm:$0xf]  ;;  %v2575_v1 = vrot.slane %v9053_v18, %v8851_v37 }
 0x121   : > { %1223 = vbcast.lane.c.b16.xlu1 %v8929_v24, 272  ;;  %1219 = vbcast.lane.c.b16.xlu0 %v8929_v24, 256  ;;  %12240 = vst [vmem:[#allocation34_spill] sm:$0xff] %v9104_v6 }
 0x122   : > { %v7380_v43 = vadd.f32 %v7379_v2, %v6869_v50  ;;  %v9094_v50 = vmul.bf16 %v2477_v23, %v349_v59  ;;  %v9108_v59 = vmul.bf16 %v2519_v20, %v355_v49  ;;  %v358_v2 = vld [vmem:[%s8783_s8 + $0xa8] sm:$0xf]  ;;  %v2547_v20 = vrot.slane %v9018_v39, %v8851_v37 }
 0x123   : > { %v9087_v46 = vpop.permute.xlu1 %966  ;;  %v9089_v55 = vpop.permute.xlu0 %962  ;;  %v9146_v26 = vmul.bf16 %v2540_v35, %v358_v2  ;;  %v9176_v32 = vmul.bf16 %v2575_v1, %v363_v8  ;;  %v364_v1 = vld [vmem:[%s8783_s8 + $0xc0] sm:$0xf] }
 0x124   : > { %v7381_v10 = vadd.f32 %v7380_v43, %v6870_v12  ;;  %v353_v12 = vld [vmem:[%s8783_s8 + $0x94] sm:$0xf]  ;;  %v9117_v43 = vmul.bf16 %v2498_v54, %v352_v62  ;;  %v2533_v54 = vrot.slane %v9020_v33, %v8851_v37  ;;  %v2568_v62 = vrot.slane %v9053_v18, %v8848_v36 }
 0x125   : > { %1231 = vbcast.lane.c.b16.xlu1 %v8929_v24, 304  ;;  %1227 = vbcast.lane.c.b16.xlu0 %v8929_v24, 288  ;;  %v9138_v40 = vmul.bf16 %v2505_v17, %v353_v12  ;;  %v2561_v17 = vrot.slane %v9055_v53, %v8851_v37  ;;  %v2596_v2 = vrot.slane %v9087_v46, %v8848_v36 }
 0x126   : > { %v7382_v3 = vadd.f32 %v7381_v10, %v6871_v30  ;;  %v2526_v30 = vrot.slane %v9020_v33, %v8848_v36  ;;  %v360_v10 = vld [vmem:[%s8783_s8 + $0xb0] sm:$0xf]  ;;  %v361_v33 = vld [vmem:[%s8783_s8 + $0xb4] sm:$0xf]  ;;  %v2582_v22 = vrot.slane %v9089_v55, %v8848_v36 }
 0x127   : > { %v9122_v49 = vpop.permute.xlu1 %974  ;;  %v9124_v23 = vpop.permute.xlu0 %970 }
 0x128   : > { %v7383_v39 = vadd.f32 %v7382_v3, %v6872_v41  ;;  %v2554_v41 = vrot.slane %v9055_v53, %v8848_v36  ;;  %v9155_v3 = vmul.bf16 %v2547_v20, %v359_v44  ;;  %v9165_v38 = vmul.bf16 %v2526_v30, %v356_v61  ;;  %v365_v30 = vld [vmem:[%s8783_s8 + $0xc4] sm:$0xf] }
 0x129   : > { %1239 = vbcast.lane.c.b16.xlu1 %v8929_v24, 336  ;;  %1235 = vbcast.lane.c.b16.xlu0 %v8929_v24, 320  ;;  %v9167_v53 = vmul.bf16 %v2533_v54, %v357_v14  ;;  %v2603_v44 = vrot.slane %v9087_v46, %v8851_v37  ;;  %v12241_v20 = vunpack.c.l.bf16 %v9039_v56  ;;  %v2589_v61 = vrot.slane %v9089_v55, %v8851_v37 }
 0x12a   : > { %v7384_v12 = vadd.f32 %v7383_v39, %v6873_v27  ;;  %v9169_v27 = vmul.bf16 %v2568_v62, %v362_v58  ;;  %v366_v39 = vld [vmem:[%s8783_s8 + $0xc8] sm:$0xf]  ;;  %v9186_v46 = vmul.bf16 %v2554_v41, %v360_v10  ;;  %v9188_v56 = vmul.bf16 %v2561_v17, %v361_v33  ;;  %v370_v17 = vld [vmem:[%s8783_s8 + $0xd8] sm:$0xf]  ;;  %v369_v41 = vld [vmem:[%s8783_s8 + $0xd4] sm:$0xf] }
 0x12b   : > { %v9161_v35 = vpop.permute.xlu1 %982  ;;  %v9163_v0 = vpop.permute.xlu0 %978  ;;  %v12242_v54 = vunpack.c.l.bf16 %v9013_v31  ;;  %v9196_v8 = vmul.bf16 %v2596_v2, %v366_v39  ;;  %v9207_v31 = vmul.bf16 %v2603_v44, %v367_v25  ;;  %v9215_v55 = vmul.bf16 %v2589_v61, %v365_v30  ;;  %v371_v30 = vld [vmem:[%s8783_s8 + $0xdc] sm:$0xf] }
 0x12c   : > { %v7385_v18 = vadd.f32 %v7384_v12, %v12241_v20  ;;  %v2624_v12 = vrot.slane %v9122_v49, %v8848_v36  ;;  %v2631_v44 = vrot.slane %v9122_v49, %v8851_v37  ;;  %v9235_v25 = vrot.slane %v8823_v13, %v8958_v45  ;;  %v383_v13 = vld [vmem:[%s8783_s8 + $0x10c] sm:$0xf] }
 0x12d   : > { %1247 = vbcast.lane.c.b16.xlu1 %v8929_v24, 368  ;;  %1243 = vbcast.lane.c.b16.xlu0 %v8929_v24, 352  ;;  %v382_v24 = vld [vmem:[%s8783_s8 + $0x108] sm:$0xf]  ;;  %v2652_v14 = vrot.slane %v9161_v35, %v8848_v36 }
 0x12e   : > { %v7386_v62 = vadd.f32 %v7385_v18, %v12242_v54  ;;  %v12243_v18 = vunpack.c.l.bf16 %v9031_v51  ;;  %v9213_v54 = vmul.bf16 %v2582_v22, %v364_v1  ;;  %v2610_v51 = vrot.slane %v9124_v23, %v8848_v36  ;;  %12245 = vst [vmem:[#allocation35_spill] sm:$0xff] %v9235_v25 }
 0x12f   : > { %v9200_v20 = vpop.permute.xlu1 %990  ;;  %v9202_v10 = vpop.permute.xlu0 %986  ;;  %v12244_v22 = vunpack.c.l.bf16 %v9059_v34  ;;  %v2617_v34 = vrot.slane %v9124_v23, %v8851_v37  ;;  %v9252_v23 = vmul.bf16 %v2631_v44, %v371_v30 }
 0x130   : > { %v7387_v2 = vadd.f32 %v7386_v62, %v12243_v18  ;;  %v9229_v62 = vmul.bf16 %v2624_v12, %v370_v17  ;;  %v368_v18 = vld [vmem:[%s8783_s8 + $0xd0] sm:$0xf]  ;;  %v380_v17 = vld [vmem:[%s8783_s8 + $0x100] sm:$0xf] }
 0x131   : > { %1258 = vbcast.lane.c.b16.xlu1 %v8938_v28, 272  ;;  %1254 = vbcast.lane.c.b16.xlu0 %v8938_v28, 256  ;;  %12247 = vst [vmem:[#allocation36_spill] sm:$0xff] %v9252_v23  ;;  %v9254_v5 = vmul.bf16 %v2610_v51, %v368_v18  ;;  %v9263_v51 = vmul.bf16 %v2617_v34, %v369_v41  ;;  %v375_v34 = vld [vmem:[%s8783_s8 + $0xec] sm:$0xf] }
 0x132   : > { %v7388_v61 = vadd.f32 %v7387_v2, %v12244_v22  ;;  %v12246_v22 = vunpack.c.l.bf16 %v9061_v63  ;;  %v12248_v63 = vunpack.c.l.bf16 %v9047_v7  ;;  %v2659_v18 = vrot.slane %v9161_v35, %v8851_v37 }
 0x133   : > { %v1005_v39 = vpop.permute.xlu1 %1004  ;;  %v1001_v49 = vpop.permute.xlu0 %1000  ;;  %v12249_v7 = vunpack.c.l.bf16 %v9057_v21  ;;  %v12250_v21 = vunpack.c.l.bf16 %v9082_v48 }
 0x134   : > { %v2708_v2 = vrot.slane %v1005_v39, %v8848_v36  ;;  %v2715_v12 = vrot.slane %v1005_v39, %v8851_v37  ;;  %v7389_v1 = vadd.f32 %v7388_v61, %v12246_v22  ;;  %v2694_v58 = vrot.slane %v1001_v49, %v8848_v36 }
 0x135   : > { %1266 = vbcast.lane.c.b16.xlu1 %v8938_v28, 304  ;;  %v2701_v19 = vrot.slane %v1001_v49, %v8851_v37  ;;  %1262 = vbcast.lane.c.b16.xlu0 %v8938_v28, 288 }
 0x136   : > { %v6402_v39 = vmul.bf16 %v2708_v2, %v382_v24  ;;  %v7390_v61 = vadd.f32 %v7389_v1, %v12248_v63  ;;  %v6400_v33 = vmul.bf16 %v2694_v58, %v380_v17  ;;  %v374_v24 = vld [vmem:[%s8783_s8 + $0xe8] sm:$0xf]  ;;  %v6403_v49 = vmul.bf16 %v2715_v12, %v383_v13  ;;  %v384_v58 = vld [vmem:[%s8783_s8 + $0x110] sm:$0xf] }
 0x137   : > { %v1013_v44 = vpop.permute.xlu1 %1012  ;;  %v1009_v30 = vpop.permute.xlu0 %1008  ;;  %v6401_v2 = vmul.bf16 %v2701_v19, %v381_v9  ;;  %v2638_v63 = vrot.slane %v9163_v0, %v8848_v36  ;;  %v9282_v17 = vmul.bf16 %v2652_v14, %v374_v24  ;;  %v12251_v14 = vunpack.c.l.bf16 %v9094_v50 }
 0x138   : > { %v7391_v1 = vadd.f32 %v7390_v61, %v12249_v7  ;;  %v6913_v22 = vunpack.c.l.bf16 %v6400_v33  ;;  %v2722_v41 = vrot.slane %v1009_v30, %v8848_v36  ;;  %v6915_v35 = vunpack.c.l.bf16 %v6402_v39  ;;  %v372_v61 = vld [vmem:[%s8783_s8 + $0xe0] sm:$0xf]  ;;  %v386_v39 = vld [vmem:[%s8783_s8 + $0x118] sm:$0xf] }
 0x139   : > { %1274 = vbcast.lane.c.b16.xlu1 %v8938_v28, 336  ;;  %v6914_v13 = vunpack.c.l.bf16 %v6401_v2  ;;  %v2736_v9 = vrot.slane %v1013_v44, %v8848_v36  ;;  %v2729_v19 = vrot.slane %v1009_v30, %v8851_v37  ;;  %1270 = vbcast.lane.c.b16.xlu0 %v8938_v28, 320  ;;  %v2645_v7 = vrot.slane %v9163_v0, %v8851_v37  ;;  %v385_v2 = vld [vmem:[%s8783_s8 + $0x114] sm:$0xf]  ;;  %v373_v30 = vld [vmem:[%s8783_s8 + $0xe4] sm:$0xf] }
 0x13a   : > { %v7392_v12 = vadd.f32 %v7391_v1, %v12250_v21  ;;  %v6916_v6 = vunpack.c.l.bf16 %v6403_v49  ;;  %v2743_v48 = vrot.slane %v1013_v44, %v8851_v37  ;;  %v6404_v1 = vmul.bf16 %v2722_v41, %v384_v58 }
 0x13b   : > { %v9289_v4 = vpop.permute.xlu1 %1020  ;;  %v9291_v25 = vpop.permute.xlu0 %1016  ;;  %v7430_v11 = vadd.f32 %v6914_v13, %v6913_v22  ;;  %v6901_v21 = vunpack.c.l.bf16 %v9254_v5  ;;  %v9299_v33 = vmul.bf16 %v2659_v18, %v375_v34  ;;  %v9303_v23 = vmul.bf16 %v2638_v63, %v372_v61 }
 0x13c   : > { %v7393_v24 = vadd.f32 %v7392_v12, %v12251_v14  ;;  %v6406_v22 = vmul.bf16 %v2736_v9, %v386_v39  ;;  %v6405_v13 = vmul.bf16 %v2729_v19, %v385_v2  ;;  %v12252_v50 = vunpack.c.l.bf16 %v9073_v60  ;;  %v388_v39 = vld [vmem:[%s8783_s8 + $0x120] sm:$0xf]  ;;  %v377_v14 = vld [vmem:[%s8783_s8 + $0xf4] sm:$0xf] }
 0x13d   : > { %1282 = vbcast.lane.c.b16.xlu1 %v8938_v28, 368  ;;  %v7431_v49 = vadd.f32 %v7430_v11, %v6915_v35  ;;  %1278 = vbcast.lane.c.b16.xlu0 %v8938_v28, 352  ;;  %v9309_v41 = vmul.bf16 %v2645_v7, %v373_v30  ;;  %v2680_v18 = vrot.slane %v9200_v20, %v8848_v36  ;;  %v378_v11 = vld [vmem:[%s8783_s8 + $0xf8] sm:$0xf]  ;;  %v6917_v9 = vunpack.c.l.bf16 %v6404_v1 }
 0x13e   : > { %v7394_v44 = vadd.f32 %v7393_v24, %v12252_v50  ;;  %v6407_v35 = vmul.bf16 %v2743_v48, %v387_v47  ;;  %v2750_v60 = vrot.slane %v9291_v25, %v8848_v36  ;;  %v12253_v19 = vunpack.c.l.bf16 %v9075_v42  ;;  %v390_v48 = vld [vmem:[%s8783_s8 + $0x128] sm:$0xf]  ;;  %v379_v24 = vld [vmem:[%s8783_s8 + $0xfc] sm:$0xf]  ;;  %v376_v50 = vld [vmem:[%s8783_s8 + $0xf0] sm:$0xf] }
 0x13f   : > { %v9313_v34 = vpop.permute.xlu1 %1028  ;;  %v9315_v63 = vpop.permute.xlu0 %1024  ;;  %v7432_v28 = vadd.f32 %v7431_v49, %v6916_v6  ;;  %v2687_v61 = vrot.slane %v9200_v20, %v8851_v37  ;;  %v2666_v7 = vrot.slane %v9202_v10, %v8848_v36  ;;  %v2764_v47 = vrot.slane %v9289_v4, %v8848_v36 }
 0x140   : > { %v7395_v12 = vadd.f32 %v7394_v44, %v12253_v19  ;;  %v6919_v6 = vunpack.c.l.bf16 %v6406_v22  ;;  %v6918_v2 = vunpack.c.l.bf16 %v6405_v13  ;;  %v2757_v42 = vrot.slane %v9291_v25, %v8851_v37  ;;  %v389_v13 = vld [vmem:[%s8783_s8 + $0x124] sm:$0xf] }
 0x141   : > { %1293 = vbcast.lane.c.b16.xlu1 %v8942_v29, 272  ;;  %v7433_v30 = vadd.f32 %v7432_v28, %v6917_v9  ;;  %1289 = vbcast.lane.c.b16.xlu0 %v8942_v29, 256  ;;  %v12254_v20 = vunpack.c.l.bf16 %v9117_v43  ;;  %v9338_v49 = vmul.bf16 %v2680_v18, %v378_v11  ;;  %v2673_v22 = vrot.slane %v9202_v10, %v8851_v37  ;;  %v391_v10 = vld [vmem:[%s8783_s8 + $0x12c] sm:$0xf] }
 0x142   : > { %v6920_v9 = vunpack.c.l.bf16 %v6407_v35  ;;  %v2771_v43 = vrot.slane %v9289_v4, %v8851_v37  ;;  %v6408_v19 = vmul.bf16 %v2750_v60, %v388_v39  ;;  %v6410_v58 = vmul.bf16 %v2764_v47, %v390_v48 }
 0x143   : > { %v7396_v1 = vadd.f32 %v7395_v12, %v12254_v20  ;;  %v9344_v44 = vpop.permute.xlu1 %1042  ;;  %v9346_v25 = vpop.permute.xlu0 %1038  ;;  %v7434_v28 = vadd.f32 %v7433_v30, %v6918_v2  ;;  %v12255_v12 = vunpack.c.l.bf16 %v9138_v40  ;;  %v9357_v0 = vmul.bf16 %v2687_v61, %v379_v24  ;;  %v392_v24 = vld [vmem:[%s8783_s8 + $0x130] sm:$0xf] }
 0x144   : > { %v9359_v35 = vmul.bf16 %v2666_v7, %v376_v50  ;;  %v6409_v60 = vmul.bf16 %v2757_v42, %v389_v13  ;;  %v12256_v40 = vunpack.c.l.bf16 %v9097_v15  ;;  %v2792_v47 = vrot.slane %v9313_v34, %v8848_v36 }
 0x145   : > { %v7397_v20 = vadd.f32 %v7396_v1, %v12255_v12  ;;  %1301 = vbcast.lane.c.b16.xlu1 %v8942_v29, 304  ;;  %v7435_v4 = vadd.f32 %v7434_v28, %v6919_v6  ;;  %1297 = vbcast.lane.c.b16.xlu0 %v8942_v29, 288  ;;  %v2778_v30 = vrot.slane %v9315_v63, %v8848_v36  ;;  %v6921_v42 = vunpack.c.l.bf16 %v6408_v19  ;;  %v394_v1 = vld [vmem:[%s8783_s8 + $0x138] sm:$0xf] }
 0x146   : > { %v9373_v6 = vmul.bf16 %v2673_v22, %v377_v14  ;;  %v6411_v48 = vmul.bf16 %v2771_v43, %v391_v10  ;;  %v12257_v50 = vunpack.c.l.bf16 %v9108_v59  ;;  %v6923_v28 = vunpack.c.l.bf16 %v6410_v58  ;;  %v395_v43 = vld [vmem:[%s8783_s8 + $0x13c] sm:$0xf] }
 0x147   : > { %v7398_v39 = vadd.f32 %v7397_v20, %v12256_v40  ;;  %v9369_v61 = vpop.permute.xlu1 %1050  ;;  %v9371_v7 = vpop.permute.xlu0 %1046  ;;  %v7436_v15 = vadd.f32 %v7435_v4, %v6920_v9  ;;  %v2799_v12 = vrot.slane %v9313_v34, %v8851_v37  ;;  %v2785_v20 = vrot.slane %v9315_v63, %v8851_v37  ;;  %v393_v9 = vld [vmem:[%s8783_s8 + $0x134] sm:$0xf]  ;;  %v399_v40 = vld [vmem:[%s8783_s8 + $0x14c] sm:$0xf] }
 0x148   : > { %v6922_v14 = vunpack.c.l.bf16 %v6409_v60  ;;  %v2820_v19 = vrot.slane %v9344_v44, %v8848_v36  ;;  %v2827_v59 = vrot.slane %v9344_v44, %v8851_v37  ;;  %v12258_v58 = vunpack.c.l.bf16 %v9165_v38  ;;  %v398_v60 = vld [vmem:[%s8783_s8 + $0x148] sm:$0xf] }
 0x149   : > { %v7399_v13 = vadd.f32 %v7398_v39, %v12257_v50  ;;  %1309 = vbcast.lane.c.b16.xlu1 %v8942_v29, 336  ;;  %v7437_v22 = vadd.f32 %v7436_v15, %v6921_v42  ;;  %1305 = vbcast.lane.c.b16.xlu0 %v8942_v29, 320  ;;  %v9394_v10 = vmul.bf16 %v2792_v47, %v394_v1  ;;  %v6924_v44 = vunpack.c.l.bf16 %v6411_v48 }
 0x14a   : > { %v6412_v4 = vmul.bf16 %v2778_v30, %v392_v24  ;;  %v2806_v38 = vrot.slane %v9346_v25, %v8848_v36  ;;  %v9408_v1 = vmul.bf16 %v2799_v12, %v395_v43  ;;  %v6413_v30 = vmul.bf16 %v2785_v20, %v393_v9  ;;  %v396_v24 = vld [vmem:[%s8783_s8 + $0x140] sm:$0xf] }
 0x14b   : > { %v7400_v34 = vadd.f32 %v7399_v13, %v12258_v58  ;;  %v9398_v39 = vpop.permute.xlu1 %1058  ;;  %v9400_v42 = vpop.permute.xlu0 %1054  ;;  %v7438_v50 = vadd.f32 %v7437_v22, %v6922_v14  ;;  %v12259_v13 = vunpack.c.l.bf16 %v9167_v53  ;;  %v9412_v2 = vmul.bf16 %v2820_v19, %v398_v60  ;;  %v397_v19 = vld [vmem:[%s8783_s8 + $0x144] sm:$0xf] }
 0x14c   : > { %v9414_v48 = vmul.bf16 %v2827_v59, %v399_v40  ;;  %v9419_v53 = vrot.slane %v8827_v16, %v8958_v45  ;;  %v12260_v12 = vunpack.c.l.bf16 %v9146_v26  ;;  %v6927_v20 = vunpack.c.l.bf16 %v9394_v10  ;;  %v402_v40 = vld [vmem:[%s8783_s8 + $0x158] sm:$0xf] }
 0x14d   : > { %v7401_v58 = vadd.f32 %v7400_v34, %v12259_v13  ;;  %1317 = vbcast.lane.c.b16.xlu1 %v8942_v29, 368  ;;  %v7439_v63 = vadd.f32 %v7438_v50, %v6923_v28  ;;  %1313 = vbcast.lane.c.b16.xlu0 %v8942_v29, 352  ;;  %v6925_v22 = vunpack.c.l.bf16 %v6412_v4  ;;  %v2813_v28 = vrot.slane %v9346_v25, %v8851_v37  ;;  %v403_v50 = vld [vmem:[%s8783_s8 + $0x15c] sm:$0xf] }
 0x14e   : > { %v6416_v59 = vmul.bf16 %v2806_v38, %v396_v24  ;;  %v2848_v34 = vrot.slane %v9369_v61, %v8848_v36  ;;  %v2855_v26 = vrot.slane %v9369_v61, %v8851_v37  ;;  %v12261_v10 = vunpack.c.l.bf16 %v9155_v3  ;;  %v400_v3 = vld [vmem:[%s8783_s8 + $0x150] sm:$0xf]  ;;  %v401_v24 = vld [vmem:[%s8783_s8 + $0x154] sm:$0xf] }
 0x14f   : > { %v7402_v14 = vadd.f32 %v7401_v58, %v12260_v12  ;;  %v9426_v43 = vpop.permute.xlu1 %1066  ;;  %v9428_v9 = vpop.permute.xlu0 %1062  ;;  %v7440_v29 = vadd.f32 %v7439_v63, %v6924_v44  ;;  %v6928_v25 = vunpack.c.l.bf16 %v9408_v1  ;;  %v6926_v60 = vunpack.c.l.bf16 %v6413_v30 }
 0x150   : > { %v2834_v63 = vrot.slane %v9371_v7, %v8848_v36  ;;  %v6931_v38 = vunpack.c.l.bf16 %v9412_v2  ;;  %v6932_v61 = vunpack.c.l.bf16 %v9414_v48  ;;  %v2841_v13 = vrot.slane %v9371_v7, %v8851_v37 }
 0x151   : > { %v7403_v4 = vadd.f32 %v7402_v14, %v12261_v10  ;;  %1328 = vbcast.lane.c.b16.xlu1 %v8966_v52, 272  ;;  %v7441_v44 = vadd.f32 %v7440_v29, %v6925_v22  ;;  %1324 = vbcast.lane.c.b16.xlu0 %v8966_v52, 256  ;;  %v12262_v58 = vunpack.c.l.bf16 %v9186_v46  ;;  %v6417_v30 = vmul.bf16 %v2813_v28, %v397_v19  ;;  %v406_v28 = vld [vmem:[%s8783_s8 + $0x168] sm:$0xf]  ;;  %v407_v19 = vld [vmem:[%s8783_s8 + $0x16c] sm:$0xf] }
 0x152   : > { %v2876_v12 = vrot.slane %v9398_v39, %v8848_v36  ;;  %v2883_v14 = vrot.slane %v9398_v39, %v8851_v37  ;;  %v6929_v10 = vunpack.c.l.bf16 %v6416_v59  ;;  %v9460_v47 = vmul.bf16 %v2848_v34, %v402_v40  ;;  %v405_v40 = vld [vmem:[%s8783_s8 + $0x164] sm:$0xf] }
 0x153   : > { %v7404_v1 = vadd.f32 %v7403_v4, %v12262_v58  ;;  %v9456_v22 = vpop.permute.xlu1 %1080  ;;  %v9458_v29 = vpop.permute.xlu0 %1076  ;;  %v7442_v7 = vadd.f32 %v7441_v44, %v6926_v60  ;;  %v9462_v46 = vmul.bf16 %v2855_v26, %v403_v50  ;;  %v12263_v4 = vunpack.c.l.bf16 %v9188_v56  ;;  %v404_v26 = vld [vmem:[%s8783_s8 + $0x160] sm:$0xf] }
 0x154   : > { %v9468_v15 = vmul.bf16 %v2834_v63, %v400_v3  ;;  %v2862_v39 = vrot.slane %v9400_v42, %v8848_v36  ;;  %v2869_v60 = vrot.slane %v9400_v42, %v8851_v37  ;;  %v9475_v34 = vmul.bf16 %v2841_v13, %v401_v24  ;;  %v410_v13 = vld [vmem:[%s8783_s8 + $0x178] sm:$0xf] }
 0x155   : > { %v7405_v58 = vadd.f32 %v7404_v1, %v12263_v4  ;;  %1336 = vbcast.lane.c.b16.xlu1 %v8966_v52, 304  ;;  %v7443_v59 = vadd.f32 %v7442_v7, %v6927_v20  ;;  %v2904_v56 = vrot.slane %v9426_v43, %v8848_v36  ;;  %v2911_v50 = vrot.slane %v9426_v43, %v8851_v37  ;;  %v411_v1 = vld [vmem:[%s8783_s8 + $0x17c] sm:$0xf] }
 0x156   : > { %1332 = vbcast.lane.c.b16.xlu0 %v8966_v52, 288  ;;  %v12264_v63 = vunpack.c.l.bf16 %v9169_v27  ;;  %v6930_v42 = vunpack.c.l.bf16 %v6417_v30  ;;  %v9486_v3 = vmul.bf16 %v2876_v12, %v406_v28  ;;  %v9488_v20 = vmul.bf16 %v2883_v14, %v407_v19 }
 0x157   : > { %v9492_v24 = vpop.permute.xlu1 %1088  ;;  %v9494_v7 = vpop.permute.xlu0 %1084  ;;  %v7444_v4 = vadd.f32 %v7443_v59, %v6928_v25  ;;  %v6935_v43 = vunpack.c.l.bf16 %v9460_v47  ;;  %v6936_v11 = vunpack.c.l.bf16 %v9462_v46  ;;  %v2890_v27 = vrot.slane %v9428_v9, %v8848_v36  ;;  %v426_v46 = vld [vmem:[%s8783_s8 + $0x1b8] sm:$0xf] }
 0x158   : > { %v7406_v44 = vadd.f32 %v7405_v58, %v12264_v63  ;;  %v12265_v30 = vunpack.c.l.bf16 %v9176_v32  ;;  %v6933_v14 = vunpack.c.l.bf16 %v9468_v15  ;;  %v9503_v28 = vmul.bf16 %v2862_v39, %v404_v26  ;;  %v408_v58 = vld [vmem:[%s8783_s8 + $0x170] sm:$0xf] }
 0x159   : > { %v9505_v19 = vmul.bf16 %v2869_v60, %v405_v40  ;;  %1344 = vbcast.lane.c.b16.xlu1 %v8966_v52, 336  ;;  %v7445_v25 = vadd.f32 %v7444_v4, %v6929_v10  ;;  %v6934_v59 = vunpack.c.l.bf16 %v9475_v34  ;;  %v9510_v63 = vmul.bf16 %v2904_v56, %v410_v13  ;;  %v409_v56 = vld [vmem:[%s8783_s8 + $0x174] sm:$0xf]  ;;  %v413_v60 = vld [vmem:[%s8783_s8 + $0x184] sm:$0xf] }
 0x15a   : > { %v7407_v12 = vadd.f32 %v7406_v44, %v12265_v30  ;;  %v9512_v18 = vmul.bf16 %v2911_v50, %v411_v1  ;;  %1340 = vbcast.lane.c.b16.xlu0 %v8966_v52, 320  ;;  %v12266_v32 = vunpack.c.l.bf16 %v9213_v54  ;;  %v2897_v10 = vrot.slane %v9428_v9, %v8851_v37  ;;  %v414_v30 = vld [vmem:[%s8783_s8 + $0x188] sm:$0xf] }
 0x15b   : > { %v9521_v26 = vpop.permute.xlu1 %1096  ;;  %v9523_v34 = vpop.permute.xlu0 %1092  ;;  %v7446_v40 = vadd.f32 %v7445_v25, %v6930_v42  ;;  %v9526_v50 = vmul.bf16 %v2890_v27, %v408_v58  ;;  %v2932_v54 = vrot.slane %v9456_v22, %v8848_v36  ;;  %v2939_v44 = vrot.slane %v9456_v22, %v8851_v37  ;;  %v412_v58 = vld [vmem:[%s8783_s8 + $0x180] sm:$0xf] }
 0x15c   : > { %v7408_v15 = vadd.f32 %v7407_v12, %v12266_v32  ;;  %v12267_v13 = vunpack.c.l.bf16 %v9215_v55  ;;  %v6937_v9 = vunpack.c.l.bf16 %v9503_v28  ;;  %v6938_v4 = vunpack.c.l.bf16 %v9505_v19  ;;  %v415_v12 = vld [vmem:[%s8783_s8 + $0x18c] sm:$0xf] }
 0x15d   : > { %v2918_v42 = vrot.slane %v9458_v29, %v8848_v36  ;;  %1352 = vbcast.lane.c.b16.xlu1 %v8966_v52, 368  ;;  %v7447_v27 = vadd.f32 %v7446_v40, %v6931_v38  ;;  %v2925_v25 = vrot.slane %v9458_v29, %v8851_v37  ;;  %v12268_v32 = vunpack.c.l.bf16 %v9196_v8 }
 0x15e   : > { %v7409_v1 = vadd.f32 %v7408_v15, %v12267_v13  ;;  %1348 = vbcast.lane.c.b16.xlu0 %v8966_v52, 352  ;;  %v9551_v13 = vmul.bf16 %v2897_v10, %v409_v56  ;;  %v2960_v2 = vrot.slane %v9492_v24, %v8848_v36  ;;  %v2967_v38 = vrot.slane %v9492_v24, %v8851_v37  ;;  %v418_v56 = vld [vmem:[%s8783_s8 + $0x198] sm:$0xf] }
 0x15f   : > { %v9558_v40 = vpop.permute.xlu1 %1104  ;;  %v9560_v55 = vpop.permute.xlu0 %1100  ;;  %v7448_v52 = vadd.f32 %v7447_v27, %v6932_v61  ;;  %v6941_v8 = vunpack.c.l.bf16 %v9526_v50  ;;  %v9565_v29 = vmul.bf16 %v2932_v54, %v414_v30  ;;  %v9567_v10 = vmul.bf16 %v2939_v44, %v415_v12  ;;  %v416_v44 = vld [vmem:[%s8783_s8 + $0x190] sm:$0xf]  ;;  %v417_v30 = vld [vmem:[%s8783_s8 + $0x194] sm:$0xf] }
 0x160   : > { %v7410_v15 = vadd.f32 %v7409_v1, %v12268_v32  ;;  %v419_v1 = vld [vmem:[%s8783_s8 + $0x19c] sm:$0xf]  ;;  %v12269_v32 = vunpack.c.l.bf16 %v9207_v31  ;;  %v9573_v22 = vmul.bf16 %v2918_v42, %v412_v58  ;;  %v2946_v39 = vrot.slane %v9494_v7, %v8848_v36  ;;  %v423_v58 = vld [vmem:[%s8783_s8 + $0x1ac] sm:$0xf] }
 0x161   : > { %v2953_v48 = vrot.slane %v9494_v7, %v8851_v37  ;;  %1363 = vbcast.lane.c.b16.xlu1 %v8976_v57, 272  ;;  %v7449_v61 = vadd.f32 %v7448_v52, %v6933_v14  ;;  %v9580_v54 = vmul.bf16 %v2925_v25, %v413_v60  ;;  %v2988_v31 = vrot.slane %v9521_v26, %v8848_v36  ;;  %v422_v60 = vld [vmem:[%s8783_s8 + $0x1a8] sm:$0xf] }
 0x162   : > { %v7411_v24 = vadd.f32 %v7410_v15, %v12269_v32  ;;  %v2995_v12 = vrot.slane %v9521_v26, %v8851_v37  ;;  %1359 = vbcast.lane.c.b16.xlu0 %v8976_v57, 256  ;;  %v6942_v7 = vunpack.c.l.bf16 %v9551_v13  ;;  %v9592_v27 = vmul.bf16 %v2960_v2, %v418_v56 }
 0x163   : > { %v9594_v14 = vmul.bf16 %v2967_v38, %v419_v1  ;;  %v9598_v25 = vpop.permute.xlu1 %1118  ;;  %v9600_v15 = vpop.permute.xlu0 %1114  ;;  %v7450_v52 = vadd.f32 %v7449_v61, %v6934_v59  ;;  %v2974_v5 = vrot.slane %v9523_v34, %v8848_v36  ;;  %v6945_v38 = vunpack.c.l.bf16 %v9573_v22 }
 0x164   : > { %v7412_v42 = vadd.f32 %v7411_v24, %v6901_v21  ;;  %v12270_v21 = vunpack.c.l.bf16 %v9263_v51  ;;  %v9609_v56 = vmul.bf16 %v2946_v39, %v416_v44  ;;  %v9611_v1 = vmul.bf16 %v2953_v48, %v417_v30  ;;  %v420_v24 = vld [vmem:[%s8783_s8 + $0x1a0] sm:$0xf]  ;;  %v425_v48 = vld [vmem:[%s8783_s8 + $0x1b4] sm:$0xf] }
 0x165   : > { %1371 = vbcast.lane.c.b16.xlu1 %v8976_v57, 304  ;;  %v7451_v59 = vadd.f32 %v7450_v52, %v6935_v43  ;;  %v6946_v61 = vunpack.c.l.bf16 %v9580_v54  ;;  %v9618_v32 = vmul.bf16 %v2988_v31, %v422_v60  ;;  %v9620_v26 = vmul.bf16 %v2995_v12, %v423_v58  ;;  %v421_v12 = vld [vmem:[%s8783_s8 + $0x1a4] sm:$0xf]  ;;  %v12272_v58 = vld [vmem:[#allocation36_spill] sm:$0xff] }
 0x166   : > { %v7413_v2 = vadd.f32 %v7412_v42, %v12270_v21  ;;  %1367 = vbcast.lane.c.b16.xlu0 %v8976_v57, 288  ;;  %v12271_v51 = vunpack.c.l.bf16 %v9229_v62  ;;  %v2981_v47 = vrot.slane %v9523_v34, %v8851_v37  ;;  %v9636_v42 = vmul.bf16 %v2974_v5, %v420_v24 }
 0x167   : > { %v9629_v43 = vpop.permute.xlu1 %1126  ;;  %v9631_v30 = vpop.permute.xlu0 %1122  ;;  %v7452_v31 = vadd.f32 %v7451_v59, %v6936_v11  ;;  %v3016_v62 = vrot.slane %v9558_v40, %v8848_v36  ;;  %v3023_v60 = vrot.slane %v9558_v40, %v8851_v37  ;;  %v12273_v52 = vunpack.c.l.bf16 %v12272_v58  ;;  %v424_v59 = vld [vmem:[%s8783_s8 + $0x1b0] sm:$0xf] }
 0x168   : > { %v7414_v39 = vadd.f32 %v7413_v2, %v12271_v51  ;;  %v427_v51 = vld [vmem:[%s8783_s8 + $0x1bc] sm:$0xf]  ;;  %v3002_v11 = vrot.slane %v9560_v55, %v8848_v36  ;;  %v12274_v58 = vunpack.c.l.bf16 %v9303_v23  ;;  %v9661_v44 = vmul.bf16 %v2981_v47, %v421_v12  ;;  %v430_v12 = vld [vmem:[%s8783_s8 + $0x1c8] sm:$0xf] }
 0x169   : > { %1379 = vbcast.lane.c.b16.xlu1 %v8976_v57, 336  ;;  %v7453_v5 = vadd.f32 %v7452_v31, %v6937_v9  ;;  %v3044_v28 = vrot.slane %v9598_v25, %v8848_v36  ;;  %v3051_v9 = vrot.slane %v9598_v25, %v8851_v37  ;;  %v9673_v23 = vmul.bf16 %v3016_v62, %v426_v46 }
 0x16a   : > { %v7415_v34 = vadd.f32 %v7414_v39, %v12273_v52  ;;  %v3009_v39 = vrot.slane %v9560_v55, %v8851_v37  ;;  %1375 = vbcast.lane.c.b16.xlu0 %v8976_v57, 320  ;;  %v9675_v47 = vmul.bf16 %v3023_v60, %v427_v51  ;;  %v12275_v40 = vunpack.c.l.bf16 %v9309_v41  ;;  %v428_v51 = vld [vmem:[%s8783_s8 + $0x1c0] sm:$0xf]  ;;  %v429_v41 = vld [vmem:[%s8783_s8 + $0x1c4] sm:$0xf] }
 0x16b   : > { %v9668_v31 = vpop.permute.xlu1 %1134  ;;  %v7454_v55 = vadd.f32 %v7453_v5, %v6938_v4  ;;  %v9683_v2 = vmul.bf16 %v3002_v11, %v424_v59  ;;  %v3030_v19 = vrot.slane %v9600_v15, %v8848_v36  ;;  %v3037_v4 = vrot.slane %v9600_v15, %v8851_v37 }
 0x16c   : > { %v7416_v52 = vadd.f32 %v7415_v34, %v12274_v58  ;;  %v431_v34 = vld [vmem:[%s8783_s8 + $0x1cc] sm:$0xf]  ;;  %v9679_v58 = vpop.permute.xlu0 %1130  ;;  %v12276_v62 = vunpack.c.l.bf16 %v9486_v3  ;;  %v9692_v46 = vmul.bf16 %v3009_v39, %v425_v48  ;;  %v3072_v11 = vrot.slane %v9629_v43, %v8848_v36  ;;  %v434_v39 = vld [vmem:[%s8783_s8 + $0x1d8] sm:$0xf] }
 0x16d   : > { %1387 = vbcast.lane.c.b16.xlu1 %v8976_v57, 368  ;;  %v3079_v5 = vrot.slane %v9629_v43, %v8851_v37  ;;  %v9704_v3 = vmul.bf16 %v3044_v28, %v430_v12  ;;  %v9706_v48 = vmul.bf16 %v3051_v9, %v431_v34  ;;  %v12279_v28 = vunpack.c.l.bf16 %v9299_v33 }
 0x16e   : > { %v7417_v25 = vadd.f32 %v7416_v52, %v12275_v40  ;;  %v7455_v60 = vadd.f32 %v7454_v55, %v12276_v62  ;;  %1383 = vbcast.lane.c.b16.xlu0 %v8976_v57, 352  ;;  %v12277_v40 = vunpack.c.l.bf16 %v9282_v17  ;;  %v435_v52 = vld [vmem:[%s8783_s8 + $0x1dc] sm:$0xf]  ;;  %v12278_v62 = vunpack.c.l.bf16 %v9488_v20  ;;  %v432_v20 = vld [vmem:[%s8783_s8 + $0x1d0] sm:$0xf] }
 0x16f   : > { %v9710_v55 = vpop.permute.xlu1 %1142  ;;  %v3058_v17 = vrot.slane %v9631_v30, %v8848_v36  ;;  %v9723_v34 = vmul.bf16 %v3030_v19, %v428_v51  ;;  %v9732_v43 = vmul.bf16 %v3072_v11, %v434_v39  ;;  %v9734_v33 = vmul.bf16 %v3079_v5, %v435_v52  ;;  %v433_v11 = vld [vmem:[%s8783_s8 + $0x1d4] sm:$0xf]  ;;  %v451_v51 = vld [vmem:[%s8783_s8 + $0x21c] sm:$0xf] }
 0x170   : > { %v7418_v15 = vadd.f32 %v7417_v25, %v12277_v40  ;;  %v7456_v24 = vadd.f32 %v7455_v60, %v12278_v62  ;;  %v9718_v25 = vpop.permute.xlu0 %1138  ;;  %v9725_v40 = vmul.bf16 %v3037_v4, %v429_v41  ;;  %v12280_v60 = vld [vmem:[#allocation32_spill] sm:$0xff]  ;;  %v12281_v19 = vunpack.c.l.bf16 %v9359_v35  ;;  %v439_v41 = vld [vmem:[%s8783_s8 + $0x1ec] sm:$0xf] }
 0x171   : > { %1398 = vbcast.lane.c.b16.xlu1 %v12280_v60, 272  ;;  %v3065_v50 = vrot.slane %v9631_v30, %v8851_v37  ;;  %v9746_v5 = vmul.bf16 %v3058_v17, %v432_v20  ;;  %v3100_v35 = vrot.slane %v9668_v31, %v8848_v36  ;;  %v444_v17 = vld [vmem:[%s8783_s8 + $0x200] sm:$0xf]  ;;  %v12283_v20 = vunpack.c.l.bf16 %v9510_v63 }
 0x172   : > { %v7419_v9 = vadd.f32 %v7418_v15, %v12279_v28  ;;  %v7457_v62 = vadd.f32 %v7456_v24, %v6941_v8  ;;  %1394 = vbcast.lane.c.b16.xlu0 %v12280_v60, 256  ;;  %v446_v15 = vld [vmem:[%s8783_s8 + $0x208] sm:$0xf]  ;;  %v12282_v28 = vunpack.c.l.bf16 %v9373_v6  ;;  %v447_v6 = vld [vmem:[%s8783_s8 + $0x20c] sm:$0xf] }
 0x173   : > { %v1154_v8 = vpop.permute.xlu1 %1153  ;;  %v9768_v13 = vmul.bf16 %v3065_v50, %v433_v11  ;;  %v12285_v11 = vunpack.c.l.bf16 %v9338_v49 }
 0x174   : > { %v7420_v4 = vadd.f32 %v7419_v9, %v12281_v19  ;;  %v7458_v24 = vadd.f32 %v7457_v62, %v6942_v7  ;;  %v3156_v39 = vrot.slane %v1154_v8, %v8848_v36  ;;  %v1150_v52 = vpop.permute.xlu0 %1149  ;;  %v438_v7 = vld [vmem:[%s8783_s8 + $0x1e8] sm:$0xf]  ;;  %v3163_v62 = vrot.slane %v1154_v8, %v8851_v37 }
 0x175   : > { %1406 = vbcast.lane.c.b16.xlu1 %v12280_v60, 304  ;;  %v3107_v8 = vrot.slane %v9668_v31, %v8851_v37  ;;  %v3149_v57 = vrot.slane %v1150_v52, %v8851_v37  ;;  %v9777_v12 = vmul.bf16 %v3100_v35, %v438_v7  ;;  %v3086_v31 = vrot.slane %v9679_v58, %v8848_v36  ;;  %v448_v7 = vld [vmem:[%s8783_s8 + $0x210] sm:$0xf] }
 0x176   : > { %v7421_v9 = vadd.f32 %v7420_v4, %v12282_v28  ;;  %v7459_v19 = vadd.f32 %v7458_v24, %v12283_v20  ;;  %v445_v4 = vld [vmem:[%s8783_s8 + $0x204] sm:$0xf]  ;;  %v3142_v28 = vrot.slane %v1150_v52, %v8848_v36  ;;  %1402 = vbcast.lane.c.b16.xlu0 %v12280_v60, 288  ;;  %v6466_v30 = vmul.bf16 %v3156_v39, %v446_v15 }
 0x177   : > { %v1162_v63 = vpop.permute.xlu1 %1161  ;;  %v12284_v24 = vunpack.c.l.bf16 %v9512_v18  ;;  %v6467_v15 = vmul.bf16 %v3163_v62, %v447_v6  ;;  %v6465_v39 = vmul.bf16 %v3149_v57, %v445_v4  ;;  %v436_v6 = vld [vmem:[%s8783_s8 + $0x1e0] sm:$0xf]  ;;  %v3093_v4 = vrot.slane %v9679_v58, %v8851_v37 }
 0x178   : > { %v6464_v59 = vmul.bf16 %v3142_v28, %v444_v17  ;;  %v1158_v50 = vpop.permute.xlu0 %1157  ;;  %v7422_v21 = vadd.f32 %v7421_v9, %v12285_v11  ;;  %v3184_v35 = vrot.slane %v1162_v63, %v8848_v36  ;;  %v9790_v9 = vmul.bf16 %v3107_v8, %v439_v41  ;;  %v450_v17 = vld [vmem:[%s8783_s8 + $0x218] sm:$0xf]  ;;  %v437_v8 = vld [vmem:[%s8783_s8 + $0x1e4] sm:$0xf] }
 0x179   : > { %v7460_v20 = vadd.f32 %v7459_v19, %v12284_v24  ;;  %1414 = vbcast.lane.c.b16.xlu1 %v12280_v60, 336  ;;  %v3170_v49 = vrot.slane %v1158_v50, %v8848_v36  ;;  %v6979_v57 = vunpack.c.l.bf16 %v6466_v30  ;;  %v6978_v62 = vunpack.c.l.bf16 %v6465_v39  ;;  %v449_v30 = vld [vmem:[%s8783_s8 + $0x214] sm:$0xf]  ;;  %v442_v24 = vld [vmem:[%s8783_s8 + $0x1f8] sm:$0xf] }
 0x17a   : > { %v6977_v52 = vunpack.c.l.bf16 %v6464_v59  ;;  %1410 = vbcast.lane.c.b16.xlu0 %v12280_v60, 320  ;;  %v3177_v19 = vrot.slane %v1158_v50, %v8851_v37  ;;  %v3128_v41 = vrot.slane %v9710_v55, %v8848_v36  ;;  %v3191_v54 = vrot.slane %v1162_v63, %v8851_v37  ;;  %v460_v59 = vld [vmem:[%s8783_s8 + $0x240] sm:$0xf] }
 0x17b   : > { %v7461_v18 = vadd.f32 %v7460_v20, %v6945_v38  ;;  %v9794_v22 = vpop.permute.xlu1 %1169  ;;  %v6980_v20 = vunpack.c.l.bf16 %v6467_v15  ;;  %v12286_v11 = vunpack.c.l.bf16 %v9357_v0  ;;  %v12287_v58 = vunpack.c.l.bf16 %v9565_v29 }
 0x17c   : > { %v9805_v28 = vpop.permute.xlu0 %1165  ;;  %v7499_v50 = vadd.f32 %v6978_v62, %v6977_v52  ;;  %v6470_v16 = vmul.bf16 %v3184_v35, %v450_v17  ;;  %v9819_v52 = vmul.bf16 %v3086_v31, %v436_v6  ;;  %v12288_v0 = vunpack.c.l.bf16 %v9567_v10 }
 0x17d   : > { %v7462_v38 = vadd.f32 %v7461_v18, %v6946_v61  ;;  %v6468_v61 = vmul.bf16 %v3170_v49, %v448_v7  ;;  %1422 = vbcast.lane.c.b16.xlu1 %v12280_v60, 368  ;;  %v7423_v39 = vadd.f32 %v7422_v21, %v12286_v11  ;;  %v6469_v7 = vmul.bf16 %v3177_v19, %v449_v30  ;;  %v12289_v19 = vld [vmem:[#allocation33_spill] sm:$0xff]  ;;  %v443_v30 = vld [vmem:[%s8783_s8 + $0x1fc] sm:$0xf] }
 0x17e   : > { %1418 = vbcast.lane.c.b16.xlu0 %v12280_v60, 352  ;;  %v7500_v63 = vadd.f32 %v7499_v50, %v6979_v57  ;;  %v9825_v21 = vmul.bf16 %v3093_v4, %v437_v8  ;;  %v3135_v35 = vrot.slane %v9710_v55, %v8851_v37  ;;  %v9829_v62 = vmul.bf16 %v3128_v41, %v442_v24 }
 0x17f   : > { %v7463_v18 = vadd.f32 %v7462_v38, %v12287_v58  ;;  %v9821_v49 = vpop.permute.xlu1 %1177  ;;  %v6471_v31 = vmul.bf16 %v3191_v54, %v451_v51  ;;  %v6981_v17 = vunpack.c.l.bf16 %v6468_v61  ;;  %v3198_v57 = vrot.slane %v9805_v28, %v8848_v36  ;;  %v452_v51 = vld [vmem:[%s8783_s8 + $0x220] sm:$0xf] }
 0x180   : > { %v9831_v60 = vpop.permute.xlu0 %1173  ;;  %v7501_v38 = vadd.f32 %v7500_v63, %v6980_v20  ;;  %v7424_v10 = vrot.slane %v7423_v39, 4  ;;  %v12290_v6 = vunpack.c.l.bf16 %v9609_v56  ;;  %v6983_v55 = vunpack.c.l.bf16 %v6470_v16  ;;  %v455_v63 = vld [vmem:[%s8783_s8 + $0x22c] sm:$0xf] }
 0x181   : > { %v7464_v29 = vadd.f32 %v7463_v18, %v12288_v0  ;;  %1433 = vbcast.lane.c.b16.xlu1 %v12289_v19, 272  ;;  %v3212_v41 = vrot.slane %v9794_v22, %v8848_v36  ;;  %v6982_v8 = vunpack.c.l.bf16 %v6469_v7  ;;  %v3219_v20 = vrot.slane %v9794_v22, %v8851_v37  ;;  %v454_v18 = vld [vmem:[%s8783_s8 + $0x228] sm:$0xf]  ;;  %v453_v7 = vld [vmem:[%s8783_s8 + $0x224] sm:$0xf] }
 0x182   : > { %1429 = vbcast.lane.c.b16.xlu0 %v12289_v19, 256  ;;  %v7502_v24 = vadd.f32 %v7501_v38, %v6981_v17  ;;  %v3205_v56 = vrot.slane %v9805_v28, %v8851_v37  ;;  %v12291_v54 = vunpack.c.l.bf16 %v9611_v1  ;;  %v6969_v61 = vunpack.c.l.bf16 %v9819_v52  ;;  %v440_v28 = vld [vmem:[%s8783_s8 + $0x1f0] sm:$0xf]  ;;  %v490_v52 = vld [vmem:[%s8783_s8 + $0x2b8] sm:$0xf] }
 0x183   : > { %v7465_v4 = vadd.f32 %v7464_v29, %v12290_v6  ;;  %v9847_v50 = vpop.permute.xlu1 %1188  ;;  %v3114_v58 = vrot.slane %v9718_v25, %v8848_v36  ;;  %v9860_v0 = vmul.bf16 %v3135_v35, %v443_v30  ;;  %v6984_v29 = vunpack.c.l.bf16 %v6471_v31  ;;  %v441_v35 = vld [vmem:[%s8783_s8 + $0x1f4] sm:$0xf] }
 0x184   : > { %v9858_v22 = vpop.permute.xlu0 %1184  ;;  %v7503_v17 = vadd.f32 %v7502_v24, %v6982_v8  ;;  %v6472_v1 = vmul.bf16 %v3198_v57, %v452_v51  ;;  %v7425_v38 = vadd.f32 %v7424_v10, %v7423_v39  ;;  %v12292_v6 = vunpack.c.l.bf16 %v9592_v27 }
 0x185   : > { %v7466_v16 = vadd.f32 %v7465_v4, %v12291_v54  ;;  %1441 = vbcast.lane.c.b16.xlu1 %v12289_v19, 304  ;;  %v3121_v15 = vrot.slane %v9718_v25, %v8851_v37  ;;  %v6474_v31 = vmul.bf16 %v3212_v41, %v454_v18  ;;  %v6475_v8 = vmul.bf16 %v3219_v20, %v455_v63  ;;  %v458_v20 = vld [vmem:[%s8783_s8 + $0x238] sm:$0xf] }
 0x186   : > { %1437 = vbcast.lane.c.b16.xlu0 %v12289_v19, 288  ;;  %v7504_v30 = vadd.f32 %v7503_v17, %v6983_v55  ;;  %v6473_v57 = vmul.bf16 %v3205_v56, %v453_v7  ;;  %v12293_v39 = vunpack.c.l.bf16 %v9594_v14  ;;  %v9875_v10 = vmul.bf16 %v3114_v58, %v440_v28  ;;  %v456_v56 = vld [vmem:[%s8783_s8 + $0x230] sm:$0xf]  ;;  %v459_v28 = vld [vmem:[%s8783_s8 + $0x23c] sm:$0xf] }
 0x187   : > { %v7467_v4 = vadd.f32 %v7466_v16, %v12292_v6  ;;  %v9871_v51 = vpop.permute.xlu1 %1196  ;;  %v3240_v25 = vrot.slane %v9821_v49, %v8848_v36  ;;  %v3247_v24 = vrot.slane %v9821_v49, %v8851_v37  ;;  %v6985_v55 = vunpack.c.l.bf16 %v6472_v1  ;;  %v457_v17 = vld [vmem:[%s8783_s8 + $0x234] sm:$0xf] }
 0x188   : > { %v9881_v16 = vpop.permute.xlu0 %1192  ;;  %v7505_v41 = vadd.f32 %v7504_v30, %v6984_v29  ;;  %v3226_v14 = vrot.slane %v9831_v60, %v8848_v36  ;;  %v3233_v58 = vrot.slane %v9831_v60, %v8851_v37  ;;  %v7426_v18 = vrot.slane %v7425_v38, 2  ;;  %v462_v30 = vld [vmem:[%s8783_s8 + $0x248] sm:$0xf] }
 0x189   : > { %v7468_v27 = vadd.f32 %v7467_v4, %v12293_v39  ;;  %1449 = vbcast.lane.c.b16.xlu1 %v12289_v19, 336  ;;  %v12294_v63 = vunpack.c.l.bf16 %v9636_v42  ;;  %v9892_v49 = vmul.bf16 %v3121_v15, %v441_v35  ;;  %v3268_v29 = vrot.slane %v9847_v50, %v8848_v36 }
 0x18a   : > { %1445 = vbcast.lane.c.b16.xlu0 %v12289_v19, 320  ;;  %v6987_v1 = vunpack.c.l.bf16 %v6474_v31  ;;  %v6988_v6 = vunpack.c.l.bf16 %v6475_v8  ;;  %v6986_v60 = vunpack.c.l.bf16 %v6473_v57  ;;  %v7506_v4 = vadd.f32 %v7505_v41, %v6985_v55  ;;  %v463_v41 = vld [vmem:[%s8783_s8 + $0x24c] sm:$0xf] }
 0x18b   : > { %v7469_v7 = vadd.f32 %v7468_v27, %v12294_v63  ;;  %v9900_v39 = vpop.permute.xlu1 %1204  ;;  %v12295_v42 = vunpack.c.l.bf16 %v9661_v44  ;;  %v9904_v35 = vmul.bf16 %v3240_v25, %v458_v20  ;;  %v3275_v27 = vrot.slane %v9847_v50, %v8851_v37  ;;  %v469_v50 = vld [vmem:[%s8783_s8 + $0x264] sm:$0xf] }
 0x18c   : > { %v3254_v63 = vrot.slane %v9858_v22, %v8848_v36  ;;  %v9910_v54 = vpop.permute.xlu0 %1200  ;;  %v7507_v31 = vadd.f32 %v7506_v4, %v6986_v60  ;;  %v9912_v8 = vmul.bf16 %v3247_v24, %v459_v28  ;;  %v6476_v57 = vmul.bf16 %v3226_v14, %v456_v56 }
 0x18d   : > { %v7470_v15 = vadd.f32 %v7469_v7, %v12295_v42  ;;  %v6477_v55 = vmul.bf16 %v3233_v58, %v457_v17  ;;  %1457 = vbcast.lane.c.b16.xlu1 %v12289_v19, 368  ;;  %v12296_v44 = vunpack.c.l.bf16 %v9618_v32  ;;  %v9921_v7 = vmul.bf16 %v3268_v29, %v462_v30  ;;  %v461_v29 = vld [vmem:[%s8783_s8 + $0x244] sm:$0xf]  ;;  %v12299_v42 = vld [vmem:[#allocation34_spill] sm:$0xff] }
 0x18e   : > { %1453 = vbcast.lane.c.b16.xlu0 %v12289_v19, 352  ;;  %v9924_v24 = vadd.f32 %v7426_v18, %v7425_v38  ;;  %v7508_v14 = vadd.f32 %v7507_v31, %v6987_v1  ;;  %v3261_v58 = vrot.slane %v9858_v22, %v8851_v37  ;;  %v12298_v32 = vunpack.c.l.bf16 %v9620_v26  ;;  %v466_v31 = vld [vmem:[%s8783_s8 + $0x258] sm:$0xf] }
 0x18f   : > { %v7471_v25 = vadd.f32 %v7470_v15, %v12296_v44  ;;  %v9929_v28 = vpop.permute.xlu1 %1212  ;;  %v6991_v60 = vunpack.c.l.bf16 %v9904_v35  ;;  %v9934_v4 = vmul.bf16 %v3275_v27, %v463_v41  ;;  %v9937_v19 = vmul.bf16 %v3254_v63, %v460_v59 }
 0x190   : > { %12297 = vst [vmem:[#allocation36_spill] sm:$0xff] %v9924_v24  ;;  %v9939_v38 = vpop.permute.xlu0 %1208  ;;  %v6992_v18 = vunpack.c.l.bf16 %v9912_v8  ;;  %v6989_v1 = vunpack.c.l.bf16 %v6476_v57  ;;  %v6990_v22 = vunpack.c.l.bf16 %v6477_v55  ;;  %v7509_v30 = vadd.f32 %v7508_v14, %v6988_v6  ;;  %v467_v8 = vld [vmem:[%s8783_s8 + $0x25c] sm:$0xf]  ;;  %v464_v14 = vld [vmem:[%s8783_s8 + $0x250] sm:$0xf] }
 0x191   : > { %v7472_v17 = vadd.f32 %v7471_v25, %v12298_v32  ;;  %1468 = vbcast.lane.c.b16.xlu1 %v12299_v42, 272  ;;  %v12300_v26 = vunpack.c.l.bf16 %v9683_v2  ;;  %v6995_v35 = vunpack.c.l.bf16 %v9921_v7  ;;  %v3296_v59 = vrot.slane %v9871_v51, %v8848_v36  ;;  %v12308_v7 = vld [vmem:[#allocation35_spill] sm:$0xff] }
 0x192   : > { %v3303_v27 = vrot.slane %v9871_v51, %v8851_v37  ;;  %1464 = vbcast.lane.c.b16.xlu0 %v12299_v42, 256  ;;  %v7510_v63 = vadd.f32 %v7509_v30, %v6989_v1  ;;  %v6481_v6 = vmul.bf16 %v3261_v58, %v461_v29  ;;  %v3282_v2 = vrot.slane %v9881_v16, %v8848_v36  ;;  %v465_v58 = vld [vmem:[%s8783_s8 + $0x254] sm:$0xf] }
 0x193   : > { %v7473_v15 = vadd.f32 %v7472_v17, %v12300_v26  ;;  %v3289_v57 = vrot.slane %v9881_v16, %v8851_v37  ;;  %v9957_v55 = vpop.permute.xlu1 %1223  ;;  %v12301_v41 = vunpack.c.l.bf16 %v9692_v46  ;;  %v6996_v51 = vunpack.c.l.bf16 %v9934_v4  ;;  %v470_v16 = vld [vmem:[%s8783_s8 + $0x268] sm:$0xf]  ;;  %v468_v46 = vld [vmem:[%s8783_s8 + $0x260] sm:$0xf] }
 0x194   : > { %v6993_v25 = vunpack.c.l.bf16 %v9937_v19  ;;  %v3324_v32 = vrot.slane %v9900_v39, %v8848_v36  ;;  %v9967_v17 = vpop.permute.xlu0 %1219  ;;  %v7511_v29 = vadd.f32 %v7510_v63, %v6990_v22  ;;  %v3331_v1 = vrot.slane %v9900_v39, %v8851_v37  ;;  %v471_v63 = vld [vmem:[%s8783_s8 + $0x26c] sm:$0xf] }
 0x195   : > { %v7474_v44 = vadd.f32 %v7473_v15, %v12301_v41  ;;  %v3310_v30 = vrot.slane %v9910_v54, %v8848_v36  ;;  %v3317_v19 = vrot.slane %v9910_v54, %v8851_v37  ;;  %1476 = vbcast.lane.c.b16.xlu1 %v12299_v42, 304  ;;  %v12302_v26 = vunpack.c.l.bf16 %v9673_v23  ;;  %v474_v23 = vld [vmem:[%s8783_s8 + $0x278] sm:$0xf] }
 0x196   : > { %v9980_v41 = vmul.bf16 %v3296_v59, %v466_v31  ;;  %v9982_v22 = vmul.bf16 %v3303_v27, %v467_v8  ;;  %v3352_v39 = vrot.slane %v9929_v28, %v8848_v36  ;;  %1472 = vbcast.lane.c.b16.xlu0 %v12299_v42, 288  ;;  %v7512_v56 = vadd.f32 %v7511_v29, %v6991_v60 }
 0x197   : > { %v7475_v15 = vadd.f32 %v7474_v44, %v12302_v26  ;;  %v6994_v54 = vunpack.c.l.bf16 %v6481_v6  ;;  %v9989_v20 = vmul.bf16 %v3282_v2, %v464_v14  ;;  %v9991_v11 = vmul.bf16 %v3289_v57, %v465_v58  ;;  %v9994_v59 = vpop.permute.xlu1 %1231  ;;  %v475_v58 = vld [vmem:[%s8783_s8 + $0x27c] sm:$0xf] }
 0x198   : > { %v12303_v27 = vunpack.c.l.bf16 %v9675_v47  ;;  %v9998_v8 = vmul.bf16 %v3324_v32, %v470_v16  ;;  %v3359_v44 = vrot.slane %v9929_v28, %v8851_v37  ;;  %v3338_v60 = vrot.slane %v9939_v38, %v8848_v36  ;;  %v10004_v29 = vpop.permute.xlu0 %1227  ;;  %v472_v47 = vld [vmem:[%s8783_s8 + $0x270] sm:$0xf] }
 0x199   : > { %v7513_v6 = vadd.f32 %v7512_v56, %v6992_v18  ;;  %v10006_v2 = vmul.bf16 %v3331_v1, %v471_v63  ;;  %v10008_v57 = vmul.bf16 %v3310_v30, %v468_v46  ;;  %v10010_v14 = vmul.bf16 %v3317_v19, %v469_v50  ;;  %1484 = vbcast.lane.c.b16.xlu1 %v12299_v42, 336 }
 0x19a   : > { %v7476_v31 = vadd.f32 %v7475_v15, %v12303_v27  ;;  %v12304_v32 = vunpack.c.l.bf16 %v9723_v34  ;;  %v6999_v16 = vunpack.c.l.bf16 %v9980_v41  ;;  %v7000_v26 = vunpack.c.l.bf16 %v9982_v22  ;;  %1480 = vbcast.lane.c.b16.xlu0 %v12299_v42, 320 }
 0x19b   : > { %v10019_v15 = vmul.bf16 %v3352_v39, %v474_v23  ;;  %v7514_v56 = vadd.f32 %v7513_v6, %v6993_v25  ;;  %v6997_v50 = vunpack.c.l.bf16 %v9989_v20  ;;  %v6998_v18 = vunpack.c.l.bf16 %v9991_v11  ;;  %v10026_v46 = vpop.permute.xlu1 %1239  ;;  %v473_v39 = vld [vmem:[%s8783_s8 + $0x274] sm:$0xf] }
 0x19c   : > { %v7477_v28 = vadd.f32 %v7476_v31, %v12304_v32  ;;  %v3345_v1 = vrot.slane %v9939_v38, %v8851_v37  ;;  %v12305_v34 = vunpack.c.l.bf16 %v9725_v40  ;;  %v10031_v63 = vmul.bf16 %v3359_v44, %v475_v58  ;;  %v10036_v20 = vpop.permute.xlu0 %1235 }
 0x19d   : > { %v10034_v25 = vmul.bf16 %v3338_v60, %v472_v47  ;;  %v7515_v11 = vadd.f32 %v7514_v56, %v6994_v54  ;;  %v7001_v38 = vunpack.c.l.bf16 %v10008_v57  ;;  %1492 = vbcast.lane.c.b16.xlu1 %v12299_v42, 368  ;;  %v12306_v40 = vunpack.c.l.bf16 %v9704_v3  ;;  %v478_v3 = vld [vmem:[%s8783_s8 + $0x288] sm:$0xf]  ;;  %v479_v47 = vld [vmem:[%s8783_s8 + $0x28c] sm:$0xf] }
 0x19e   : > { %v7478_v30 = vadd.f32 %v7477_v28, %v12305_v34  ;;  %v3380_v60 = vrot.slane %v9957_v55, %v8848_v36  ;;  %v3387_v54 = vrot.slane %v9957_v55, %v8851_v37  ;;  %1488 = vbcast.lane.c.b16.xlu0 %v12299_v42, 352  ;;  %v10052_v58 = vmul.bf16 %v3345_v1, %v473_v39  ;;  %v476_v1 = vld [vmem:[%s8783_s8 + $0x280] sm:$0xf]  ;;  %v477_v34 = vld [vmem:[%s8783_s8 + $0x284] sm:$0xf] }
 0x19f   : > { %v7516_v6 = vadd.f32 %v7515_v11, %v6995_v35  ;;  %v3366_v32 = vrot.slane %v9967_v17, %v8848_v36  ;;  %v3373_v28 = vrot.slane %v9967_v17, %v8851_v37  ;;  %v10060_v56 = vpop.permute.xlu1 %1247  ;;  %v12307_v55 = vunpack.c.l.bf16 %v9706_v48  ;;  %v482_v11 = vld [vmem:[%s8783_s8 + $0x298] sm:$0xf]  ;;  %v495_v57 = vld [vmem:[%s8783_s8 + $0x2cc] sm:$0xf] }
 0x1a0   : > { %v7479_v31 = vadd.f32 %v7478_v30, %v12306_v40  ;;  %v3408_v30 = vrot.slane %v9994_v59, %v8848_v36  ;;  %v10070_v39 = vpop.permute.xlu0 %1243  ;;  %v3415_v48 = vrot.slane %v9994_v59, %v8851_v37  ;;  %v480_v40 = vld [vmem:[%s8783_s8 + $0x290] sm:$0xf]  ;;  %v12309_v44 = vunpack.c.l.bf16 %v9746_v5 }
 0x1a1   : > { %v7517_v17 = vadd.f32 %v7516_v6, %v6996_v51  ;;  %1503 = vbcast.lane.c.b16.xlu1 %v12308_v7, 272  ;;  %v10085_v23 = vmul.bf16 %v3380_v60, %v478_v3  ;;  %v10087_v4 = vmul.bf16 %v3387_v54, %v479_v47  ;;  %v483_v51 = vld [vmem:[%s8783_s8 + $0x29c] sm:$0xf]  ;;  %v481_v6 = vld [vmem:[%s8783_s8 + $0x294] sm:$0xf]  ;;  %v3436_v59 = vrot.slane %v10026_v46, %v8848_v36 }
 0x1a2   : > { %v7480_v42 = vadd.f32 %v7479_v31, %v12307_v55  ;;  %v3394_v31 = vrot.slane %v10004_v29, %v8848_v36  ;;  %v3401_v55 = vrot.slane %v10004_v29, %v8851_v37  ;;  %1499 = vbcast.lane.c.b16.xlu0 %v12308_v7, 256  ;;  %v10095_v27 = vmul.bf16 %v3366_v32, %v476_v1  ;;  %v487_v29 = vld [vmem:[%s8783_s8 + $0x2ac] sm:$0xf] }
 0x1a3   : > { %v7518_v19 = vadd.f32 %v7517_v17, %v6997_v50  ;;  %v10097_v5 = vmul.bf16 %v3373_v28, %v477_v34  ;;  %v10100_v60 = vpop.permute.xlu1 %1258  ;;  %v12310_v54 = vunpack.c.l.bf16 %v9768_v13  ;;  %v10104_v47 = vmul.bf16 %v3408_v30, %v482_v11  ;;  %v484_v13 = vld [vmem:[%s8783_s8 + $0x2a0] sm:$0xf] }
 0x1a4   : > { %v7481_v35 = vadd.f32 %v7480_v42, %v12309_v44  ;;  %v486_v44 = vld [vmem:[%s8783_s8 + $0x2a8] sm:$0xf]  ;;  %v3443_v42 = vrot.slane %v10026_v46, %v8851_v37  ;;  %v3422_v50 = vrot.slane %v10036_v20, %v8848_v36  ;;  %v10110_v17 = vpop.permute.xlu0 %1254  ;;  %v10112_v1 = vmul.bf16 %v3415_v48, %v483_v51 }
 0x1a5   : > { %v7519_v32 = vadd.f32 %v7518_v19, %v6998_v18  ;;  %v10114_v28 = vmul.bf16 %v3394_v31, %v480_v40  ;;  %v10116_v34 = vmul.bf16 %v3401_v55, %v481_v6  ;;  %1511 = vbcast.lane.c.b16.xlu1 %v12308_v7, 304  ;;  %v7009_v19 = vunpack.c.l.bf16 %v10095_v27 }
 0x1a6   : > { %v7482_v3 = vadd.f32 %v7481_v35, %v12310_v54  ;;  %v12311_v35 = vunpack.c.l.bf16 %v9732_v43  ;;  %v10125_v54 = vmul.bf16 %v3436_v59, %v486_v44  ;;  %1507 = vbcast.lane.c.b16.xlu0 %v12308_v7, 288  ;;  %v7010_v48 = vunpack.c.l.bf16 %v10097_v5  ;;  %v485_v59 = vld [vmem:[%s8783_s8 + $0x2a4] sm:$0xf] }
 0x1a7   : > { %v7520_v18 = vadd.f32 %v7519_v32, %v6999_v16  ;;  %v3429_v40 = vrot.slane %v10036_v20, %v8851_v37  ;;  %v10134_v43 = vpop.permute.xlu1 %1266  ;;  %v12312_v31 = vunpack.c.l.bf16 %v9734_v33  ;;  %v10139_v6 = vmul.bf16 %v3443_v42, %v487_v29  ;;  %v494_v42 = vld [vmem:[%s8783_s8 + $0x2c8] sm:$0xf] }
 0x1a8   : > { %v7483_v46 = vadd.f32 %v7482_v3, %v12311_v35  ;;  %v10142_v41 = vmul.bf16 %v3422_v50, %v484_v13  ;;  %v10144_v16 = vpop.permute.xlu0 %1262  ;;  %v3464_v50 = vrot.slane %v10060_v56, %v8848_v36  ;;  %v3471_v22 = vrot.slane %v10060_v56, %v8851_v37  ;;  %v491_v13 = vld [vmem:[%s8783_s8 + $0x2bc] sm:$0xf] }
 0x1a9   : > { %v7521_v44 = vadd.f32 %v7520_v18, %v7000_v26  ;;  %1519 = vbcast.lane.c.b16.xlu1 %v12308_v7, 336  ;;  %v10162_v32 = vmul.bf16 %v3429_v40, %v485_v59  ;;  %v3457_v35 = vrot.slane %v10070_v39, %v8851_v37  ;;  %v489_v18 = vld [vmem:[%s8783_s8 + $0x2b4] sm:$0xf]  ;;  %v3492_v40 = vrot.slane %v10100_v60, %v8848_v36 }
 0x1aa   : > { %v7484_v55 = vadd.f32 %v7483_v46, %v12312_v31  ;;  %1515 = vbcast.lane.c.b16.xlu0 %v12308_v7, 320  ;;  %v3499_v31 = vrot.slane %v10100_v60, %v8851_v37  ;;  %v3478_v20 = vrot.slane %v10110_v17, %v8848_v36  ;;  %v3485_v51 = vrot.slane %v10110_v17, %v8851_v37 }
 0x1ab   : > { %v7522_v26 = vadd.f32 %v7521_v44, %v7001_v38  ;;  %v10170_v46 = vpop.permute.xlu1 %1274  ;;  %v488_v38 = vld [vmem:[%s8783_s8 + $0x2b0] sm:$0xf]  ;;  %v12314_v44 = vunpack.c.l.bf16 %v10010_v14  ;;  %v10193_v60 = vmul.bf16 %v3464_v50, %v490_v52  ;;  %v10195_v33 = vmul.bf16 %v3471_v22, %v491_v13  ;;  %v498_v52 = vld [vmem:[%s8783_s8 + $0x2d8] sm:$0xf]  ;;  %v499_v13 = vld [vmem:[%s8783_s8 + $0x2dc] sm:$0xf] }
 0x1ac   : > { %v7485_v29 = vadd.f32 %v7484_v55, %v6969_v61  ;;  %v3450_v61 = vrot.slane %v10070_v39, %v8848_v36  ;;  %v10180_v55 = vpop.permute.xlu0 %1270  ;;  %v12313_v39 = vunpack.c.l.bf16 %v9825_v21  ;;  %v492_v21 = vld [vmem:[%s8783_s8 + $0x2c0] sm:$0xf]  ;;  %v3520_v14 = vrot.slane %v10134_v43, %v8848_v36 }
 0x1ad   : > { %v7523_v56 = vadd.f32 %v7522_v26, %v12314_v44  ;;  %1527 = vbcast.lane.c.b16.xlu1 %v12308_v7, 368  ;;  %v3527_v26 = vrot.slane %v10134_v43, %v8851_v37  ;;  %v10209_v22 = vmul.bf16 %v3457_v35, %v489_v18  ;;  %v10215_v11 = vmul.bf16 %v3492_v40, %v494_v42  ;;  %v497_v40 = vld [vmem:[%s8783_s8 + $0x2d4] sm:$0xf] }
 0x1ae   : > { %v7486_v59 = vadd.f32 %v7485_v29, %v12313_v39  ;;  %v493_v29 = vld [vmem:[%s8783_s8 + $0x2c4] sm:$0xf]  ;;  %1523 = vbcast.lane.c.b16.xlu0 %v12308_v7, 352  ;;  %v12315_v39 = vunpack.c.l.bf16 %v9998_v8  ;;  %v10207_v50 = vmul.bf16 %v3450_v61, %v488_v38  ;;  %v10217_v43 = vmul.bf16 %v3499_v31, %v495_v57  ;;  %v496_v57 = vld [vmem:[%s8783_s8 + $0x2d0] sm:$0xf] }
 0x1af   : > { %v10213_v3 = vpop.permute.xlu1 %1282  ;;  %v3506_v8 = vrot.slane %v10144_v16, %v8848_v36  ;;  %v3513_v7 = vrot.slane %v10144_v16, %v8851_v37  ;;  %v12316_v61 = vunpack.c.l.bf16 %v9777_v12  ;;  %v12317_v38 = vunpack.c.l.bf16 %v10006_v2  ;;  %v509_v16 = vld [vmem:[%s8783_s8 + $0x304] sm:$0xf] }
 0x1b0   : > { %v7524_v44 = vadd.f32 %v7523_v56, %v12315_v39  ;;  %v10223_v56 = vpop.permute.xlu0 %1278  ;;  %v10229_v39 = vmul.bf16 %v3478_v20, %v492_v21  ;;  %v10231_v42 = vmul.bf16 %v3485_v51, %v493_v29  ;;  %v10238_v17 = vmul.bf16 %v3520_v14, %v498_v52  ;;  %v510_v14 = vld [vmem:[%s8783_s8 + $0x308] sm:$0xf] }
 0x1b1   : > { %v7487_v35 = vadd.f32 %v7486_v59, %v12316_v61  ;;  %1538 = vbcast.lane.c.b16.xlu1 %v9419_v53, 272  ;;  %v10240_v12 = vmul.bf16 %v3527_v26, %v499_v13  ;;  %v12318_v2 = vunpack.c.l.bf16 %v10034_v25  ;;  %v3548_v21 = vrot.slane %v10170_v46, %v8848_v36  ;;  %v502_v25 = vld [vmem:[%s8783_s8 + $0x2e8] sm:$0xf] }
 0x1b2   : > { %v7525_v18 = vadd.f32 %v7524_v44, %v12317_v38  ;;  %1534 = vbcast.lane.c.b16.xlu0 %v9419_v53, 256  ;;  %v10251_v26 = vmul.bf16 %v3506_v8, %v496_v57  ;;  %v10253_v52 = vmul.bf16 %v3513_v7, %v497_v40  ;;  %v12319_v61 = vunpack.c.l.bf16 %v9790_v9  ;;  %v508_v57 = vld [vmem:[%s8783_s8 + $0x300] sm:$0xf] }
 0x1b3   : > { %v1294_v29 = vpop.permute.xlu1 %1293  ;;  %v3555_v9 = vrot.slane %v10170_v46, %v8851_v37 }
 0x1b4   : > { %v7526_v51 = vadd.f32 %v7525_v18, %v12318_v2  ;;  %v1290_v13 = vpop.permute.xlu0 %1289  ;;  %v7488_v38 = vadd.f32 %v7487_v35, %v12319_v61  ;;  %v12320_v18 = vunpack.c.l.bf16 %v10052_v58  ;;  %v3604_v35 = vrot.slane %v1294_v29, %v8848_v36 }
 0x1b5   : > { %1546 = vbcast.lane.c.b16.xlu1 %v9419_v53, 304  ;;  %v12321_v58 = vunpack.c.l.bf16 %v10019_v15  ;;  %v10274_v61 = vmul.bf16 %v3548_v21, %v502_v25  ;;  %v3611_v8 = vrot.slane %v1294_v29, %v8851_v37  ;;  %v3590_v7 = vrot.slane %v1290_v13, %v8848_v36 }
 0x1b6   : > { %v7527_v2 = vadd.f32 %v7526_v51, %v12320_v18  ;;  %1542 = vbcast.lane.c.b16.xlu0 %v9419_v53, 288  ;;  %v503_v51 = vld [vmem:[%s8783_s8 + $0x2ec] sm:$0xf]  ;;  %v6530_v59 = vmul.bf16 %v3604_v35, %v510_v14  ;;  %v3597_v20 = vrot.slane %v1290_v13, %v8851_v37  ;;  %v12324_v25 = vunpack.c.l.bf16 %v10031_v63  ;;  %v500_v14 = vld [vmem:[%s8783_s8 + $0x2e0] sm:$0xf] }
 0x1b7   : > { %12322 = vst [vmem:[#allocation32_spill] sm:$0xff] %v10274_v61  ;;  %v511_v18 = vld [vmem:[%s8783_s8 + $0x30c] sm:$0xf]  ;;  %v1302_v44 = vpop.permute.xlu1 %1301  ;;  %v3534_v29 = vrot.slane %v10180_v55, %v8848_v36  ;;  %v6528_v30 = vmul.bf16 %v3590_v7, %v508_v57  ;;  %v10290_v46 = vmul.bf16 %v3555_v9, %v503_v51  ;;  %v3541_v13 = vrot.slane %v10180_v55, %v8851_v37  ;;  %v512_v57 = vld [vmem:[%s8783_s8 + $0x310] sm:$0xf] }
 0x1b8   : > { %v7528_v40 = vadd.f32 %v7527_v2, %v12321_v58  ;;  %v1298_v15 = vpop.permute.xlu0 %1297  ;;  %v12323_v2 = vunpack.c.l.bf16 %v9875_v10  ;;  %v6531_v10 = vmul.bf16 %v3611_v8, %v511_v18  ;;  %v6529_v35 = vmul.bf16 %v3597_v20, %v509_v16  ;;  %v501_v51 = vld [vmem:[%s8783_s8 + $0x2e4] sm:$0xf]  ;;  %v513_v20 = vld [vmem:[%s8783_s8 + $0x314] sm:$0xf] }
 0x1b9   : > { %1554 = vbcast.lane.c.b16.xlu1 %v9419_v53, 336  ;;  %v3576_v7 = vrot.slane %v10213_v3, %v8848_v36  ;;  %v7041_v9 = vunpack.c.l.bf16 %v6528_v30  ;;  %v7043_v55 = vunpack.c.l.bf16 %v6530_v59  ;;  %v3632_v16 = vrot.slane %v1302_v44, %v8848_v36 }
 0x1ba   : > { %v7489_v21 = vadd.f32 %v7488_v38, %v12323_v2  ;;  %v7529_v58 = vadd.f32 %v7528_v40, %v12324_v25  ;;  %1550 = vbcast.lane.c.b16.xlu0 %v9419_v53, 320  ;;  %v7042_v8 = vunpack.c.l.bf16 %v6529_v35  ;;  %v3618_v27 = vrot.slane %v1298_v15, %v8848_v36  ;;  %v514_v38 = vld [vmem:[%s8783_s8 + $0x318] sm:$0xf] }
 0x1bb   : > { %v10302_v40 = vpop.permute.xlu1 %1309  ;;  %v12325_v18 = vunpack.c.l.bf16 %v9892_v49  ;;  %v10312_v30 = vmul.bf16 %v3534_v29, %v500_v14  ;;  %v3625_v59 = vrot.slane %v1298_v15, %v8851_v37  ;;  %v7044_v35 = vunpack.c.l.bf16 %v6531_v10  ;;  %v515_v15 = vld [vmem:[%s8783_s8 + $0x31c] sm:$0xf] }
 0x1bc   : > { %v7530_v63 = vadd.f32 %v7529_v58, %v7009_v19  ;;  %v1306_v19 = vpop.permute.xlu0 %1305  ;;  %v506_v58 = vld [vmem:[%s8783_s8 + $0x2f8] sm:$0xf]  ;;  %v7568_v31 = vadd.f32 %v7042_v8, %v7041_v9  ;;  %v3639_v24 = vrot.slane %v1302_v44, %v8851_v37  ;;  %v6532_v61 = vmul.bf16 %v3618_v27, %v512_v57  ;;  %v507_v10 = vld [vmem:[%s8783_s8 + $0x2fc] sm:$0xf] }
 0x1bd   : > { %v7490_v2 = vadd.f32 %v7489_v21, %v12325_v18  ;;  %1562 = vbcast.lane.c.b16.xlu1 %v9419_v53, 368  ;;  %v12326_v49 = vunpack.c.l.bf16 %v10085_v23  ;;  %v10323_v21 = vmul.bf16 %v3541_v13, %v501_v51  ;;  %v3583_v29 = vrot.slane %v10213_v3, %v8851_v37  ;;  %v524_v3 = vld [vmem:[%s8783_s8 + $0x340] sm:$0xf] }
 0x1be   : > { %v7531_v25 = vadd.f32 %v7530_v63, %v7010_v48  ;;  %1558 = vbcast.lane.c.b16.xlu0 %v9419_v53, 352  ;;  %v10331_v63 = vmul.bf16 %v3576_v7, %v506_v58  ;;  %v7569_v44 = vadd.f32 %v7568_v31, %v7043_v55  ;;  %v6534_v53 = vmul.bf16 %v3632_v16, %v514_v38  ;;  %v518_v55 = vld [vmem:[%s8783_s8 + $0x328] sm:$0xf] }
 0x1bf   : > { %v10328_v14 = vpop.permute.xlu1 %1317  ;;  %v6533_v9 = vmul.bf16 %v3625_v59, %v513_v20  ;;  %v12327_v57 = vunpack.c.l.bf16 %v9829_v62  ;;  %v12328_v51 = vunpack.c.l.bf16 %v10087_v4  ;;  %v3660_v27 = vrot.slane %v10302_v40, %v8848_v36  ;;  %v527_v20 = vld [vmem:[%s8783_s8 + $0x34c] sm:$0xf] }
 0x1c0   : > { %v7532_v5 = vadd.f32 %v7531_v25, %v12326_v49  ;;  %v10333_v23 = vpop.permute.xlu0 %1313  ;;  %v6535_v7 = vmul.bf16 %v3639_v24, %v515_v15  ;;  %v7045_v18 = vunpack.c.l.bf16 %v6532_v61  ;;  %v7570_v31 = vadd.f32 %v7569_v44, %v7044_v35  ;;  %v517_v49 = vld [vmem:[%s8783_s8 + $0x324] sm:$0xf]  ;;  %v504_v44 = vld [vmem:[%s8783_s8 + $0x2f0] sm:$0xf] }
 0x1c1   : > { %v7491_v13 = vadd.f32 %v7490_v2, %v12327_v57  ;;  %v3646_v38 = vrot.slane %v1306_v19, %v8848_v36  ;;  %v12329_v16 = vunpack.c.l.bf16 %v10114_v28  ;;  %v10347_v4 = vmul.bf16 %v3583_v29, %v507_v10  ;;  %v516_v2 = vld [vmem:[%s8783_s8 + $0x320] sm:$0xf] }
 0x1c2   : > { %v7533_v8 = vadd.f32 %v7532_v5, %v12328_v51  ;;  %v3653_v25 = vrot.slane %v1306_v19, %v8851_v37  ;;  %v3562_v24 = vrot.slane %v10223_v56, %v8848_v36  ;;  %v7047_v61 = vunpack.c.l.bf16 %v6534_v53 }
 0x1c3   : > { %12330 = vst [vmem:[#allocation33_spill] sm:$0xff] %v10347_v4  ;;  %v10351_v58 = vpop.permute.xlu1 %1328  ;;  %v7046_v59 = vunpack.c.l.bf16 %v6533_v9  ;;  %v7571_v35 = vadd.f32 %v7570_v31, %v7045_v18  ;;  %v12331_v28 = vunpack.c.l.bf16 %v9860_v0  ;;  %v12332_v29 = vunpack.c.l.bf16 %v10116_v34  ;;  %v519_v9 = vld [vmem:[%s8783_s8 + $0x32c] sm:$0xf] }
 0x1c4   : > { %v7534_v62 = vadd.f32 %v7533_v8, %v12329_v16  ;;  %v10356_v5 = vpop.permute.xlu0 %1324  ;;  %v3667_v19 = vrot.slane %v10302_v40, %v8851_v37  ;;  %v6538_v57 = vmul.bf16 %v3660_v27, %v518_v55  ;;  %v7048_v8 = vunpack.c.l.bf16 %v6535_v7  ;;  %v12334_v55 = vld [vmem:[#allocation23_spill] sm:$0xff] }
 0x1c5   : > { %v7492_v15 = vadd.f32 %v7491_v13, %v12331_v28  ;;  %v7572_v53 = vadd.f32 %v7571_v35, %v7046_v59  ;;  %v6536_v18 = vmul.bf16 %v3646_v38, %v516_v2  ;;  %v12333_v31 = vunpack.c.l.bf16 %v10104_v47  ;;  %v12335_v59 = vld [vmem:[#allocation28_spill] sm:$0xff] }
 0x1c6   : > { %v7535_v10 = vadd.f32 %v7534_v62, %v12332_v29  ;;  %v3569_v34 = vrot.slane %v10223_v56, %v8851_v37  ;;  %v6537_v13 = vmul.bf16 %v3653_v25, %v517_v49  ;;  %v10374_v40 = vmul.bf16 %v3562_v24, %v504_v44  ;;  %v505_v49 = vld [vmem:[%s8783_s8 + $0x2f4] sm:$0xf] }
 0x1c7   : > { %v10372_v62 = vpop.permute.xlu1 %1336  ;;  %v7573_v27 = vadd.f32 %v7572_v53, %v7047_v61  ;;  %v10377_v7 = vsub.s32 3, %v12334_v55  ;;  %v10381_v38 = vrot.slane %v12335_v59, %v8958_v45  ;;  %v7493_v2 = vrot.slane %v7492_v15, 4 }
 0x1c8   : > { %v7536_v16 = vadd.f32 %v7535_v10, %v12333_v31  ;;  %v10383_v47 = vpop.permute.xlu0 %1332  ;;  %v12336_v35 = vunpack.c.l.bf16 %v10112_v1  ;;  %v6539_v25 = vmul.bf16 %v3667_v19, %v519_v9  ;;  %v7051_v24 = vunpack.c.l.bf16 %v6538_v57  ;;  %v12337_v10 = vld [vmem:[#allocation24_spill] sm:$0xff] }
 0x1c9   : > { %v7049_v61 = vunpack.c.l.bf16 %v6536_v18  ;;  %v7574_v28 = vadd.f32 %v7573_v27, %v7048_v8  ;;  %v3674_v29 = vrot.slane %v10333_v23, %v8848_v36  ;;  %v10392_v44 = vrot.slane %v12337_v10, %v10377_v7  ;;  %1569 = vbcast.lane.c.b16.xlu0 %v10381_v38, 256  ;;  %v520_v8 = vld [vmem:[%s8783_s8 + $0x330] sm:$0xf]  ;;  %v523_v27 = vld [vmem:[%s8783_s8 + $0x33c] sm:$0xf] }
 0x1ca   : > { %v7537_v56 = vadd.f32 %v7536_v16, %v12336_v35  ;;  %v12338_v53 = vunpack.c.l.bf16 %v10142_v41  ;;  %v7050_v31 = vunpack.c.l.bf16 %v6537_v13  ;;  %v3688_v19 = vrot.slane %v10328_v14, %v8848_v36  ;;  %v522_v16 = vld [vmem:[%s8783_s8 + $0x338] sm:$0xf]  ;;  %v526_v10 = vld [vmem:[%s8783_s8 + $0x348] sm:$0xf] }
 0x1cb   : > { %v3695_v57 = vrot.slane %v10328_v14, %v8851_v37  ;;  %v10402_v9 = vpop.permute.xlu1 %1344  ;;  %v7575_v18 = vadd.f32 %v7574_v28, %v7049_v61  ;;  %v3681_v41 = vrot.slane %v10333_v23, %v8851_v37  ;;  %1709 = vbcast.lane.c.b16.xlu1 %v10392_v44, 256  ;;  %v3716_v13 = vrot.slane %v10351_v58, %v8848_v36  ;;  %v521_v28 = vld [vmem:[%s8783_s8 + $0x334] sm:$0xf] }
 0x1cc   : > { %v7538_v1 = vadd.f32 %v7537_v56, %v12338_v53  ;;  %v10413_v55 = vrot.slane %v12335_v59, %v10377_v7  ;;  %v10415_v14 = vpop.permute.xlu0 %1340  ;;  %v12339_v35 = vunpack.c.l.bf16 %v10162_v32  ;;  %v10419_v61 = vmul.bf16 %v3569_v34, %v505_v49 }
 0x1cd   : > { %v3723_v23 = vrot.slane %v10351_v58, %v8851_v37  ;;  %v3702_v53 = vrot.slane %v10356_v5, %v8848_v36  ;;  %v7052_v51 = vunpack.c.l.bf16 %v6539_v25  ;;  %v7576_v59 = vadd.f32 %v7575_v18, %v7050_v31  ;;  %1573 = vbcast.lane.c.b16.xlu0 %v10381_v38, 272  ;;  %v539_v31 = vld [vmem:[%s8783_s8 + $0x37c] sm:$0xf] }
 0x1ce   : > { %v7539_v56 = vadd.f32 %v7538_v1, %v12339_v35  ;;  %v6540_v48 = vmul.bf16 %v3674_v29, %v520_v8  ;;  %v10431_v32 = vadd.f32 %v7493_v2, %v7492_v15  ;;  %v12341_v34 = vunpack.c.l.bf16 %v10125_v54 }
 0x1cf   : > { %v6542_v1 = vmul.bf16 %v3688_v19, %v522_v16  ;;  %v10435_v58 = vmul.bf16 %v3695_v57, %v523_v27  ;;  %v10437_v35 = vpop.permute.xlu1 %1352  ;;  %v7577_v4 = vadd.f32 %v7576_v59, %v7051_v24  ;;  %v6541_v0 = vmul.bf16 %v3681_v41, %v521_v28  ;;  %1849 = vbcast.lane.c.b16.xlu1 %v10413_v55, 256  ;;  %v525_v24 = vld [vmem:[%s8783_s8 + $0x344] sm:$0xf] }
 0x1d0   : > { %12340 = vst [vmem:[#allocation34_spill] sm:$0xff] %v10431_v32  ;;  %v7540_v49 = vadd.f32 %v7539_v56, %v12341_v34  ;;  %v10439_v25 = vmul.bf16 %v3716_v13, %v526_v10  ;;  %v3709_v29 = vrot.slane %v10356_v5, %v8851_v37  ;;  %v10444_v15 = vpop.permute.xlu0 %1348  ;;  %v12342_v54 = vunpack.c.l.bf16 %v10139_v6 }
 0x1d1   : > { %v10449_v19 = vmul.bf16 %v3723_v23, %v527_v20  ;;  %v10452_v57 = vmul.bf16 %v3702_v53, %v524_v3  ;;  %v7053_v8 = vunpack.c.l.bf16 %v6540_v48  ;;  %v7578_v18 = vadd.f32 %v7577_v4, %v7052_v51  ;;  %1713 = vbcast.lane.c.b16.xlu0 %v10392_v44, 272  ;;  %v530_v3 = vld [vmem:[%s8783_s8 + $0x358] sm:$0xf]  ;;  %v531_v48 = vld [vmem:[%s8783_s8 + $0x35c] sm:$0xf] }
 0x1d2   : > { %v7541_v2 = vadd.f32 %v7540_v49, %v12342_v54  ;;  %v3744_v5 = vrot.slane %v10372_v62, %v8848_v36  ;;  %v3751_v16 = vrot.slane %v10372_v62, %v8851_v37  ;;  %v12343_v27 = vunpack.c.l.bf16 %v10207_v50 }
 0x1d3   : > { %v7055_v20 = vunpack.c.l.bf16 %v6542_v1  ;;  %v7056_v13 = vunpack.c.l.bf16 %v10435_v58  ;;  %v10465_v4 = vpop.permute.xlu1 %1363  ;;  %v7054_v51 = vunpack.c.l.bf16 %v6541_v0  ;;  %v7579_v56 = vadd.f32 %v7578_v18, %v7053_v8  ;;  %1853 = vbcast.lane.c.b16.xlu1 %v10413_v55, 272  ;;  %v528_v58 = vld [vmem:[%s8783_s8 + $0x350] sm:$0xf]  ;;  %v532_v8 = vld [vmem:[%s8783_s8 + $0x360] sm:$0xf] }
 0x1d4   : > { %v7542_v41 = vadd.f32 %v7541_v2, %v12343_v27  ;;  %v7059_v62 = vunpack.c.l.bf16 %v10439_v25  ;;  %v6545_v28 = vmul.bf16 %v3709_v29, %v525_v24  ;;  %v10469_v10 = vpop.permute.xlu0 %1359  ;;  %v12344_v50 = vunpack.c.l.bf16 %v10209_v22  ;;  %v529_v2 = vld [vmem:[%s8783_s8 + $0x354] sm:$0xf]  ;;  %v534_v27 = vld [vmem:[%s8783_s8 + $0x368] sm:$0xf] }
 0x1d5   : > { %v7060_v53 = vunpack.c.l.bf16 %v10449_v19  ;;  %v7057_v59 = vunpack.c.l.bf16 %v10452_v57  ;;  %v3730_v0 = vrot.slane %v10383_v47, %v8848_v36  ;;  %v7580_v34 = vadd.f32 %v7579_v56, %v7054_v51  ;;  %1577 = vbcast.lane.c.b16.xlu0 %v10381_v38, 288 }
 0x1d6   : > { %v7543_v23 = vadd.f32 %v7542_v41, %v12344_v50  ;;  %v10477_v49 = vmul.bf16 %v3744_v5, %v530_v3  ;;  %v10479_v1 = vmul.bf16 %v3751_v16, %v531_v48  ;;  %v3737_v29 = vrot.slane %v10383_v47, %v8851_v37 }
 0x1d7   : > { %v12345_v22 = vunpack.c.l.bf16 %v10193_v60  ;;  %v3772_v24 = vrot.slane %v10402_v9, %v8848_v36  ;;  %v3779_v57 = vrot.slane %v10402_v9, %v8851_v37  ;;  %v3758_v18 = vrot.slane %v10415_v14, %v8848_v36  ;;  %v10495_v5 = vpop.permute.xlu1 %1371  ;;  %v535_v60 = vld [vmem:[%s8783_s8 + $0x36c] sm:$0xf]  ;;  %1717 = vbcast.lane.c.b16.xlu1 %v10392_v44, 288 }
 0x1d8   : > { %v7581_v47 = vadd.f32 %v7580_v34, %v7055_v20  ;;  %v7058_v16 = vunpack.c.l.bf16 %v6545_v28  ;;  %v3765_v41 = vrot.slane %v10415_v14, %v8851_v37  ;;  %v3800_v9 = vrot.slane %v10437_v35, %v8848_v36  ;;  %v10504_v3 = vpop.permute.xlu0 %1367  ;;  %v533_v20 = vld [vmem:[%s8783_s8 + $0x364] sm:$0xf]  ;;  %v538_v28 = vld [vmem:[%s8783_s8 + $0x378] sm:$0xf] }
 0x1d9   : > { %v7544_v54 = vadd.f32 %v7543_v23, %v12345_v22  ;;  %v12346_v48 = vunpack.c.l.bf16 %v10195_v33  ;;  %v10508_v56 = vmul.bf16 %v3730_v0, %v528_v58  ;;  %v3807_v50 = vrot.slane %v10437_v35, %v8851_v37  ;;  %v536_v33 = vld [vmem:[%s8783_s8 + $0x370] sm:$0xf]  ;;  %1857 = vbcast.lane.c.b16.xlu0 %v10413_v55, 288 }
 0x1da   : > { %v3786_v14 = vrot.slane %v10444_v15, %v8848_v36  ;;  %v7582_v23 = vadd.f32 %v7581_v47, %v7056_v13  ;;  %v7063_v34 = vunpack.c.l.bf16 %v10477_v49  ;;  %v10518_v6 = vmul.bf16 %v3737_v29, %v529_v2 }
 0x1db   : > { %v7545_v51 = vadd.f32 %v7544_v54, %v12346_v48  ;;  %v12347_v0 = vunpack.c.l.bf16 %v10229_v39  ;;  %v10525_v54 = vmul.bf16 %v3772_v24, %v534_v27  ;;  %v10527_v35 = vmul.bf16 %v3779_v57, %v535_v60  ;;  %v10531_v13 = vpop.permute.xlu1 %1379  ;;  %1581 = vbcast.lane.c.b16.xlu1 %v10381_v38, 304 }
 0x1dc   : > { %v10529_v48 = vmul.bf16 %v3758_v18, %v532_v8  ;;  %v7583_v47 = vadd.f32 %v7582_v23, %v7057_v59  ;;  %v10533_v22 = vmul.bf16 %v3765_v41, %v533_v20  ;;  %v10535_v29 = vmul.bf16 %v3800_v9, %v538_v28  ;;  %v10540_v39 = vpop.permute.xlu0 %1375  ;;  %v537_v59 = vld [vmem:[%s8783_s8 + $0x374] sm:$0xf] }
 0x1dd   : > { %v7546_v58 = vadd.f32 %v7545_v51, %v12347_v0  ;;  %v3793_v2 = vrot.slane %v10444_v15, %v8851_v37  ;;  %v12348_v24 = vunpack.c.l.bf16 %v10231_v42  ;;  %v7061_v8 = vunpack.c.l.bf16 %v10508_v56  ;;  %1721 = vbcast.lane.c.b16.xlu0 %v10392_v44, 304 }
 0x1de   : > { %v10545_v18 = vmul.bf16 %v3807_v50, %v539_v31  ;;  %v10548_v27 = vmul.bf16 %v3786_v14, %v536_v33  ;;  %v7584_v60 = vadd.f32 %v7583_v47, %v7058_v16  ;;  %v7062_v41 = vunpack.c.l.bf16 %v10518_v6  ;;  %v542_v16 = vld [vmem:[%s8783_s8 + $0x388] sm:$0xf]  ;;  %v543_v6 = vld [vmem:[%s8783_s8 + $0x38c] sm:$0xf] }
 0x1df   : > { %v7547_v57 = vadd.f32 %v7546_v58, %v12348_v24  ;;  %v3828_v15 = vrot.slane %v10465_v4, %v8848_v36  ;;  %v3835_v9 = vrot.slane %v10465_v4, %v8851_v37  ;;  %v12349_v42 = vunpack.c.l.bf16 %v10215_v11  ;;  %v10563_v28 = vpop.permute.xlu1 %1387  ;;  %1861 = vbcast.lane.c.b16.xlu1 %v10413_v55, 304  ;;  %v550_v58 = vld [vmem:[%s8783_s8 + $0x3a8] sm:$0xf]  ;;  %v551_v4 = vld [vmem:[%s8783_s8 + $0x3ac] sm:$0xf] }
 0x1e0   : > { %v7065_v20 = vunpack.c.l.bf16 %v10529_v48  ;;  %v7585_v50 = vadd.f32 %v7584_v60, %v7059_v62  ;;  %v10569_v14 = vmul.bf16 %v3793_v2, %v537_v59  ;;  %v10572_v23 = vpop.permute.xlu0 %1383  ;;  %v12350_v33 = vunpack.c.l.bf16 %v10217_v43 }
 0x1e1   : > { %v7548_v51 = vadd.f32 %v7547_v57, %v12349_v42  ;;  %v3814_v62 = vrot.slane %v10469_v10, %v8848_v36  ;;  %v10582_v2 = vmul.bf16 %v3828_v15, %v542_v16  ;;  %v10584_v24 = vmul.bf16 %v3835_v9, %v543_v6  ;;  %v540_v57 = vld [vmem:[%s8783_s8 + $0x380] sm:$0xf]  ;;  %1585 = vbcast.lane.c.b16.xlu0 %v10381_v38, 320  ;;  %v541_v42 = vld [vmem:[%s8783_s8 + $0x384] sm:$0xf] }
 0x1e2   : > { %v7586_v47 = vadd.f32 %v7585_v50, %v7060_v53  ;;  %v3821_v43 = vrot.slane %v10469_v10, %v8851_v37  ;;  %v12351_v59 = vunpack.c.l.bf16 %v10251_v26  ;;  %v3856_v19 = vrot.slane %v10495_v5, %v8848_v36  ;;  %v544_v15 = vld [vmem:[%s8783_s8 + $0x390] sm:$0xf]  ;;  %v546_v26 = vld [vmem:[%s8783_s8 + $0x398] sm:$0xf]  ;;  %v547_v6 = vld [vmem:[%s8783_s8 + $0x39c] sm:$0xf] }
 0x1e3   : > { %v7549_v0 = vadd.f32 %v7548_v51, %v12350_v33  ;;  %v3863_v53 = vrot.slane %v10495_v5, %v8851_v37  ;;  %v3842_v9 = vrot.slane %v10504_v3, %v8848_v36  ;;  %v10600_v51 = vpop.permute.xlu1 %1398  ;;  %v3849_v50 = vrot.slane %v10504_v3, %v8851_v37  ;;  %1725 = vbcast.lane.c.b16.xlu1 %v10392_v44, 320 }
 0x1e4   : > { %v7587_v10 = vadd.f32 %v7586_v47, %v7061_v8  ;;  %v3884_v5 = vrot.slane %v10531_v13, %v8848_v36  ;;  %v10610_v33 = vpop.permute.xlu0 %1394  ;;  %v10614_v8 = vmul.bf16 %v3814_v62, %v540_v57  ;;  %v545_v47 = vld [vmem:[%s8783_s8 + $0x394] sm:$0xf]  ;;  %v3891_v11 = vrot.slane %v10531_v13, %v8851_v37 }
 0x1e5   : > { %v7550_v60 = vadd.f32 %v7549_v0, %v12351_v59  ;;  %v12352_v0 = vunpack.c.l.bf16 %v10253_v52  ;;  %v3870_v3 = vrot.slane %v10540_v39, %v8848_v36  ;;  %v10624_v31 = vmul.bf16 %v3821_v43, %v541_v42  ;;  %v548_v52 = vld [vmem:[%s8783_s8 + $0x3a0] sm:$0xf]  ;;  %1865 = vbcast.lane.c.b16.xlu0 %v10413_v55, 320 }
 0x1e6   : > { %v7588_v16 = vadd.f32 %v7587_v10, %v7062_v41  ;;  %v12353_v62 = vunpack.c.l.bf16 %v10238_v17  ;;  %v10633_v13 = vmul.bf16 %v3863_v53, %v547_v6  ;;  %v10641_v42 = vmul.bf16 %v3849_v50, %v545_v47 }
 0x1e7   : > { %v7551_v59 = vadd.f32 %v7550_v60, %v12352_v0  ;;  %v10631_v60 = vmul.bf16 %v3856_v19, %v546_v26  ;;  %v10635_v0 = vmul.bf16 %v3842_v9, %v544_v15  ;;  %v10637_v41 = vpop.permute.xlu1 %1406  ;;  %v10643_v10 = vmul.bf16 %v3884_v5, %v550_v58  ;;  %1589 = vbcast.lane.c.b16.xlu1 %v10381_v38, 336  ;;  %v554_v5 = vld [vmem:[%s8783_s8 + $0x3b8] sm:$0xf] }
 0x1e8   : > { %v7589_v43 = vadd.f32 %v7588_v16, %v7063_v34  ;;  %v3877_v56 = vrot.slane %v10540_v39, %v8851_v37  ;;  %v10648_v17 = vpop.permute.xlu0 %1402  ;;  %v12354_v19 = vunpack.c.l.bf16 %v10240_v12  ;;  %v7073_v15 = vunpack.c.l.bf16 %v10614_v8  ;;  %v549_v34 = vld [vmem:[%s8783_s8 + $0x3a4] sm:$0xf] }
 0x1e9   : > { %v7552_v57 = vadd.f32 %v7551_v59, %v12353_v62  ;;  %v10653_v49 = vmul.bf16 %v3891_v11, %v551_v4  ;;  %v10656_v9 = vmul.bf16 %v3870_v3, %v548_v52  ;;  %v12355_v58 = vunpack.c.l.bf16 %v10479_v1  ;;  %1729 = vbcast.lane.c.b16.xlu0 %v10392_v44, 336  ;;  %v555_v59 = vld [vmem:[%s8783_s8 + $0x3bc] sm:$0xf] }
 0x1ea   : > { %v3912_v26 = vrot.slane %v10563_v28, %v8848_v36  ;;  %v3919_v12 = vrot.slane %v10563_v28, %v8851_v37  ;;  %v12356_v6 = vunpack.c.l.bf16 %v10312_v30  ;;  %v10679_v52 = vmul.bf16 %v3877_v56, %v549_v34 }
 0x1eb   : > { %v7553_v53 = vadd.f32 %v7552_v57, %v12354_v19  ;;  %v7590_v16 = vadd.f32 %v7589_v43, %v12355_v58  ;;  %v10673_v47 = vpop.permute.xlu1 %1414  ;;  %1869 = vbcast.lane.c.b16.xlu1 %v10413_v55, 336  ;;  %v12357_v57 = vunpack.c.l.bf16 %v10323_v21  ;;  %v3905_v21 = vrot.slane %v10572_v23, %v8851_v37  ;;  %v553_v19 = vld [vmem:[%s8783_s8 + $0x3b4] sm:$0xf] }
 0x1ec   : > { %v10682_v62 = vpop.permute.xlu0 %1410  ;;  %v10692_v34 = vmul.bf16 %v3912_v26, %v554_v5  ;;  %v10694_v58 = vmul.bf16 %v3919_v12, %v555_v59  ;;  %v3947_v26 = vrot.slane %v10600_v51, %v8851_v37  ;;  %v556_v12 = vld [vmem:[%s8783_s8 + $0x3c0] sm:$0xf]  ;;  %v3926_v5 = vrot.slane %v10610_v33, %v8848_v36 }
 0x1ed   : > { %v7554_v4 = vadd.f32 %v7553_v53, %v12356_v6  ;;  %v7591_v3 = vadd.f32 %v7590_v16, %v7065_v20  ;;  %v3898_v20 = vrot.slane %v10572_v23, %v8848_v36  ;;  %v12358_v53 = vunpack.c.l.bf16 %v10533_v22  ;;  %v552_v16 = vld [vmem:[%s8783_s8 + $0x3b0] sm:$0xf]  ;;  %1593 = vbcast.lane.c.b16.xlu0 %v10381_v38, 352  ;;  %v12359_v6 = vld [vmem:[#allocation32_spill] sm:$0xff] }
 0x1ee   : > { %v3940_v22 = vrot.slane %v10600_v51, %v8848_v36  ;;  %v12361_v23 = vunpack.c.l.bf16 %v10525_v54  ;;  %v3968_v51 = vrot.slane %v10637_v41, %v8848_v36  ;;  %v12362_v48 = vunpack.c.l.bf16 %v10290_v46  ;;  %v563_v46 = vld [vmem:[%s8783_s8 + $0x3dc] sm:$0xf] }
 0x1ef   : > { %v7555_v43 = vadd.f32 %v7554_v4, %v12357_v57  ;;  %v7592_v56 = vadd.f32 %v7591_v3, %v12358_v53  ;;  %v12360_v4 = vunpack.c.l.bf16 %v12359_v6  ;;  %v10710_v59 = vpop.permute.xlu1 %1422  ;;  %v558_v53 = vld [vmem:[%s8783_s8 + $0x3c8] sm:$0xf]  ;;  %v559_v6 = vld [vmem:[%s8783_s8 + $0x3cc] sm:$0xf]  ;;  %1733 = vbcast.lane.c.b16.xlu1 %v10392_v44, 352  ;;  %v3975_v50 = vrot.slane %v10637_v41, %v8851_v37 }
 0x1f0   : > { %v10722_v30 = vpop.permute.xlu0 %1418  ;;  %v12363_v11 = vunpack.c.l.bf16 %v10527_v35  ;;  %v10737_v25 = vmul.bf16 %v3905_v21, %v553_v19  ;;  %v10745_v41 = vmul.bf16 %v3940_v22, %v558_v53  ;;  %v10749_v35 = vmul.bf16 %v3926_v5, %v556_v12 }
 0x1f1   : > { %v7556_v57 = vadd.f32 %v7555_v43, %v12360_v4  ;;  %v7593_v3 = vadd.f32 %v7592_v56, %v12361_v23  ;;  %v3933_v4 = vrot.slane %v10610_v33, %v8851_v37  ;;  %v10726_v56 = vmul.bf16 %v3898_v20, %v552_v16  ;;  %v557_v23 = vld [vmem:[%s8783_s8 + $0x3c4] sm:$0xf]  ;;  %v562_v43 = vld [vmem:[%s8783_s8 + $0x3d8] sm:$0xf]  ;;  %1873 = vbcast.lane.c.b16.xlu0 %v10413_v55, 352 }
 0x1f2   : > { %v3954_v33 = vrot.slane %v10648_v17, %v8848_v36  ;;  %v3961_v20 = vrot.slane %v10648_v17, %v8851_v37  ;;  %v12364_v19 = vunpack.c.l.bf16 %v10548_v27  ;;  %v10756_v39 = vmul.bf16 %v3968_v51, %v562_v43 }
 0x1f3   : > { %v7557_v54 = vadd.f32 %v7556_v57, %v12362_v48  ;;  %v7594_v28 = vadd.f32 %v7593_v3, %v12363_v11  ;;  %v560_v48 = vld [vmem:[%s8783_s8 + $0x3d0] sm:$0xf]  ;;  %v10747_v57 = vmul.bf16 %v3947_v26, %v559_v6  ;;  %v561_v11 = vld [vmem:[%s8783_s8 + $0x3d4] sm:$0xf]  ;;  %v1434_v3 = vpop.permute.xlu1 %1433  ;;  %v10754_v1 = vmul.bf16 %v3933_v4, %v557_v23  ;;  %1597 = vbcast.lane.c.b16.xlu1 %v10381_v38, 368 }
 0x1f4   : > { %v3996_v17 = vrot.slane %v10673_v47, %v8848_v36  ;;  %v1430_v22 = vpop.permute.xlu0 %1429  ;;  %v12365_v26 = vunpack.c.l.bf16 %v10374_v40  ;;  %v10764_v53 = vmul.bf16 %v3975_v50, %v563_v46  ;;  %v10766_v27 = vmul.bf16 %v3954_v33, %v560_v48  ;;  %v567_v23 = vld [vmem:[%s8783_s8 + $0x3ec] sm:$0xf]  ;;  %v565_v40 = vld [vmem:[%s8783_s8 + $0x3e4] sm:$0xf] }
 0x1f5   : > { %v7595_v21 = vadd.f32 %v7594_v28, %v12364_v19  ;;  %v566_v28 = vld [vmem:[%s8783_s8 + $0x3e8] sm:$0xf]  ;;  %v12366_v43 = vunpack.c.l.bf16 %v10569_v14  ;;  %v10772_v4 = vmul.bf16 %v3961_v20, %v561_v11  ;;  %v4003_v51 = vrot.slane %v10673_v47, %v8851_v37  ;;  %1737 = vbcast.lane.c.b16.xlu0 %v10392_v44, 368  ;;  %v564_v11 = vld [vmem:[%s8783_s8 + $0x3e0] sm:$0xf] }
 0x1f6   : > { %v7558_v12 = vadd.f32 %v7557_v54, %v12365_v26  ;;  %v3982_v14 = vrot.slane %v10682_v62, %v8848_v36  ;;  %v12367_v46 = vunpack.c.l.bf16 %v10535_v29  ;;  %v10789_v20 = vmul.bf16 %v3996_v17, %v566_v28 }
 0x1f7   : > { %v7596_v6 = vadd.f32 %v7595_v21, %v12366_v43  ;;  %v10783_v33 = vpop.permute.xlu1 %1441  ;;  %1877 = vbcast.lane.c.b16.xlu1 %v10413_v55, 368  ;;  %v12369_v21 = vunpack.c.l.bf16 %v10419_v61  ;;  %v12371_v17 = vunpack.c.l.bf16 %v10545_v18  ;;  %v10806_v44 = vmul.bf16 %v4003_v51, %v567_v23  ;;  %v12373_v61 = vld [vmem:[#allocation29_spill] sm:$0xff] }
 0x1f8   : > { %12368 = vst [vmem:[#allocation35_spill] sm:$0xff] %v10789_v20  ;;  %v10793_v19 = vpop.permute.xlu0 %1437  ;;  %v10810_v50 = vrot.slane %v12373_v61, %v8958_v45  ;;  %v10815_v29 = vmul.bf16 %v3982_v14, %v564_v11  ;;  %v4052_v43 = vrot.slane %v1434_v3, %v8848_v36  ;;  %v4059_v18 = vrot.slane %v1434_v3, %v8851_v37 }
 0x1f9   : > { %v7597_v48 = vadd.f32 %v7596_v6, %v12367_v46  ;;  %v7559_v26 = vadd.f32 %v7558_v12, %v12369_v21  ;;  %v12370_v6 = vld [vmem:[#allocation25_spill] sm:$0xff]  ;;  %12372 = vst [vmem:[#allocation23_spill] sm:$0xff] %v10806_v44  ;;  %v3989_v21 = vrot.slane %v10682_v62, %v8851_v37  ;;  %v4038_v62 = vrot.slane %v1430_v22, %v8848_v36 }
 0x1fa   : > { %v10801_v46 = vrot.slane %v12370_v6, %v10377_v7  ;;  %v574_v12 = vld [vmem:[%s8783_s8 + $0x408] sm:$0xf]  ;;  %v575_v6 = vld [vmem:[%s8783_s8 + $0x40c] sm:$0xf]  ;;  %1604 = vbcast.lane.c.b16.xlu0 %v10810_v50, 256  ;;  %v4045_v14 = vrot.slane %v1430_v22, %v8851_v37  ;;  %v12374_v11 = vunpack.c.l.bf16 %v10331_v63  ;;  %v4024_v8 = vrot.slane %v10710_v59, %v8848_v36 }
 0x1fb   : > { %v7598_v28 = vadd.f32 %v7597_v48, %v12371_v17  ;;  %v572_v48 = vld [vmem:[%s8783_s8 + $0x400] sm:$0xf]  ;;  %v573_v17 = vld [vmem:[%s8783_s8 + $0x404] sm:$0xf]  ;;  %v10822_v55 = vpop.permute.xlu1 %1449  ;;  %v12375_v23 = vunpack.c.l.bf16 %v10624_v31  ;;  %v6595_v16 = vmul.bf16 %v4059_v18, %v575_v6  ;;  %v10845_v63 = vmul.bf16 %v3989_v21, %v565_v40  ;;  %v578_v40 = vld [vmem:[%s8783_s8 + $0x418] sm:$0xf] }
 0x1fc   : > { %1744 = vbcast.lane.c.b16.xlu1 %v10801_v46, 256  ;;  %v10832_v3 = vpop.permute.xlu0 %1445  ;;  %v7560_v47 = vadd.f32 %v7559_v26, %v12374_v11  ;;  %v6592_v22 = vmul.bf16 %v4038_v62, %v572_v48  ;;  %v6593_v38 = vmul.bf16 %v4045_v14, %v573_v17  ;;  %v570_v26 = vld [vmem:[%s8783_s8 + $0x3f8] sm:$0xf]  ;;  %v12376_v31 = vunpack.c.l.bf16 %v10582_v2  ;;  %v576_v21 = vld [vmem:[%s8783_s8 + $0x410] sm:$0xf] }
 0x1fd   : > { %v7599_v51 = vadd.f32 %v7598_v28, %v7073_v15  ;;  %v6594_v15 = vmul.bf16 %v4052_v43, %v574_v12  ;;  %v10840_v28 = vrot.slane %v12373_v61, %v10377_v7  ;;  %v4031_v43 = vrot.slane %v10710_v59, %v8851_v37 }
 0x1fe   : > { %v4080_v61 = vrot.slane %v10783_v33, %v8848_v36  ;;  %v7105_v48 = vunpack.c.l.bf16 %v6592_v22  ;;  %v7106_v17 = vunpack.c.l.bf16 %v6593_v38  ;;  %v4087_v2 = vrot.slane %v10783_v33, %v8851_v37 }
 0x1ff   : > { %v7600_v54 = vadd.f32 %v7599_v51, %v12375_v23  ;;  %v10852_v12 = vpop.permute.xlu1 %1457  ;;  %v7107_v18 = vunpack.c.l.bf16 %v6594_v15  ;;  %1884 = vbcast.lane.c.b16.xlu0 %v10840_v28, 256  ;;  %v12377_v51 = vld [vmem:[#allocation33_spill] sm:$0xff]  ;;  %v4066_v38 = vrot.slane %v10793_v19, %v8848_v36  ;;  %v4073_v14 = vrot.slane %v10793_v19, %v8851_v37 }
 0x200   : > { %1608 = vbcast.lane.c.b16.xlu1 %v10810_v50, 272  ;;  %v10860_v59 = vpop.permute.xlu0 %1453  ;;  %v12378_v23 = vunpack.c.l.bf16 %v12377_v51  ;;  %v12379_v11 = vunpack.c.l.bf16 %v10584_v24  ;;  %v10873_v22 = vmul.bf16 %v4024_v8, %v570_v26  ;;  %v7637_v51 = vadd.f32 %v7106_v17, %v7105_v48  ;;  %v569_v26 = vld [vmem:[%s8783_s8 + $0x3f4] sm:$0xf]  ;;  %v595_v8 = vld [vmem:[%s8783_s8 + $0x45c] sm:$0xf] }
 0x201   : > { %v7601_v6 = vadd.f32 %v7600_v54, %v12376_v31  ;;  %v577_v54 = vld [vmem:[%s8783_s8 + $0x414] sm:$0xf]  ;;  %v7108_v31 = vunpack.c.l.bf16 %v6595_v16  ;;  %v4010_v33 = vrot.slane %v10722_v30, %v8848_v36  ;;  %v4017_v5 = vrot.slane %v10722_v30, %v8851_v37  ;;  %v571_v16 = vld [vmem:[%s8783_s8 + $0x3fc] sm:$0xf] }
 0x202   : > { %v7561_v62 = vadd.f32 %v7560_v47, %v12378_v23  ;;  %v579_v47 = vld [vmem:[%s8783_s8 + $0x41c] sm:$0xf]  ;;  %v568_v23 = vld [vmem:[%s8783_s8 + $0x3f0] sm:$0xf]  ;;  %v6598_v32 = vmul.bf16 %v4080_v61, %v578_v40  ;;  %v6596_v44 = vmul.bf16 %v4066_v38, %v576_v21  ;;  %v12380_v19 = vunpack.c.l.bf16 %v10635_v0 }
 0x203   : > { %v7602_v15 = vadd.f32 %v7601_v6, %v12379_v11  ;;  %v10881_v20 = vpop.permute.xlu1 %1468  ;;  %v7638_v6 = vadd.f32 %v7637_v51, %v7107_v18  ;;  %v6597_v48 = vmul.bf16 %v4073_v14, %v577_v54  ;;  %1748 = vbcast.lane.c.b16.xlu0 %v10801_v46, 272  ;;  %v6599_v40 = vmul.bf16 %v4087_v2, %v579_v47  ;;  %v582_v14 = vld [vmem:[%s8783_s8 + $0x428] sm:$0xf]  ;;  %v580_v2 = vld [vmem:[%s8783_s8 + $0x420] sm:$0xf] }
 0x204   : > { %1888 = vbcast.lane.c.b16.xlu1 %v10840_v28, 272  ;;  %v10890_v30 = vpop.permute.xlu0 %1464  ;;  %v7562_v61 = vrot.slane %v7561_v62, 4  ;;  %v4108_v0 = vrot.slane %v10822_v55, %v8848_v36  ;;  %v12381_v21 = vunpack.c.l.bf16 %v10641_v42  ;;  %v7109_v18 = vunpack.c.l.bf16 %v6596_v44 }
 0x205   : > { %v7603_v24 = vadd.f32 %v7602_v15, %v12380_v19  ;;  %v7639_v54 = vadd.f32 %v7638_v6, %v7108_v31  ;;  %v4094_v11 = vrot.slane %v10832_v3, %v8848_v36  ;;  %v10900_v15 = vmul.bf16 %v4031_v43, %v571_v16  ;;  %v581_v43 = vld [vmem:[%s8783_s8 + $0x424] sm:$0xf] }
 0x206   : > { %v10902_v51 = vmul.bf16 %v4010_v33, %v568_v23  ;;  %v10904_v19 = vmul.bf16 %v4017_v5, %v569_v26  ;;  %v4101_v47 = vrot.slane %v10832_v3, %v8851_v37  ;;  %v12382_v42 = vunpack.c.l.bf16 %v10631_v60 }
 0x207   : > { %v7604_v38 = vadd.f32 %v7603_v24, %v12381_v21  ;;  %v10909_v17 = vpop.permute.xlu1 %1476  ;;  %v7111_v31 = vunpack.c.l.bf16 %v6598_v32  ;;  %v7110_v24 = vunpack.c.l.bf16 %v6597_v48  ;;  %v7640_v6 = vadd.f32 %v7639_v54, %v7109_v18  ;;  %1612 = vbcast.lane.c.b16.xlu0 %v10810_v50, 288  ;;  %v583_v21 = vld [vmem:[%s8783_s8 + $0x42c] sm:$0xf]  ;;  %v586_v18 = vld [vmem:[%s8783_s8 + $0x438] sm:$0xf] }
 0x208   : > { %1752 = vbcast.lane.c.b16.xlu1 %v10801_v46, 288  ;;  %v10916_v5 = vpop.permute.xlu0 %1472  ;;  %v10918_v23 = vadd.f32 %v7562_v61, %v7561_v62  ;;  %v4115_v3 = vrot.slane %v10822_v55, %v8851_v37  ;;  %v10922_v33 = vmul.bf16 %v4108_v0, %v582_v14  ;;  %v4136_v32 = vrot.slane %v10852_v12, %v8848_v36 }
 0x209   : > { %v7605_v44 = vadd.f32 %v7604_v38, %v12382_v42  ;;  %v12384_v60 = vunpack.c.l.bf16 %v10633_v13  ;;  %v7112_v26 = vunpack.c.l.bf16 %v6599_v40  ;;  %v7641_v48 = vadd.f32 %v7640_v6, %v7110_v24  ;;  %v587_v24 = vld [vmem:[%s8783_s8 + $0x43c] sm:$0xf] }
 0x20a   : > { %12383 = vst [vmem:[#allocation28_spill] sm:$0xff] %v10918_v23  ;;  %v6600_v38 = vmul.bf16 %v4094_v11, %v580_v2  ;;  %v6601_v0 = vmul.bf16 %v4101_v47, %v581_v43  ;;  %v12385_v14 = vunpack.c.l.bf16 %v10656_v9  ;;  %v4143_v11 = vrot.slane %v10852_v12, %v8851_v37  ;;  %v591_v47 = vld [vmem:[%s8783_s8 + $0x44c] sm:$0xf] }
 0x20b   : > { %v7606_v16 = vadd.f32 %v7605_v44, %v12384_v60  ;;  %v10933_v54 = vpop.permute.xlu1 %1484  ;;  %v7642_v40 = vadd.f32 %v7641_v48, %v7111_v31  ;;  %1892 = vbcast.lane.c.b16.xlu0 %v10840_v28, 288  ;;  %v6603_v44 = vmul.bf16 %v4115_v3, %v583_v21  ;;  %v7115_v9 = vunpack.c.l.bf16 %v10922_v33  ;;  %v584_v48 = vld [vmem:[%s8783_s8 + $0x430] sm:$0xf] }
 0x20c   : > { %1616 = vbcast.lane.c.b16.xlu1 %v10810_v50, 304  ;;  %v10942_v2 = vpop.permute.xlu0 %1480  ;;  %v10947_v6 = vmul.bf16 %v4136_v32, %v586_v18  ;;  %v12386_v31 = vunpack.c.l.bf16 %v10679_v52  ;;  %v7113_v12 = vunpack.c.l.bf16 %v6600_v38  ;;  %v4129_v3 = vrot.slane %v10860_v59, %v8851_v37  ;;  %v588_v52 = vld [vmem:[%s8783_s8 + $0x440] sm:$0xf] }
 0x20d   : > { %v7607_v42 = vadd.f32 %v7606_v16, %v12385_v14  ;;  %v7643_v60 = vadd.f32 %v7642_v40, %v7112_v26  ;;  %v4122_v16 = vrot.slane %v10860_v59, %v8848_v36  ;;  %v585_v14 = vld [vmem:[%s8783_s8 + $0x434] sm:$0xf]  ;;  %v4164_v33 = vrot.slane %v10881_v20, %v8848_v36 }
 0x20e   : > { %v4171_v32 = vrot.slane %v10881_v20, %v8851_v37  ;;  %v4150_v21 = vrot.slane %v10890_v30, %v8848_v36  ;;  %v12387_v26 = vunpack.c.l.bf16 %v10643_v10  ;;  %v10968_v59 = vmul.bf16 %v4143_v11, %v587_v24 }
 0x20f   : > { %v7608_v43 = vadd.f32 %v7607_v42, %v12386_v31  ;;  %v10964_v38 = vpop.permute.xlu1 %1492  ;;  %v7114_v42 = vunpack.c.l.bf16 %v6601_v0  ;;  %v7644_v40 = vadd.f32 %v7643_v60, %v7113_v12  ;;  %v590_v31 = vld [vmem:[%s8783_s8 + $0x448] sm:$0xf]  ;;  %1756 = vbcast.lane.c.b16.xlu0 %v10801_v46, 304  ;;  %v7116_v61 = vunpack.c.l.bf16 %v6603_v44  ;;  %v589_v60 = vld [vmem:[%s8783_s8 + $0x444] sm:$0xf] }
 0x210   : > { %1896 = vbcast.lane.c.b16.xlu1 %v10840_v28, 304  ;;  %v10974_v20 = vpop.permute.xlu0 %1488  ;;  %v7119_v62 = vunpack.c.l.bf16 %v10947_v6  ;;  %v4157_v10 = vrot.slane %v10890_v30, %v8851_v37  ;;  %v4192_v0 = vrot.slane %v10909_v17, %v8848_v36  ;;  %v12388_v11 = vunpack.c.l.bf16 %v10653_v49 }
 0x211   : > { %v7609_v18 = vadd.f32 %v7608_v43, %v12387_v26  ;;  %v7645_v43 = vadd.f32 %v7644_v40, %v7114_v42  ;;  %v6604_v12 = vmul.bf16 %v4122_v16, %v584_v48  ;;  %v594_v26 = vld [vmem:[%s8783_s8 + $0x458] sm:$0xf]  ;;  %v4199_v13 = vrot.slane %v10909_v17, %v8851_v37 }
 0x212   : > { %v6605_v44 = vmul.bf16 %v4129_v3, %v585_v14  ;;  %v10987_v55 = vmul.bf16 %v4164_v33, %v590_v31  ;;  %v10989_v6 = vmul.bf16 %v4171_v32, %v591_v47  ;;  %v10991_v30 = vmul.bf16 %v4150_v21, %v588_v52  ;;  %v598_v31 = vld [vmem:[%s8783_s8 + $0x468] sm:$0xf] }
 0x213   : > { %v7610_v24 = vadd.f32 %v7609_v18, %v12388_v11  ;;  %v10994_v23 = vpop.permute.xlu1 %1503  ;;  %v12389_v49 = vunpack.c.l.bf16 %v10726_v56  ;;  %v7646_v16 = vadd.f32 %v7645_v43, %v7115_v9  ;;  %v7120_v48 = vunpack.c.l.bf16 %v10968_v59  ;;  %1620 = vbcast.lane.c.b16.xlu0 %v10810_v50, 320  ;;  %v592_v56 = vld [vmem:[%s8783_s8 + $0x450] sm:$0xf]  ;;  %v593_v59 = vld [vmem:[%s8783_s8 + $0x454] sm:$0xf] }
 0x214   : > { %v4178_v17 = vrot.slane %v10916_v5, %v8848_v36  ;;  %1760 = vbcast.lane.c.b16.xlu1 %v10801_v46, 320  ;;  %v11003_v47 = vpop.permute.xlu0 %1499  ;;  %v11005_v14 = vmul.bf16 %v4157_v10, %v589_v60  ;;  %v11007_v3 = vmul.bf16 %v4192_v0, %v594_v26  ;;  %v4185_v9 = vrot.slane %v10916_v5, %v8851_v37 }
 0x215   : > { %v7611_v18 = vadd.f32 %v7610_v24, %v12389_v49  ;;  %v4220_v33 = vrot.slane %v10933_v54, %v8848_v36  ;;  %v12390_v32 = vunpack.c.l.bf16 %v10737_v25  ;;  %v7117_v21 = vunpack.c.l.bf16 %v6604_v12 }
 0x216   : > { %v7647_v42 = vadd.f32 %v7646_v16, %v7116_v61  ;;  %v11016_v40 = vmul.bf16 %v4199_v13, %v595_v8  ;;  %v7118_v10 = vunpack.c.l.bf16 %v6605_v44  ;;  %v7123_v0 = vunpack.c.l.bf16 %v10987_v55  ;;  %v599_v13 = vld [vmem:[%s8783_s8 + $0x46c] sm:$0xf]  ;;  %v606_v16 = vld [vmem:[%s8783_s8 + $0x488] sm:$0xf] }
 0x217   : > { %v7612_v52 = vadd.f32 %v7611_v18, %v12390_v32  ;;  %v7124_v11 = vunpack.c.l.bf16 %v10989_v6  ;;  %v4227_v5 = vrot.slane %v10933_v54, %v8851_v37  ;;  %v11024_v24 = vpop.permute.xlu1 %1511  ;;  %v12391_v25 = vunpack.c.l.bf16 %v10692_v34  ;;  %1900 = vbcast.lane.c.b16.xlu0 %v10840_v28, 320  ;;  %v597_v32 = vld [vmem:[%s8783_s8 + $0x464] sm:$0xf] }
 0x218   : > { %v7648_v60 = vadd.f32 %v7647_v42, %v7117_v21  ;;  %v7121_v8 = vunpack.c.l.bf16 %v10991_v30  ;;  %v11029_v61 = vmul.bf16 %v4178_v17, %v592_v56  ;;  %1624 = vbcast.lane.c.b16.xlu1 %v10810_v50, 336  ;;  %v11034_v12 = vpop.permute.xlu0 %1507  ;;  %v7122_v54 = vunpack.c.l.bf16 %v11005_v14  ;;  %v596_v14 = vld [vmem:[%s8783_s8 + $0x460] sm:$0xf] }
 0x219   : > { %v7613_v43 = vadd.f32 %v7612_v52, %v12391_v25  ;;  %v11038_v34 = vmul.bf16 %v4185_v9, %v593_v59  ;;  %v11040_v44 = vmul.bf16 %v4220_v33, %v598_v31  ;;  %v12392_v30 = vunpack.c.l.bf16 %v10694_v58  ;;  %v600_v25 = vld [vmem:[%s8783_s8 + $0x470] sm:$0xf]  ;;  %v607_v31 = vld [vmem:[%s8783_s8 + $0x48c] sm:$0xf] }
 0x21a   : > { %v7649_v18 = vadd.f32 %v7648_v60, %v7118_v10  ;;  %v4206_v17 = vrot.slane %v10942_v2, %v8848_v36  ;;  %v11047_v56 = vmul.bf16 %v4227_v5, %v599_v13  ;;  %v4213_v9 = vrot.slane %v10942_v2, %v8851_v37  ;;  %v602_v10 = vld [vmem:[%s8783_s8 + $0x478] sm:$0xf]  ;;  %v603_v5 = vld [vmem:[%s8783_s8 + $0x47c] sm:$0xf] }
 0x21b   : > { %v7614_v49 = vadd.f32 %v7613_v43, %v12392_v30  ;;  %v4248_v33 = vrot.slane %v10964_v38, %v8848_v36  ;;  %v4255_v58 = vrot.slane %v10964_v38, %v8851_v37  ;;  %v11057_v52 = vpop.permute.xlu1 %1519  ;;  %v12393_v21 = vunpack.c.l.bf16 %v10749_v35  ;;  %1764 = vbcast.lane.c.b16.xlu0 %v10801_v46, 336 }
 0x21c   : > { %v7650_v59 = vadd.f32 %v7649_v18, %v7119_v62  ;;  %v4234_v2 = vrot.slane %v10974_v20, %v8848_v36  ;;  %1904 = vbcast.lane.c.b16.xlu1 %v10840_v28, 336  ;;  %v11068_v38 = vpop.permute.xlu0 %1515  ;;  %v4241_v43 = vrot.slane %v10974_v20, %v8851_v37  ;;  %v4276_v60 = vrot.slane %v10994_v23, %v8848_v36 }
 0x21d   : > { %v7615_v42 = vadd.f32 %v7614_v49, %v12393_v21  ;;  %v12394_v13 = vunpack.c.l.bf16 %v10754_v1  ;;  %v11079_v18 = vmul.bf16 %v4206_v17, %v596_v14  ;;  %v601_v21 = vld [vmem:[%s8783_s8 + $0x474] sm:$0xf]  ;;  %v4283_v26 = vrot.slane %v10994_v23, %v8851_v37  ;;  %v604_v23 = vld [vmem:[%s8783_s8 + $0x480] sm:$0xf] }
 0x21e   : > { %v7651_v49 = vadd.f32 %v7650_v59, %v7120_v48  ;;  %v11085_v62 = vmul.bf16 %v4213_v9, %v597_v32  ;;  %v11087_v35 = vmul.bf16 %v4248_v33, %v602_v10  ;;  %v11089_v20 = vmul.bf16 %v4255_v58, %v603_v5 }
 0x21f   : > { %v7616_v30 = vadd.f32 %v7615_v42, %v12394_v13  ;;  %v4262_v1 = vrot.slane %v11003_v47, %v8848_v36  ;;  %v12395_v42 = vunpack.c.l.bf16 %v10745_v41  ;;  %v7132_v14 = vunpack.c.l.bf16 %v11047_v56  ;;  %1628 = vbcast.lane.c.b16.xlu0 %v10810_v50, 352  ;;  %v11102_v32 = vpop.permute.xlu1 %1527  ;;  %v628_v56 = vld [vmem:[%s8783_s8 + $0x4e0] sm:$0xf] }
 0x220   : > { %v7652_v17 = vadd.f32 %v7651_v49, %v7121_v8  ;;  %v11097_v59 = vmul.bf16 %v4234_v2, %v600_v25  ;;  %1768 = vbcast.lane.c.b16.xlu1 %v10801_v46, 352  ;;  %v11104_v9 = vpop.permute.xlu0 %1523  ;;  %v11106_v33 = vmul.bf16 %v4241_v43, %v601_v21  ;;  %v11108_v41 = vmul.bf16 %v4276_v60, %v606_v16  ;;  %v610_v43 = vld [vmem:[%s8783_s8 + $0x498] sm:$0xf] }
 0x221   : > { %v7617_v48 = vadd.f32 %v7616_v30, %v12395_v42  ;;  %v4269_v8 = vrot.slane %v11003_v47, %v8851_v37  ;;  %v4304_v58 = vrot.slane %v11024_v24, %v8848_v36  ;;  %v12396_v10 = vunpack.c.l.bf16 %v10747_v57  ;;  %v605_v30 = vld [vmem:[%s8783_s8 + $0x484] sm:$0xf]  ;;  %v611_v42 = vld [vmem:[%s8783_s8 + $0x49c] sm:$0xf] }
 0x222   : > { %v7653_v2 = vadd.f32 %v7652_v17, %v7122_v54  ;;  %v7129_v25 = vunpack.c.l.bf16 %v11079_v18  ;;  %v11117_v13 = vmul.bf16 %v4283_v26, %v607_v31  ;;  %v7130_v16 = vunpack.c.l.bf16 %v11085_v62 }
 0x223   : > { %v7618_v5 = vadd.f32 %v7617_v48, %v12396_v10  ;;  %v7135_v60 = vunpack.c.l.bf16 %v11087_v35  ;;  %v11123_v49 = vmul.bf16 %v4262_v1, %v604_v23  ;;  %v4311_v47 = vrot.slane %v11024_v24, %v8851_v37  ;;  %1908 = vbcast.lane.c.b16.xlu0 %v10840_v28, 352  ;;  %v618_v24 = vld [vmem:[%s8783_s8 + $0x4b8] sm:$0xf] }
 0x224   : > { %v12397_v21 = vunpack.c.l.bf16 %v10766_v27  ;;  %v7654_v54 = vadd.f32 %v7653_v2, %v7123_v0  ;;  %v7133_v31 = vunpack.c.l.bf16 %v11097_v59  ;;  %1632 = vbcast.lane.c.b16.xlu1 %v10810_v50, 368  ;;  %v11135_v48 = vpop.permute.xlu0 %1534  ;;  %v7134_v1 = vunpack.c.l.bf16 %v11106_v33  ;;  %v608_v2 = vld [vmem:[%s8783_s8 + $0x490] sm:$0xf] }
 0x225   : > { %v11139_v27 = vmul.bf16 %v4269_v8, %v605_v30  ;;  %v11141_v55 = vmul.bf16 %v4304_v58, %v610_v43  ;;  %v12398_v0 = vunpack.c.l.bf16 %v10772_v4  ;;  %v4290_v10 = vrot.slane %v11034_v12, %v8848_v36 }
 0x226   : > { %v7619_v57 = vadd.f32 %v7618_v5, %v12397_v21  ;;  %v7655_v50 = vadd.f32 %v7654_v54, %v7124_v11  ;;  %v11151_v5 = vpop.permute.xlu1 %1538  ;;  %v11154_v58 = vmul.bf16 %v4311_v47, %v611_v42  ;;  %v4297_v4 = vrot.slane %v11034_v12, %v8851_v37  ;;  %v614_v54 = vld [vmem:[%s8783_s8 + $0x4a8] sm:$0xf] }
 0x227   : > { %v4332_v6 = vrot.slane %v11057_v52, %v8848_v36  ;;  %v12399_v11 = vunpack.c.l.bf16 %v10756_v39  ;;  %v12400_v43 = vunpack.c.l.bf16 %v11029_v61  ;;  %v4339_v47 = vrot.slane %v11057_v52, %v8851_v37  ;;  %v612_v61 = vld [vmem:[%s8783_s8 + $0x4a0] sm:$0xf]  ;;  %1772 = vbcast.lane.c.b16.xlu0 %v10801_v46, 368  ;;  %v613_v39 = vld [vmem:[%s8783_s8 + $0x4a4] sm:$0xf] }
 0x228   : > { %v7620_v17 = vadd.f32 %v7619_v57, %v12398_v0  ;;  %v609_v57 = vld [vmem:[%s8783_s8 + $0x494] sm:$0xf]  ;;  %v4318_v42 = vrot.slane %v11068_v38, %v8848_v36  ;;  %1912 = vbcast.lane.c.b16.xlu1 %v10840_v28, 368  ;;  %v615_v0 = vld [vmem:[%s8783_s8 + $0x4ac] sm:$0xf]  ;;  %v4360_v52 = vrot.slane %v11102_v32, %v8848_v36  ;;  %v12402_v28 = vunpack.c.l.bf16 %v11038_v34 }
 0x229   : > { %v7656_v21 = vadd.f32 %v7655_v50, %v12400_v43  ;;  %v12401_v50 = vunpack.c.l.bf16 %v10764_v53  ;;  %v11185_v23 = vmul.bf16 %v4290_v10, %v608_v2  ;;  %v4367_v12 = vrot.slane %v11102_v32, %v8851_v37  ;;  %v619_v53 = vld [vmem:[%s8783_s8 + $0x4bc] sm:$0xf] }
 0x22a   : > { %v7621_v30 = vadd.f32 %v7620_v17, %v12399_v11  ;;  %v4325_v17 = vrot.slane %v11068_v38, %v8851_v37  ;;  %v11191_v38 = vpop.permute.xlu0 %1542  ;;  %v11194_v8 = vmul.bf16 %v4297_v4, %v609_v57  ;;  %v11196_v26 = vmul.bf16 %v4332_v6, %v614_v54  ;;  %v11210_v4 = vpop.permute.xlu1 %1546 }
 0x22b   : > { %v7657_v43 = vadd.f32 %v7656_v21, %v12402_v28  ;;  %v4346_v34 = vrot.slane %v11104_v9, %v8848_v36  ;;  %v12403_v10 = vunpack.c.l.bf16 %v10815_v29  ;;  %v11205_v32 = vmul.bf16 %v4339_v47, %v615_v0  ;;  %v616_v28 = vld [vmem:[%s8783_s8 + $0x4b0] sm:$0xf] }
 0x22c   : > { %v7622_v11 = vadd.f32 %v7621_v30, %v12401_v50  ;;  %v12404_v30 = vunpack.c.l.bf16 %v11007_v3  ;;  %v11207_v50 = vmul.bf16 %v4318_v42, %v612_v61  ;;  %v11212_v6 = vmul.bf16 %v4325_v17, %v613_v39  ;;  %v12405_v29 = vld [vmem:[#allocation26_spill] sm:$0xff] }
 0x22d   : > { %v11214_v57 = vmul.bf16 %v4360_v52, %v618_v24  ;;  %v4353_v54 = vrot.slane %v11104_v9, %v8851_v37  ;;  %v12406_v3 = vunpack.c.l.bf16 %v10845_v63  ;;  %v12407_v42 = vunpack.c.l.bf16 %v11016_v40  ;;  %v12408_v39 = vld [vmem:[#allocation30_spill] sm:$0xff]  ;;  %v12409_v63 = vld [vmem:[#allocation35_spill] sm:$0xff] }
 0x22e   : > { %v7623_v2 = vadd.f32 %v7622_v11, %v12403_v10  ;;  %v7658_v21 = vadd.f32 %v7657_v43, %v12404_v30  ;;  %v11220_v11 = vrot.slane %v12405_v29, %v10377_v7  ;;  %v11226_v61 = vmul.bf16 %v4367_v12, %v619_v53  ;;  %v617_v43 = vld [vmem:[%s8783_s8 + $0x4b4] sm:$0xf] }
 0x22f   : > { %v11231_v24 = vrot.slane %v12408_v39, %v8958_v45  ;;  %v11236_v10 = vmul.bf16 %v4346_v34, %v616_v28  ;;  %v12410_v40 = vunpack.c.l.bf16 %v12409_v63  ;;  %v11249_v28 = vmul.bf16 %v4353_v54, %v617_v43  ;;  %v622_v43 = vld [vmem:[%s8783_s8 + $0x4c8] sm:$0xf]  ;;  %v1555_v63 = vpop.permute.xlu1 %1554  ;;  %v623_v54 = vld [vmem:[%s8783_s8 + $0x4cc] sm:$0xf]  ;;  %v624_v34 = vld [vmem:[%s8783_s8 + $0x4d0] sm:$0xf] }
 0x230   : > { %v7624_v47 = vadd.f32 %v7623_v2, %v12406_v3  ;;  %v7659_v0 = vadd.f32 %v7658_v21, %v12407_v42  ;;  %1779 = vbcast.lane.c.b16.xlu1 %v11220_v11, 256  ;;  %v11246_v21 = vpop.permute.xlu0 %1550  ;;  %v4388_v29 = vrot.slane %v11151_v5, %v8848_v36  ;;  %v11255_v18 = vrot.slane %v12408_v39, %v10377_v7  ;;  %v620_v2 = vld [vmem:[%s8783_s8 + $0x4c0] sm:$0xf] }
 0x231   : > { %1639 = vbcast.lane.c.b16.xlu0 %v11231_v24, 256  ;;  %v4395_v39 = vrot.slane %v11151_v5, %v8851_v37  ;;  %v4381_v62 = vrot.slane %v11135_v48, %v8851_v37  ;;  %v621_v5 = vld [vmem:[%s8783_s8 + $0x4c4] sm:$0xf]  ;;  %v4451_v30 = vrot.slane %v1555_v63, %v8851_v37 }
 0x232   : > { %v7625_v12 = vadd.f32 %v7624_v47, %v12410_v40  ;;  %v7660_v53 = vadd.f32 %v7659_v0, %v7129_v25  ;;  %v12411_v25 = vld [vmem:[#allocation23_spill] sm:$0xff]  ;;  %v4416_v0 = vrot.slane %v11210_v4, %v8848_v36 }
 0x233   : > { %v12412_v3 = vunpack.c.l.bf16 %v12411_v25  ;;  %v12414_v25 = vunpack.c.l.bf16 %v11040_v44  ;;  %v627_v44 = vld [vmem:[%s8783_s8 + $0x4dc] sm:$0xf]  ;;  %v625_v40 = vld [vmem:[%s8783_s8 + $0x4d4] sm:$0xf]  ;;  %v11304_v9 = vmul.bf16 %v4395_v39, %v623_v54 }
 0x234   : > { %v7661_v42 = vadd.f32 %v7660_v53, %v7130_v16  ;;  %1643 = vbcast.lane.c.b16.xlu1 %v11231_v24, 272  ;;  %v12413_v16 = vunpack.c.l.bf16 %v10902_v51  ;;  %v11285_v51 = vmul.bf16 %v4388_v29, %v622_v43  ;;  %v630_v29 = vld [vmem:[%s8783_s8 + $0x4e8] sm:$0xf]  ;;  %v4444_v43 = vrot.slane %v1555_v63, %v8848_v36  ;;  %v11302_v46 = vpop.permute.xlu0 %1558 }
 0x235   : > { %v7626_v47 = vadd.f32 %v7625_v12, %v12412_v3  ;;  %v4374_v12 = vrot.slane %v11135_v48, %v8848_v36  ;;  %1919 = vbcast.lane.c.b16.xlu0 %v11255_v18, 256  ;;  %v4423_v48 = vrot.slane %v11210_v4, %v8851_v37 }
 0x236   : > { %v7662_v3 = vadd.f32 %v7661_v42, %v12414_v25  ;;  %v4402_v42 = vrot.slane %v11191_v38, %v8848_v36  ;;  %v12415_v25 = vunpack.c.l.bf16 %v10904_v19  ;;  %v631_v19 = vld [vmem:[%s8783_s8 + $0x4ec] sm:$0xf] }
 0x237   : > { %v7627_v53 = vadd.f32 %v7626_v47, %v12413_v16  ;;  %v626_v47 = vld [vmem:[%s8783_s8 + $0x4d8] sm:$0xf]  ;;  %v4409_v16 = vrot.slane %v11191_v38, %v8851_v37  ;;  %v11306_v17 = vmul.bf16 %v4374_v12, %v620_v2  ;;  %v11308_v38 = vmul.bf16 %v4381_v62, %v621_v5  ;;  %v11324_v2 = vpop.permute.xlu1 %1562 }
 0x238   : > { %v7663_v4 = vadd.f32 %v7662_v3, %v7132_v14  ;;  %1923 = vbcast.lane.c.b16.xlu1 %v11255_v18, 272  ;;  %v4430_v14 = vrot.slane %v11246_v21, %v8848_v36  ;;  %v11319_v54 = vmul.bf16 %v4416_v0, %v626_v47  ;;  %v11321_v39 = vmul.bf16 %v4423_v48, %v627_v44  ;;  %v639_v44 = vld [vmem:[%s8783_s8 + $0x50c] sm:$0xf] }
 0x239   : > { %v7628_v52 = vadd.f32 %v7627_v53, %v12415_v25  ;;  %v12416_v53 = vunpack.c.l.bf16 %v10873_v22  ;;  %1783 = vbcast.lane.c.b16.xlu0 %v11220_v11, 272  ;;  %v11326_v12 = vmul.bf16 %v4402_v42, %v624_v34  ;;  %v11328_v62 = vmul.bf16 %v4409_v16, %v625_v40  ;;  %v629_v25 = vld [vmem:[%s8783_s8 + $0x4e4] sm:$0xf] }
 0x23a   : > { %v7664_v63 = vadd.f32 %v7663_v4, %v7133_v31  ;;  %v11330_v5 = vmul.bf16 %v4444_v43, %v630_v29  ;;  %v4437_v22 = vrot.slane %v11246_v21, %v8851_v37  ;;  %v11340_v0 = vmul.bf16 %v4430_v14, %v628_v56  ;;  %v638_v31 = vld [vmem:[%s8783_s8 + $0x508] sm:$0xf] }
 0x23b   : > { %v7629_v3 = vadd.f32 %v7628_v52, %v12416_v53  ;;  %v11338_v52 = vmul.bf16 %v4451_v30, %v631_v19  ;;  %v12418_v34 = vunpack.c.l.bf16 %v10900_v15  ;;  %v1570_v21 = vpop.permute.xlu0 %1569  ;;  %v12419_v4 = vunpack.c.l.bf16 %v11089_v20  ;;  %v700_v53 = vld [vmem:[%s8783_s8 + $0x600] sm:$0xf] }
 0x23c   : > { %v7665_v59 = vadd.f32 %v7664_v63, %v7134_v1  ;;  %1787 = vbcast.lane.c.b16.xlu1 %v11220_v11, 288  ;;  %v11352_v15 = vmul.bf16 %v4437_v22, %v629_v25  ;;  %v4472_v56 = vrot.slane %v11324_v2, %v8848_v36  ;;  %v636_v63 = vld [vmem:[%s8783_s8 + $0x500] sm:$0xf]  ;;  %v634_v22 = vld [vmem:[%s8783_s8 + $0x4f8] sm:$0xf] }
 0x23d   : > { %12417 = vst [vmem:[#allocation24_spill] sm:$0xff] %v11338_v52  ;;  %v7630_v48 = vadd.f32 %v7629_v3, %v12418_v34  ;;  %1647 = vbcast.lane.c.b16.xlu0 %v11231_v24, 288  ;;  %v1710_v14 = vpop.permute.xlu1 %1709  ;;  %v701_v3 = vld [vmem:[%s8783_s8 + $0x604] sm:$0xf]  ;;  %v635_v1 = vld [vmem:[%s8783_s8 + $0x4fc] sm:$0xf] }
 0x23e   : > { %v7666_v33 = vadd.f32 %v7665_v59, %v7135_v60  ;;  %v4486_v60 = vrot.slane %v1570_v21, %v8848_v36  ;;  %v4479_v59 = vrot.slane %v11324_v2, %v8851_v37  ;;  %v4934_v20 = vrot.slane %v1710_v14, %v8848_v36  ;;  %v637_v2 = vld [vmem:[%s8783_s8 + $0x504] sm:$0xf] }
 0x23f   : > { %v7631_v25 = vrot.slane %v7630_v48, 4  ;;  %v4941_v34 = vrot.slane %v1710_v14, %v8851_v37  ;;  %v1574_v30 = vpop.permute.xlu0 %1573  ;;  %v11387_v42 = vmul.bf16 %v4472_v56, %v634_v22 }
 0x240   : > { %v7667_v29 = vadd.f32 %v7666_v33, %v12419_v4  ;;  %1651 = vbcast.lane.c.b16.xlu1 %v11231_v24, 304  ;;  %v12420_v33 = vunpack.c.l.bf16 %v11123_v49  ;;  %v6720_v16 = vmul.bf16 %v4934_v20, %v700_v53  ;;  %v4493_v49 = vrot.slane %v1570_v21, %v8851_v37  ;;  %v764_v21 = vld [vmem:[%s8783_s8 + $0x700] sm:$0xf] }
 0x241   : > { %1927 = vbcast.lane.c.b16.xlu0 %v11255_v18, 288  ;;  %v6721_v14 = vmul.bf16 %v4941_v34, %v701_v3  ;;  %v1850_v40 = vpop.permute.xlu1 %1849  ;;  %v4500_v47 = vrot.slane %v1574_v30, %v8848_v36  ;;  %v4507_v19 = vrot.slane %v1574_v30, %v8851_v37  ;;  %v11403_v34 = vadd.f32 %v7631_v25, %v7630_v48  ;;  %v767_v48 = vld [vmem:[%s8783_s8 + $0x70c] sm:$0xf] }
 0x242   : > { %v7668_v4 = vadd.f32 %v7667_v29, %v12420_v33  ;;  %v6656_v29 = vmul.bf16 %v4486_v60, %v636_v63  ;;  %v12421_v33 = vunpack.c.l.bf16 %v11139_v27  ;;  %v7233_v35 = vunpack.c.l.bf16 %v6720_v16  ;;  %v765_v60 = vld [vmem:[%s8783_s8 + $0x704] sm:$0xf] }
 0x243   : > { %v7234_v53 = vunpack.c.l.bf16 %v6721_v14  ;;  %v6657_v20 = vmul.bf16 %v4493_v49, %v637_v2  ;;  %v12422_v27 = vunpack.c.l.bf16 %v11108_v41  ;;  %v11398_v63 = vmul.bf16 %v4479_v59, %v635_v1  ;;  %v1714_v16 = vpop.permute.xlu0 %1713 }
 0x244   : > { %v7669_v43 = vadd.f32 %v7668_v4, %v12421_v33  ;;  %v7169_v3 = vunpack.c.l.bf16 %v6656_v29  ;;  %1931 = vbcast.lane.c.b16.xlu1 %v11255_v18, 304  ;;  %v5382_v22 = vrot.slane %v1850_v40, %v8848_v36  ;;  %v5389_v30 = vrot.slane %v1850_v40, %v8851_v37  ;;  %v766_v33 = vld [vmem:[%s8783_s8 + $0x708] sm:$0xf] }
 0x245   : > { %1791 = vbcast.lane.c.b16.xlu0 %v11220_v11, 304  ;;  %v7170_v4 = vunpack.c.l.bf16 %v6657_v20  ;;  %v6658_v2 = vmul.bf16 %v4500_v47, %v638_v31  ;;  %v6659_v14 = vmul.bf16 %v4507_v19, %v639_v44  ;;  %v12423_v49 = vunpack.c.l.bf16 %v11117_v13  ;;  %v1854_v59 = vpop.permute.xlu1 %1853  ;;  %v702_v19 = vld [vmem:[%s8783_s8 + $0x608] sm:$0xf] }
 0x246   : > { %v7670_v56 = vadd.f32 %v7669_v43, %v12422_v27  ;;  %v7775_v29 = vadd.f32 %v7234_v53, %v7233_v35  ;;  %v6784_v1 = vmul.bf16 %v5382_v22, %v764_v21  ;;  %v6785_v43 = vmul.bf16 %v5389_v30, %v765_v60  ;;  %v703_v53 = vld [vmem:[%s8783_s8 + $0x60c] sm:$0xf] }
 0x247   : > { %v7706_v27 = vadd.f32 %v7170_v4, %v7169_v3  ;;  %v7171_v52 = vunpack.c.l.bf16 %v6658_v2  ;;  %v7172_v40 = vunpack.c.l.bf16 %v6659_v14  ;;  %v5396_v25 = vrot.slane %v1854_v59, %v8848_v36  ;;  %v1578_v20 = vpop.permute.xlu0 %1577  ;;  %v704_v14 = vld [vmem:[%s8783_s8 + $0x610] sm:$0xf] }
 0x248   : > { %v7671_v41 = vadd.f32 %v7670_v56, %v12423_v49  ;;  %1795 = vbcast.lane.c.b16.xlu1 %v11220_v11, 320  ;;  %v12424_v31 = vunpack.c.l.bf16 %v11185_v23  ;;  %v7297_v13 = vunpack.c.l.bf16 %v6784_v1  ;;  %v7298_v44 = vunpack.c.l.bf16 %v6785_v43 }
 0x249   : > { %1655 = vbcast.lane.c.b16.xlu0 %v11231_v24, 320  ;;  %v5403_v35 = vrot.slane %v1854_v59, %v8851_v37  ;;  %v7707_v3 = vadd.f32 %v7706_v27, %v7171_v52  ;;  %v6786_v21 = vmul.bf16 %v5396_v25, %v766_v33  ;;  %v4948_v60 = vrot.slane %v1714_v16, %v8848_v36  ;;  %v1718_v2 = vpop.permute.xlu1 %1717  ;;  %v705_v59 = vld [vmem:[%s8783_s8 + $0x614] sm:$0xf]  ;;  %v640_v33 = vld [vmem:[%s8783_s8 + $0x510] sm:$0xf] }
 0x24a   : > { %v7672_v47 = vadd.f32 %v7671_v41, %v12424_v31  ;;  %v4955_v56 = vrot.slane %v1714_v16, %v8851_v37  ;;  %v12425_v23 = vunpack.c.l.bf16 %v11194_v8  ;;  %v7844_v30 = vadd.f32 %v7298_v44, %v7297_v13  ;;  %v641_v31 = vld [vmem:[%s8783_s8 + $0x514] sm:$0xf] }
 0x24b   : > { %v6787_v4 = vmul.bf16 %v5403_v35, %v767_v48  ;;  %v4514_v49 = vrot.slane %v1578_v20, %v8848_v36  ;;  %v7708_v41 = vadd.f32 %v7707_v3, %v7172_v40  ;;  %v7299_v1 = vunpack.c.l.bf16 %v6786_v21  ;;  %v1858_v40 = vpop.permute.xlu0 %1857 }
 0x24c   : > { %v7673_v22 = vadd.f32 %v7672_v47, %v12425_v23  ;;  %v6722_v43 = vmul.bf16 %v4948_v60, %v702_v19  ;;  %v6723_v52 = vmul.bf16 %v4955_v56, %v703_v53  ;;  %1659 = vbcast.lane.c.b16.xlu1 %v11231_v24, 336  ;;  %v12426_v16 = vunpack.c.l.bf16 %v11141_v55  ;;  %v642_v56 = vld [vmem:[%s8783_s8 + $0x518] sm:$0xf] }
 0x24d   : > { %v7300_v8 = vunpack.c.l.bf16 %v6787_v4  ;;  %1935 = vbcast.lane.c.b16.xlu0 %v11255_v18, 320  ;;  %v4962_v48 = vrot.slane %v1718_v2, %v8848_v36  ;;  %v4969_v25 = vrot.slane %v1718_v2, %v8851_v37  ;;  %v7845_v47 = vadd.f32 %v7844_v30, %v7299_v1  ;;  %v1582_v60 = vpop.permute.xlu1 %1581 }
 0x24e   : > { %v7674_v27 = vadd.f32 %v7673_v22, %v12426_v16  ;;  %v7235_v13 = vunpack.c.l.bf16 %v6722_v43  ;;  %v7236_v44 = vunpack.c.l.bf16 %v6723_v52  ;;  %v4521_v35 = vrot.slane %v1578_v20, %v8851_v37  ;;  %v768_v16 = vld [vmem:[%s8783_s8 + $0x710] sm:$0xf] }
 0x24f   : > { %v12427_v19 = vunpack.c.l.bf16 %v11154_v58  ;;  %v6724_v55 = vmul.bf16 %v4962_v48, %v704_v14  ;;  %v6725_v3 = vmul.bf16 %v4969_v25, %v705_v59  ;;  %v6660_v21 = vmul.bf16 %v4514_v49, %v640_v33  ;;  %v643_v49 = vld [vmem:[%s8783_s8 + $0x51c] sm:$0xf]  ;;  %v1722_v43 = vpop.permute.xlu0 %1721  ;;  %v632_v48 = vld [vmem:[%s8783_s8 + $0x4f0] sm:$0xf]  ;;  %v633_v25 = vld [vmem:[%s8783_s8 + $0x4f4] sm:$0xf] }
 0x250   : > { %v7846_v23 = vadd.f32 %v7845_v47, %v7300_v8  ;;  %v7776_v22 = vadd.f32 %v7775_v29, %v7235_v13  ;;  %v6661_v4 = vmul.bf16 %v4521_v35, %v641_v31  ;;  %1939 = vbcast.lane.c.b16.xlu1 %v11255_v18, 336  ;;  %v4528_v30 = vrot.slane %v1582_v60, %v8848_v36 }
 0x251   : > { %v7675_v53 = vadd.f32 %v7674_v27, %v12427_v19  ;;  %v12428_v20 = vunpack.c.l.bf16 %v11207_v50  ;;  %v7237_v2 = vunpack.c.l.bf16 %v6724_v55  ;;  %v7238_v14 = vunpack.c.l.bf16 %v6725_v3  ;;  %1799 = vbcast.lane.c.b16.xlu0 %v11220_v11, 336  ;;  %v769_v27 = vld [vmem:[%s8783_s8 + $0x714] sm:$0xf]  ;;  %v1862_v35 = vpop.permute.xlu1 %1861  ;;  %v770_v19 = vld [vmem:[%s8783_s8 + $0x718] sm:$0xf] }
 0x252   : > { %v7173_v1 = vunpack.c.l.bf16 %v6660_v21  ;;  %v7777_v29 = vadd.f32 %v7776_v22, %v7236_v44  ;;  %v7174_v52 = vunpack.c.l.bf16 %v6661_v4  ;;  %v4535_v59 = vrot.slane %v1582_v60, %v8851_v37 }
 0x253   : > { %v7676_v58 = vadd.f32 %v7675_v53, %v12428_v20  ;;  %v6662_v33 = vmul.bf16 %v4528_v30, %v642_v56  ;;  %v12429_v8 = vunpack.c.l.bf16 %v11212_v6  ;;  %v5410_v47 = vrot.slane %v1858_v40, %v8848_v36 }
 0x254   : > { %v7709_v31 = vadd.f32 %v7708_v41, %v7173_v1  ;;  %v5417_v13 = vrot.slane %v1858_v40, %v8851_v37  ;;  %v7778_v44 = vadd.f32 %v7777_v29, %v7237_v2  ;;  %v6663_v53 = vmul.bf16 %v4535_v59, %v643_v49  ;;  %1803 = vbcast.lane.c.b16.xlu1 %v11220_v11, 352  ;;  %v1586_v40 = vpop.permute.xlu0 %1585 }
 0x255   : > { %v7677_v50 = vadd.f32 %v7676_v58, %v12429_v8  ;;  %v7175_v55 = vunpack.c.l.bf16 %v6662_v33  ;;  %v5424_v3 = vrot.slane %v1862_v35, %v8848_v36  ;;  %v12430_v6 = vunpack.c.l.bf16 %v11196_v26  ;;  %1663 = vbcast.lane.c.b16.xlu0 %v11231_v24, 352  ;;  %v771_v26 = vld [vmem:[%s8783_s8 + $0x71c] sm:$0xf]  ;;  %v706_v33 = vld [vmem:[%s8783_s8 + $0x618] sm:$0xf] }
 0x256   : > { %v7710_v41 = vadd.f32 %v7709_v31, %v7174_v52  ;;  %v6788_v60 = vmul.bf16 %v5410_v47, %v768_v16  ;;  %v6789_v56 = vmul.bf16 %v5417_v13, %v769_v27  ;;  %v12431_v22 = vrot.slane %v11302_v46, %v8848_v36  ;;  %v707_v16 = vld [vmem:[%s8783_s8 + $0x61c] sm:$0xf]  ;;  %v1726_v27 = vpop.permute.xlu1 %1725  ;;  %v709_v13 = vld [vmem:[%s8783_s8 + $0x624] sm:$0xf] }
 0x257   : > { %v7678_v21 = vadd.f32 %v7677_v50, %v12430_v6  ;;  %v12432_v30 = vrot.slane %v11302_v46, %v8851_v37  ;;  %v5431_v58 = vrot.slane %v1862_v35, %v8851_v37  ;;  %v6790_v2 = vmul.bf16 %v5424_v3, %v770_v19  ;;  %v644_v3 = vld [vmem:[%s8783_s8 + $0x520] sm:$0xf] }
 0x258   : > { %v11460_v4 = vmul.bf16 %v12431_v22, %v632_v48  ;;  %v12433_v1 = vunpack.c.l.bf16 %v11205_v32  ;;  %v7779_v29 = vadd.f32 %v7778_v44, %v7238_v14  ;;  %v7176_v52 = vunpack.c.l.bf16 %v6663_v53  ;;  %1667 = vbcast.lane.c.b16.xlu1 %v11231_v24, 368  ;;  %v1866_v19 = vpop.permute.xlu0 %1865 }
 0x259   : > { %v11465_v20 = vmul.bf16 %v12432_v30, %v633_v25  ;;  %v7301_v59 = vunpack.c.l.bf16 %v6788_v60  ;;  %v7711_v8 = vadd.f32 %v7710_v41, %v7175_v55  ;;  %v7302_v50 = vunpack.c.l.bf16 %v6789_v56  ;;  %v708_v25 = vld [vmem:[%s8783_s8 + $0x620] sm:$0xf]  ;;  %1943 = vbcast.lane.c.b16.xlu0 %v11255_v18, 352 }
 0x25a   : > { %v7679_v49 = vadd.f32 %v7678_v21, %v12433_v1  ;;  %v4976_v46 = vrot.slane %v1722_v43, %v8848_v36  ;;  %v4983_v48 = vrot.slane %v1722_v43, %v8851_v37  ;;  %v12434_v32 = vunpack.c.l.bf16 %v11236_v10  ;;  %v1590_v60 = vpop.permute.xlu1 %1589 }
 0x25b   : > { %v7847_v31 = vadd.f32 %v7846_v23, %v7301_v59  ;;  %v6791_v47 = vmul.bf16 %v5431_v58, %v771_v26  ;;  %v4990_v35 = vrot.slane %v1726_v27, %v8848_v36  ;;  %v7303_v44 = vunpack.c.l.bf16 %v6790_v2  ;;  %v645_v23 = vld [vmem:[%s8783_s8 + $0x524] sm:$0xf]  ;;  %v646_v59 = vld [vmem:[%s8783_s8 + $0x528] sm:$0xf] }
 0x25c   : > { %v7680_v14 = vadd.f32 %v7679_v49, %v12434_v32  ;;  %v6726_v53 = vmul.bf16 %v4976_v46, %v706_v33  ;;  %v6727_v55 = vmul.bf16 %v4983_v48, %v707_v16  ;;  %v4997_v43 = vrot.slane %v1726_v27, %v8851_v37  ;;  %1947 = vbcast.lane.c.b16.xlu1 %v11255_v18, 368  ;;  %v1730_v33 = vpop.permute.xlu0 %1729 }
 0x25d   : > { %v12435_v24 = vunpack.c.l.bf16 %v11249_v28  ;;  %v7848_v10 = vadd.f32 %v7847_v31, %v7302_v50  ;;  %v6728_v21 = vmul.bf16 %v4990_v35, %v708_v25  ;;  %v4542_v41 = vrot.slane %v1586_v40, %v8848_v36  ;;  %1807 = vbcast.lane.c.b16.xlu0 %v11220_v11, 368  ;;  %v772_v25 = vld [vmem:[%s8783_s8 + $0x720] sm:$0xf] }
 0x25e   : > { %v7712_v56 = vadd.f32 %v7711_v8, %v7176_v52  ;;  %v7239_v22 = vunpack.c.l.bf16 %v6726_v53  ;;  %v6729_v30 = vmul.bf16 %v4997_v43, %v709_v13  ;;  %v4549_v26 = vrot.slane %v1586_v40, %v8851_v37  ;;  %v647_v8 = vld [vmem:[%s8783_s8 + $0x52c] sm:$0xf]  ;;  %v1870_v32 = vpop.permute.xlu1 %1869 }
 0x25f   : > { %v7681_v6 = vadd.f32 %v7680_v14, %v12435_v24  ;;  %v12436_v58 = vunpack.c.l.bf16 %v11214_v57  ;;  %v7304_v28 = vunpack.c.l.bf16 %v6791_v47  ;;  %v7240_v1 = vunpack.c.l.bf16 %v6727_v55  ;;  %v773_v47 = vld [vmem:[%s8783_s8 + $0x724] sm:$0xf] }
 0x260   : > { %v6664_v49 = vmul.bf16 %v4542_v41, %v644_v3  ;;  %v7849_v16 = vadd.f32 %v7848_v10, %v7303_v44  ;;  %v7780_v52 = vadd.f32 %v7779_v29, %v7239_v22  ;;  %v6665_v27 = vmul.bf16 %v4549_v26, %v645_v23  ;;  %v11507_v55 = vpop.permute.xlu0 %1593  ;;  %v12441_v26 = vld [vmem:[#allocation31_spill] sm:$0xff] }
 0x261   : > { %v7682_v2 = vadd.f32 %v7681_v6, %v12436_v58  ;;  %v4556_v40 = vrot.slane %v1590_v60, %v8848_v36  ;;  %v12437_v18 = vunpack.c.l.bf16 %v11226_v61  ;;  %v7241_v57 = vunpack.c.l.bf16 %v6728_v21  ;;  %v12439_v6 = vld [vmem:[#allocation27_spill] sm:$0xff] }
 0x262   : > { %v7177_v46 = vunpack.c.l.bf16 %v6664_v49  ;;  %v4563_v48 = vrot.slane %v1590_v60, %v8851_v37  ;;  %v7781_v14 = vadd.f32 %v7780_v52, %v7240_v1  ;;  %v7242_v11 = vunpack.c.l.bf16 %v6729_v30  ;;  %v710_v52 = vld [vmem:[%s8783_s8 + $0x628] sm:$0xf] }
 0x263   : > { %v7683_v50 = vadd.f32 %v7682_v2, %v12437_v18  ;;  %v6666_v31 = vmul.bf16 %v4556_v40, %v646_v59  ;;  %v5438_v29 = vrot.slane %v1866_v19, %v8848_v36  ;;  %v12438_v13 = vunpack.c.l.bf16 %v11306_v17  ;;  %v775_v2 = vld [vmem:[%s8783_s8 + $0x72c] sm:$0xf] }
 0x264   : > { %v7713_v44 = vadd.f32 %v7712_v56, %v7177_v46  ;;  %v11504_v53 = vmul.bf16 %v4563_v48, %v647_v8  ;;  %v5445_v61 = vrot.slane %v1866_v19, %v8851_v37  ;;  %v7850_v43 = vadd.f32 %v7849_v16, %v7304_v28  ;;  %v774_v56 = vld [vmem:[%s8783_s8 + $0x728] sm:$0xf]  ;;  %v1734_v19 = vpop.permute.xlu1 %1733  ;;  %v11529_v8 = vpop.permute.xlu0 %1873 }
 0x265   : > { %v7684_v35 = vadd.f32 %v7683_v50, %v12438_v13  ;;  %v7178_v3 = vunpack.c.l.bf16 %v6665_v27  ;;  %v6792_v24 = vmul.bf16 %v5438_v29, %v772_v25  ;;  %v11511_v10 = vrot.slane %v12439_v6, %v10377_v7  ;;  %v711_v27 = vld [vmem:[%s8783_s8 + $0x62c] sm:$0xf]  ;;  %v712_v13 = vld [vmem:[%s8783_s8 + $0x630] sm:$0xf]  ;;  %v649_v6 = vld [vmem:[%s8783_s8 + $0x534] sm:$0xf] }
 0x266   : > { %v12440_v21 = vunpack.c.l.bf16 %v11308_v38  ;;  %v7782_v17 = vadd.f32 %v7781_v14, %v7241_v57  ;;  %v7179_v41 = vunpack.c.l.bf16 %v6666_v31  ;;  %v6793_v60 = vmul.bf16 %v5445_v61, %v773_v47 }
 0x267   : > { %v7714_v22 = vadd.f32 %v7713_v44, %v7178_v3  ;;  %v7305_v30 = vunpack.c.l.bf16 %v6792_v24  ;;  %1814 = vbcast.lane.c.b16.xlu1 %v11511_v10, 256  ;;  %v11519_v58 = vrot.slane %v12441_v26, %v8958_v45  ;;  %v5452_v28 = vrot.slane %v1870_v32, %v8848_v36 }
 0x268   : > { %v7685_v23 = vadd.f32 %v7684_v35, %v12440_v21  ;;  %v12442_v38 = vunpack.c.l.bf16 %v11285_v51  ;;  %v7180_v49 = vunpack.c.l.bf16 %v11504_v53  ;;  %v7306_v59 = vunpack.c.l.bf16 %v6793_v60  ;;  %v648_v53 = vld [vmem:[%s8783_s8 + $0x530] sm:$0xf]  ;;  %v11548_v61 = vpop.permute.xlu0 %1737 }
 0x269   : > { %v5459_v16 = vrot.slane %v1870_v32, %v8851_v37  ;;  %v7851_v40 = vadd.f32 %v7850_v43, %v7305_v30  ;;  %1674 = vbcast.lane.c.b16.xlu0 %v11519_v58, 256  ;;  %v6794_v45 = vmul.bf16 %v5452_v28, %v774_v56  ;;  %v5004_v18 = vrot.slane %v1730_v33, %v8848_v36  ;;  %v1598_v32 = vpop.permute.xlu1 %1597  ;;  %v650_v56 = vld [vmem:[%s8783_s8 + $0x538] sm:$0xf] }
 0x26a   : > { %v7686_v1 = vadd.f32 %v7685_v23, %v12442_v38  ;;  %v5011_v51 = vrot.slane %v1730_v33, %v8851_v37  ;;  %v12443_v50 = vunpack.c.l.bf16 %v11304_v9  ;;  %v7783_v46 = vadd.f32 %v7782_v17, %v7242_v11  ;;  %v713_v11 = vld [vmem:[%s8783_s8 + $0x634] sm:$0xf] }
 0x26b   : > { %v6795_v48 = vmul.bf16 %v5459_v16, %v775_v2  ;;  %v11538_v25 = vrot.slane %v12441_v26, %v10377_v7  ;;  %v7852_v14 = vadd.f32 %v7851_v40, %v7306_v59  ;;  %v7307_v31 = vunpack.c.l.bf16 %v6794_v45  ;;  %1678 = vbcast.lane.c.b16.xlu1 %v11519_v58, 272  ;;  %v776_v40 = vld [vmem:[%s8783_s8 + $0x730] sm:$0xf]  ;;  %v777_v45 = vld [vmem:[%s8783_s8 + $0x734] sm:$0xf] }
 0x26c   : > { %v7687_v57 = vadd.f32 %v7686_v1, %v12443_v50  ;;  %v6730_v47 = vmul.bf16 %v5004_v18, %v710_v52  ;;  %v6731_v29 = vmul.bf16 %v5011_v51, %v711_v27  ;;  %v12444_v33 = vunpack.c.l.bf16 %v11326_v12 }
 0x26d   : > { %v7715_v35 = vadd.f32 %v7714_v22, %v7179_v41  ;;  %v5018_v44 = vrot.slane %v1734_v19, %v8848_v36  ;;  %v5025_v7 = vrot.slane %v1734_v19, %v8851_v37  ;;  %v7308_v43 = vunpack.c.l.bf16 %v6795_v48  ;;  %1954 = vbcast.lane.c.b16.xlu0 %v11538_v25, 256  ;;  %v1878_v19 = vpop.permute.xlu1 %1877  ;;  %v11577_v48 = vpop.permute.xlu0 %1604 }
 0x26e   : > { %v7688_v9 = vadd.f32 %v7687_v57, %v12444_v33  ;;  %v7853_v3 = vadd.f32 %v7852_v14, %v7307_v31  ;;  %v7243_v24 = vunpack.c.l.bf16 %v6730_v47  ;;  %v4570_v12 = vrot.slane %v11507_v55, %v8848_v36 }
 0x26f   : > { %v12445_v21 = vunpack.c.l.bf16 %v11328_v62  ;;  %v7244_v17 = vunpack.c.l.bf16 %v6731_v29  ;;  %v6732_v41 = vmul.bf16 %v5018_v44, %v712_v13  ;;  %v4577_v60 = vrot.slane %v11507_v55, %v8851_v37  ;;  %1958 = vbcast.lane.c.b16.xlu1 %v11538_v25, 272 }
 0x270   : > { %v7784_v22 = vadd.f32 %v7783_v46, %v7243_v24  ;;  %v6733_v30 = vmul.bf16 %v5025_v7, %v713_v11  ;;  %v6668_v26 = vmul.bf16 %v4570_v12, %v648_v53  ;;  %v4584_v2 = vrot.slane %v1598_v32, %v8848_v36  ;;  %v779_v7 = vld [vmem:[%s8783_s8 + $0x73c] sm:$0xf]  ;;  %v714_v12 = vld [vmem:[%s8783_s8 + $0x638] sm:$0xf] }
 0x271   : > { %v7689_v23 = vadd.f32 %v7688_v9, %v12445_v21  ;;  %v12446_v62 = vunpack.c.l.bf16 %v11319_v54  ;;  %v7716_v38 = vadd.f32 %v7715_v35, %v7180_v49  ;;  %v7245_v1 = vunpack.c.l.bf16 %v6732_v41  ;;  %1818 = vbcast.lane.c.b16.xlu0 %v11511_v10, 272  ;;  %v651_v54 = vld [vmem:[%s8783_s8 + $0x53c] sm:$0xf]  ;;  %v11575_v46 = vpop.permute.xlu1 %1744 }
 0x272   : > { %v6669_v59 = vmul.bf16 %v4577_v60, %v649_v6  ;;  %v7785_v16 = vadd.f32 %v7784_v22, %v7244_v17  ;;  %v7181_v55 = vunpack.c.l.bf16 %v6668_v26  ;;  %v4591_v52 = vrot.slane %v1598_v32, %v8851_v37  ;;  %v715_v21 = vld [vmem:[%s8783_s8 + $0x63c] sm:$0xf]  ;;  %v11593_v17 = vpop.permute.xlu0 %1884 }
 0x273   : > { %v7690_v28 = vadd.f32 %v7689_v23, %v12446_v62  ;;  %v6670_v27 = vmul.bf16 %v4584_v2, %v650_v56  ;;  %v12447_v18 = vunpack.c.l.bf16 %v11321_v39  ;;  %v7167_v50 = vunpack.c.l.bf16 %v11387_v42  ;;  %1822 = vbcast.lane.c.b16.xlu1 %v11511_v10, 288  ;;  %v778_v39 = vld [vmem:[%s8783_s8 + $0x738] sm:$0xf]  ;;  %v716_v2 = vld [vmem:[%s8783_s8 + $0x640] sm:$0xf] }
 0x274   : > { %v5466_v49 = vrot.slane %v11529_v8, %v8848_v36  ;;  %v5473_v57 = vrot.slane %v11529_v8, %v8851_v37  ;;  %v7854_v32 = vadd.f32 %v7853_v3, %v7308_v43  ;;  %v7246_v14 = vunpack.c.l.bf16 %v6733_v30 }
 0x275   : > { %v7691_v51 = vadd.f32 %v7690_v28, %v12447_v18  ;;  %v7182_v31 = vunpack.c.l.bf16 %v6669_v59  ;;  %v7717_v47 = vadd.f32 %v7716_v38, %v7181_v55  ;;  %v12448_v29 = vunpack.c.l.bf16 %v11340_v0  ;;  %1682 = vbcast.lane.c.b16.xlu0 %v11519_v58, 288  ;;  %v11591_v23 = vpop.permute.xlu1 %1608  ;;  %v717_v18 = vld [vmem:[%s8783_s8 + $0x644] sm:$0xf] }
 0x276   : > { %v6796_v33 = vmul.bf16 %v5466_v49, %v776_v40  ;;  %v6797_v9 = vmul.bf16 %v5473_v57, %v777_v45  ;;  %v5480_v8 = vrot.slane %v1878_v19, %v8848_v36  ;;  %v7786_v35 = vadd.f32 %v7785_v16, %v7245_v1  ;;  %v11612_v40 = vpop.permute.xlu0 %1748 }
 0x277   : > { %v7692_v13 = vadd.f32 %v7691_v51, %v12448_v29  ;;  %v6671_v11 = vmul.bf16 %v4591_v52, %v651_v54  ;;  %v7183_v44 = vunpack.c.l.bf16 %v6670_v27  ;;  %v5487_v53 = vrot.slane %v1878_v19, %v8851_v37  ;;  %1686 = vbcast.lane.c.b16.xlu1 %v11519_v58, 304  ;;  %v652_v52 = vld [vmem:[%s8783_s8 + $0x540] sm:$0xf]  ;;  %v653_v54 = vld [vmem:[%s8783_s8 + $0x544] sm:$0xf] }
 0x278   : > { %v12449_v43 = vunpack.c.l.bf16 %v11352_v15  ;;  %v7718_v24 = vadd.f32 %v7717_v47, %v7182_v31  ;;  %v7309_v0 = vunpack.c.l.bf16 %v6796_v33  ;;  %v6798_v6 = vmul.bf16 %v5480_v8, %v778_v39 }
 0x279   : > { %v7168_v41 = vunpack.c.l.bf16 %v11398_v63  ;;  %v7310_v60 = vunpack.c.l.bf16 %v6797_v9  ;;  %v5032_v56 = vrot.slane %v11548_v61, %v8848_v36  ;;  %v5039_v15 = vrot.slane %v11548_v61, %v8851_v37  ;;  %1962 = vbcast.lane.c.b16.xlu0 %v11538_v25, 288  ;;  %v11610_v27 = vpop.permute.xlu1 %1888  ;;  %v654_v9 = vld [vmem:[%s8783_s8 + $0x548] sm:$0xf] }
 0x27a   : > { %v7693_v3 = vadd.f32 %v7692_v13, %v12449_v43  ;;  %v12450_v19 = vunpack.c.l.bf16 %v11330_v5  ;;  %v7855_v30 = vadd.f32 %v7854_v32, %v7309_v0  ;;  %v6799_v26 = vmul.bf16 %v5487_v53, %v779_v7  ;;  %v12451_v32 = vld [vmem:[#allocation24_spill] sm:$0xff]  ;;  %v11631_v53 = vpop.permute.xlu0 %1612 }
 0x27b   : > { %v5046_v62 = vrot.slane %v11575_v46, %v8848_v36  ;;  %v7787_v28 = vadd.f32 %v7786_v35, %v7246_v14  ;;  %v7311_v38 = vunpack.c.l.bf16 %v6798_v6  ;;  %v6734_v1 = vmul.bf16 %v5032_v56, %v714_v12  ;;  %1966 = vbcast.lane.c.b16.xlu1 %v11538_v25, 304  ;;  %v780_v6 = vld [vmem:[%s8783_s8 + $0x740] sm:$0xf]  ;;  %v781_v12 = vld [vmem:[%s8783_s8 + $0x744] sm:$0xf] }
 0x27c   : > { %v7694_v22 = vadd.f32 %v7693_v3, %v12450_v19  ;;  %v6735_v59 = vmul.bf16 %v5039_v15, %v715_v21  ;;  %v7184_v61 = vunpack.c.l.bf16 %v6671_v11  ;;  %v7719_v16 = vadd.f32 %v7718_v24, %v7183_v44  ;;  %v655_v21 = vld [vmem:[%s8783_s8 + $0x54c] sm:$0xf]  ;;  %v782_v19 = vld [vmem:[%s8783_s8 + $0x748] sm:$0xf] }
 0x27d   : > { %v7856_v55 = vadd.f32 %v7855_v30, %v7310_v60  ;;  %v5053_v5 = vrot.slane %v11575_v46, %v8851_v37  ;;  %v7247_v45 = vunpack.c.l.bf16 %v6734_v1  ;;  %v6736_v51 = vmul.bf16 %v5046_v62, %v716_v2  ;;  %1826 = vbcast.lane.c.b16.xlu0 %v11511_v10, 304  ;;  %v11629_v7 = vpop.permute.xlu1 %1752 }
 0x27e   : > { %v4598_v49 = vrot.slane %v11577_v48, %v8848_v36  ;;  %v4605_v57 = vrot.slane %v11577_v48, %v8851_v37  ;;  %v7633_v46 = vrot.slane %v11403_v34, 2  ;;  %v12452_v14 = vunpack.c.l.bf16 %v12451_v32 }
 0x27f   : > { %v7312_v47 = vunpack.c.l.bf16 %v6799_v26  ;;  %v7248_v39 = vunpack.c.l.bf16 %v6735_v59  ;;  %v7857_v29 = vadd.f32 %v7856_v55, %v7311_v38  ;;  %v7788_v13 = vadd.f32 %v7787_v28, %v7247_v45  ;;  %1830 = vbcast.lane.c.b16.xlu1 %v11511_v10, 320  ;;  %v783_v38 = vld [vmem:[%s8783_s8 + $0x74c] sm:$0xf]  ;;  %v11651_v59 = vpop.permute.xlu0 %1892 }
 0x280   : > { %v7695_v31 = vadd.f32 %v7694_v22, %v12452_v14  ;;  %v6672_v33 = vmul.bf16 %v4598_v49, %v652_v52  ;;  %v4612_v48 = vrot.slane %v11591_v23, %v8848_v36  ;;  %v7165_v8 = vunpack.c.l.bf16 %v11460_v4 }
 0x281   : > { %v7720_v35 = vadd.f32 %v7719_v16, %v7184_v61  ;;  %v6737_v11 = vmul.bf16 %v5053_v5, %v717_v18  ;;  %v6673_v44 = vmul.bf16 %v4605_v57, %v653_v54  ;;  %v7789_v43 = vadd.f32 %v7788_v13, %v7248_v39  ;;  %1690 = vbcast.lane.c.b16.xlu0 %v11519_v58, 320  ;;  %v11649_v1 = vpop.permute.xlu1 %1616  ;;  %v718_v5 = vld [vmem:[%s8783_s8 + $0x648] sm:$0xf] }
 0x282   : > { %v7249_v3 = vunpack.c.l.bf16 %v6736_v51  ;;  %v7185_v24 = vunpack.c.l.bf16 %v6672_v33  ;;  %v4619_v0 = vrot.slane %v11591_v23, %v8851_v37  ;;  %v7166_v4 = vunpack.c.l.bf16 %v11465_v20  ;;  %v719_v51 = vld [vmem:[%s8783_s8 + $0x64c] sm:$0xf] }
 0x283   : > { %v6674_v60 = vmul.bf16 %v4612_v48, %v654_v9  ;;  %v5494_v56 = vrot.slane %v11593_v17, %v8848_v36  ;;  %v5501_v15 = vrot.slane %v11593_v17, %v8851_v37  ;;  %v7696_v22 = vadd.f32 %v7695_v31, %v7165_v8  ;;  %1694 = vbcast.lane.c.b16.xlu1 %v11519_v58, 336  ;;  %v11669_v9 = vpop.permute.xlu0 %1756 }
 0x284   : > { %v7858_v30 = vadd.f32 %v7857_v29, %v7312_v47  ;;  %v7721_v23 = vadd.f32 %v7720_v35, %v7185_v24  ;;  %v5508_v26 = vrot.slane %v11610_v27, %v8848_v36  ;;  %v7250_v2 = vunpack.c.l.bf16 %v6737_v11  ;;  %v721_v29 = vld [vmem:[%s8783_s8 + $0x654] sm:$0xf]  ;;  %v656_v24 = vld [vmem:[%s8783_s8 + $0x550] sm:$0xf] }
 0x285   : > { %v7186_v20 = vunpack.c.l.bf16 %v6673_v44  ;;  %v6800_v62 = vmul.bf16 %v5494_v56, %v780_v6  ;;  %v6801_v28 = vmul.bf16 %v5501_v15, %v781_v12  ;;  %v7790_v17 = vadd.f32 %v7789_v43, %v7249_v3  ;;  %1970 = vbcast.lane.c.b16.xlu0 %v11538_v25, 320  ;;  %v11667_v33 = vpop.permute.xlu1 %1896 }
 0x286   : > { %v6675_v61 = vmul.bf16 %v4619_v0, %v655_v21  ;;  %v5515_v16 = vrot.slane %v11610_v27, %v8851_v37  ;;  %v6802_v55 = vmul.bf16 %v5508_v26, %v782_v19  ;;  %v7187_v45 = vunpack.c.l.bf16 %v6674_v60  ;;  %v720_v27 = vld [vmem:[%s8783_s8 + $0x650] sm:$0xf]  ;;  %v657_v0 = vld [vmem:[%s8783_s8 + $0x554] sm:$0xf]  ;;  %v658_v19 = vld [vmem:[%s8783_s8 + $0x558] sm:$0xf] }
 0x287   : > { %v7722_v52 = vadd.f32 %v7721_v23, %v7186_v20  ;;  %v7313_v18 = vunpack.c.l.bf16 %v6800_v62  ;;  %v5060_v54 = vrot.slane %v11612_v40, %v8848_v36  ;;  %v7697_v49 = vadd.f32 %v7696_v22, %v7166_v4  ;;  %1974 = vbcast.lane.c.b16.xlu1 %v11538_v25, 336 }
 0x288   : > { %v7314_v57 = vunpack.c.l.bf16 %v6801_v28  ;;  %v6803_v32 = vmul.bf16 %v5515_v16, %v783_v38  ;;  %v5067_v14 = vrot.slane %v11612_v40, %v8851_v37  ;;  %v7315_v47 = vunpack.c.l.bf16 %v6802_v55  ;;  %v785_v55 = vld [vmem:[%s8783_s8 + $0x754] sm:$0xf] }
 0x289   : > { %v7859_v31 = vadd.f32 %v7858_v30, %v7313_v18  ;;  %v6738_v39 = vmul.bf16 %v5060_v54, %v718_v5  ;;  %v5074_v13 = vrot.slane %v11629_v7, %v8848_v36  ;;  %v7791_v48 = vadd.f32 %v7790_v17, %v7250_v2  ;;  %1834 = vbcast.lane.c.b16.xlu0 %v11511_v10, 336  ;;  %v11682_v22 = vpop.permute.xlu1 %1760  ;;  %v11684_v30 = vpop.permute.xlu0 %1620  ;;  %v786_v54 = vld [vmem:[%s8783_s8 + $0x758] sm:$0xf] }
 0x28a   : > { %v7188_v8 = vunpack.c.l.bf16 %v6675_v61  ;;  %v6739_v35 = vmul.bf16 %v5067_v14, %v719_v51  ;;  %v5081_v40 = vrot.slane %v11629_v7, %v8851_v37  ;;  %v7723_v11 = vadd.f32 %v7722_v52, %v7187_v45  ;;  %v784_v61 = vld [vmem:[%s8783_s8 + $0x750] sm:$0xf] }
 0x28b   : > { %v7860_v44 = vadd.f32 %v7859_v31, %v7314_v57  ;;  %v7251_v43 = vunpack.c.l.bf16 %v6738_v39  ;;  %v6740_v3 = vmul.bf16 %v5074_v13, %v720_v27  ;;  %v7316_v6 = vunpack.c.l.bf16 %v6803_v32  ;;  %1838 = vbcast.lane.c.b16.xlu1 %v11511_v10, 352  ;;  %v787_v27 = vld [vmem:[%s8783_s8 + $0x75c] sm:$0xf]  ;;  %v722_v13 = vld [vmem:[%s8783_s8 + $0x658] sm:$0xf] }
 0x28c   : > { %v6741_v12 = vmul.bf16 %v5081_v40, %v721_v29  ;;  %v4626_v4 = vrot.slane %v11631_v53, %v8848_v36  ;;  %v4633_v21 = vrot.slane %v11631_v53, %v8851_v37  ;;  %v7252_v60 = vunpack.c.l.bf16 %v6739_v35  ;;  %v659_v53 = vld [vmem:[%s8783_s8 + $0x55c] sm:$0xf] }
 0x28d   : > { %v7861_v7 = vadd.f32 %v7860_v44, %v7315_v47  ;;  %v7792_v56 = vadd.f32 %v7791_v48, %v7251_v43  ;;  %v7253_v15 = vunpack.c.l.bf16 %v6740_v3  ;;  %v11688_v23 = vadd.f32 %v7697_v49, %v7167_v50  ;;  %1698 = vbcast.lane.c.b16.xlu0 %v11519_v58, 352  ;;  %v11706_v49 = vpop.permute.xlu0 %1900  ;;  %v723_v40 = vld [vmem:[%s8783_s8 + $0x65c] sm:$0xf]  ;;  %v724_v44 = vld [vmem:[%s8783_s8 + $0x660] sm:$0xf] }
 0x28e   : > { %v6676_v26 = vmul.bf16 %v4626_v4, %v656_v24  ;;  %v6677_v2 = vmul.bf16 %v4633_v21, %v657_v0  ;;  %v4640_v20 = vrot.slane %v11649_v1, %v8848_v36  ;;  %v7724_v62 = vadd.f32 %v7723_v11, %v7188_v8 }
 0x28f   : > { %v7793_v28 = vadd.f32 %v7792_v56, %v7252_v60  ;;  %v7254_v38 = vunpack.c.l.bf16 %v6741_v12  ;;  %v4647_v17 = vrot.slane %v11649_v1, %v8851_v37  ;;  %v7862_v16 = vadd.f32 %v7861_v7, %v7316_v6  ;;  %v11704_v1 = vpop.permute.xlu1 %1624  ;;  %1702 = vbcast.lane.c.b16.xlu1 %v11519_v58, 368  ;;  %v725_v7 = vld [vmem:[%s8783_s8 + $0x664] sm:$0xf] }
 0x290   : > { %v7189_v42 = vunpack.c.l.bf16 %v6676_v26  ;;  %v6678_v50 = vmul.bf16 %v4640_v20, %v658_v19  ;;  %v5522_v5 = vrot.slane %v11651_v59, %v8848_v36  ;;  %v7190_v45 = vunpack.c.l.bf16 %v6677_v2  ;;  %v660_v19 = vld [vmem:[%s8783_s8 + $0x560] sm:$0xf]  ;;  %v661_v20 = vld [vmem:[%s8783_s8 + $0x564] sm:$0xf] }
 0x291   : > { %v7794_v52 = vadd.f32 %v7793_v28, %v7253_v15  ;;  %v6679_v18 = vmul.bf16 %v4647_v17, %v659_v53  ;;  %v5529_v51 = vrot.slane %v11651_v59, %v8851_v37  ;;  %v5536_v31 = vrot.slane %v11667_v33, %v8848_v36  ;;  %1978 = vbcast.lane.c.b16.xlu0 %v11538_v25, 352  ;;  %v11726_v0 = vpop.permute.xlu0 %1764 }
 0x292   : > { %v7725_v57 = vadd.f32 %v7724_v62, %v7189_v42  ;;  %v7191_v32 = vunpack.c.l.bf16 %v6678_v50  ;;  %v6804_v14 = vmul.bf16 %v5522_v5, %v784_v61  ;;  %v5543_v59 = vrot.slane %v11667_v33, %v8851_v37  ;;  %v663_v5 = vld [vmem:[%s8783_s8 + $0x56c] sm:$0xf] }
 0x293   : > { %v7795_v47 = vadd.f32 %v7794_v52, %v7254_v38  ;;  %v7192_v39 = vunpack.c.l.bf16 %v6679_v18  ;;  %v6805_v29 = vmul.bf16 %v5529_v51, %v785_v55  ;;  %v6806_v35 = vmul.bf16 %v5536_v31, %v786_v54  ;;  %v11724_v24 = vpop.permute.xlu1 %1904  ;;  %1982 = vbcast.lane.c.b16.xlu1 %v11538_v25, 368  ;;  %v788_v52 = vld [vmem:[%s8783_s8 + $0x760] sm:$0xf] }
 0x294   : > { %v7726_v48 = vadd.f32 %v7725_v57, %v7190_v45  ;;  %v7317_v8 = vunpack.c.l.bf16 %v6804_v14  ;;  %v5088_v11 = vrot.slane %v11669_v9, %v8848_v36  ;;  %v6807_v58 = vmul.bf16 %v5543_v59, %v787_v27  ;;  %v789_v27 = vld [vmem:[%s8783_s8 + $0x764] sm:$0xf]  ;;  %v790_v59 = vld [vmem:[%s8783_s8 + $0x768] sm:$0xf] }
 0x295   : > { %v7318_v43 = vunpack.c.l.bf16 %v6805_v29  ;;  %v5095_v3 = vrot.slane %v11669_v9, %v8851_v37  ;;  %v5102_v33 = vrot.slane %v11682_v22, %v8848_v36  ;;  %v7319_v4 = vunpack.c.l.bf16 %v6806_v35  ;;  %1842 = vbcast.lane.c.b16.xlu0 %v11511_v10, 368  ;;  %v791_v35 = vld [vmem:[%s8783_s8 + $0x76c] sm:$0xf] }
 0x296   : > { %v7727_v6 = vadd.f32 %v7726_v48, %v7191_v32  ;;  %v7863_v12 = vadd.f32 %v7862_v16, %v7317_v8  ;;  %v6742_v21 = vmul.bf16 %v5088_v11, %v722_v13  ;;  %v7320_v60 = vunpack.c.l.bf16 %v6807_v58  ;;  %v11742_v16 = vpop.permute.xlu0 %1628 }
 0x297   : > { %v6743_v56 = vmul.bf16 %v5095_v3, %v723_v40  ;;  %v5109_v9 = vrot.slane %v11682_v22, %v8851_v37  ;;  %v6744_v15 = vmul.bf16 %v5102_v33, %v724_v44  ;;  %v4654_v62 = vrot.slane %v11684_v30, %v8848_v36  ;;  %v662_v22 = vld [vmem:[%s8783_s8 + $0x568] sm:$0xf]  ;;  %v11740_v61 = vpop.permute.xlu1 %1768 }
 0x298   : > { %v7728_v26 = vadd.f32 %v7727_v6, %v7192_v39  ;;  %v7864_v2 = vadd.f32 %v7863_v12, %v7318_v43  ;;  %v7255_v53 = vunpack.c.l.bf16 %v6742_v21  ;;  %v4661_v17 = vrot.slane %v11684_v30, %v8851_v37  ;;  %v726_v3 = vld [vmem:[%s8783_s8 + $0x668] sm:$0xf] }
 0x299   : > { %v7256_v25 = vunpack.c.l.bf16 %v6743_v56  ;;  %v6745_v28 = vmul.bf16 %v5109_v9, %v725_v7  ;;  %v7257_v38 = vunpack.c.l.bf16 %v6744_v15  ;;  %v6680_v55 = vmul.bf16 %v4654_v62, %v660_v19  ;;  %v728_v15 = vld [vmem:[%s8783_s8 + $0x670] sm:$0xf] }
 0x29a   : > { %v7865_v42 = vadd.f32 %v7864_v2, %v7319_v4  ;;  %v7796_v50 = vadd.f32 %v7795_v47, %v7255_v53  ;;  %v4668_v10 = vrot.slane %v11704_v1, %v8848_v36  ;;  %v6681_v18 = vmul.bf16 %v4661_v17, %v661_v20  ;;  %v11761_v11 = vpop.permute.xlu0 %1908  ;;  %v727_v4 = vld [vmem:[%s8783_s8 + $0x66c] sm:$0xf]  ;;  %v729_v2 = vld [vmem:[%s8783_s8 + $0x674] sm:$0xf]  ;;  %v664_v17 = vld [vmem:[%s8783_s8 + $0x570] sm:$0xf] }
 0x29b   : > { %v7258_v45 = vunpack.c.l.bf16 %v6745_v28  ;;  %v4675_v30 = vrot.slane %v11704_v1, %v8851_v37  ;;  %v5550_v51 = vrot.slane %v11706_v49, %v8848_v36  ;;  %v7193_v32 = vunpack.c.l.bf16 %v6680_v55  ;;  %v11756_v13 = vpop.permute.xlu1 %1632  ;;  %v665_v55 = vld [vmem:[%s8783_s8 + $0x574] sm:$0xf] }
 0x29c   : > { %v7866_v54 = vadd.f32 %v7865_v42, %v7320_v60  ;;  %v7797_v57 = vadd.f32 %v7796_v50, %v7256_v25  ;;  %v6682_v14 = vmul.bf16 %v4668_v10, %v662_v22  ;;  %v7194_v31 = vunpack.c.l.bf16 %v6681_v18 }
 0x29d   : > { %v6683_v47 = vmul.bf16 %v4675_v30, %v663_v5  ;;  %v5557_v39 = vrot.slane %v11706_v49, %v8851_v37  ;;  %v6808_v29 = vmul.bf16 %v5550_v51, %v788_v52  ;;  %v7729_v48 = vadd.f32 %v7728_v26, %v7193_v32 }
 0x29e   : > { %v7798_v1 = vadd.f32 %v7797_v57, %v7257_v38  ;;  %v7195_v8 = vunpack.c.l.bf16 %v6682_v14  ;;  %v5564_v40 = vrot.slane %v11724_v24, %v8848_v36  ;;  %v5571_v49 = vrot.slane %v11724_v24, %v8851_v37  ;;  %v667_v57 = vld [vmem:[%s8783_s8 + $0x57c] sm:$0xf] }
 0x29f   : > { %v7196_v44 = vunpack.c.l.bf16 %v6683_v47  ;;  %v6809_v43 = vmul.bf16 %v5557_v39, %v789_v27  ;;  %v7321_v58 = vunpack.c.l.bf16 %v6808_v29  ;;  %v7730_v6 = vadd.f32 %v7729_v48, %v7194_v31  ;;  %v1913_v20 = vpop.permute.xlu1 %1912  ;;  %v792_v39 = vld [vmem:[%s8783_s8 + $0x770] sm:$0xf] }
 0x2a0   : > { %v7799_v33 = vadd.f32 %v7798_v1, %v7258_v45  ;;  %v6810_v12 = vmul.bf16 %v5564_v40, %v790_v59  ;;  %v5116_v21 = vrot.slane %v11726_v0, %v8848_v36  ;;  %v6811_v56 = vmul.bf16 %v5571_v49, %v791_v35  ;;  %v793_v1 = vld [vmem:[%s8783_s8 + $0x774] sm:$0xf] }
 0x2a1   : > { %v7322_v7 = vunpack.c.l.bf16 %v6809_v43  ;;  %v7867_v60 = vadd.f32 %v7866_v54, %v7321_v58  ;;  %v5123_v9 = vrot.slane %v11726_v0, %v8851_v37  ;;  %v7731_v19 = vadd.f32 %v7730_v6, %v7195_v8  ;;  %v11778_v0 = vpop.permute.xlu0 %1772  ;;  %v794_v8 = vld [vmem:[%s8783_s8 + $0x778] sm:$0xf] }
 0x2a2   : > { %v7323_v26 = vunpack.c.l.bf16 %v6810_v12  ;;  %v6746_v24 = vmul.bf16 %v5116_v21, %v726_v3  ;;  %v5130_v53 = vrot.slane %v11740_v61, %v8848_v36  ;;  %v7324_v25 = vunpack.c.l.bf16 %v6811_v56  ;;  %v795_v12 = vld [vmem:[%s8783_s8 + $0x77c] sm:$0xf]  ;;  %v730_v56 = vld [vmem:[%s8783_s8 + $0x678] sm:$0xf] }
 0x2a3   : > { %v7868_v62 = vadd.f32 %v7867_v60, %v7322_v7  ;;  %v6747_v28 = vmul.bf16 %v5123_v9, %v727_v4  ;;  %v5137_v38 = vrot.slane %v11740_v61, %v8851_v37  ;;  %v7732_v22 = vadd.f32 %v7731_v19, %v7196_v44  ;;  %v666_v61 = vld [vmem:[%s8783_s8 + $0x578] sm:$0xf]  ;;  %v1780_v35 = vpop.permute.xlu1 %1779  ;;  %v731_v19 = vld [vmem:[%s8783_s8 + $0x67c] sm:$0xf] }
 0x2a4   : > { %v7259_v42 = vunpack.c.l.bf16 %v6746_v24  ;;  %v6748_v50 = vmul.bf16 %v5130_v53, %v728_v15  ;;  %v4682_v5 = vrot.slane %v11742_v16, %v8848_v36  ;;  %v4689_v18 = vrot.slane %v11742_v16, %v8851_v37 }
 0x2a5   : > { %v7869_v10 = vadd.f32 %v7868_v62, %v7323_v26  ;;  %v7260_v52 = vunpack.c.l.bf16 %v6747_v28  ;;  %v6749_v45 = vmul.bf16 %v5137_v38, %v729_v2  ;;  %v4696_v32 = vrot.slane %v11756_v13, %v8848_v36  ;;  %v1640_v58 = vpop.permute.xlu0 %1639  ;;  %v732_v28 = vld [vmem:[%s8783_s8 + $0x680] sm:$0xf] }
 0x2a6   : > { %v7800_v30 = vadd.f32 %v7799_v33, %v7259_v42  ;;  %v7261_v51 = vunpack.c.l.bf16 %v6748_v50  ;;  %v6684_v54 = vmul.bf16 %v4682_v5, %v664_v17  ;;  %v6685_v31 = vmul.bf16 %v4689_v18, %v665_v55  ;;  %v733_v42 = vld [vmem:[%s8783_s8 + $0x684] sm:$0xf]  ;;  %v668_v55 = vld [vmem:[%s8783_s8 + $0x580] sm:$0xf] }
 0x2a7   : > { %v7870_v14 = vadd.f32 %v7869_v10, %v7324_v25  ;;  %v7262_v27 = vunpack.c.l.bf16 %v6749_v45  ;;  %v4703_v47 = vrot.slane %v11756_v13, %v8851_v37  ;;  %v6686_v16 = vmul.bf16 %v4696_v32, %v666_v61  ;;  %v1644_v24 = vpop.permute.xlu1 %1643 }
 0x2a8   : > { %v7801_v29 = vadd.f32 %v7800_v30, %v7260_v52  ;;  %v7197_v59 = vunpack.c.l.bf16 %v6684_v54  ;;  %v5578_v48 = vrot.slane %v11761_v11, %v8848_v36  ;;  %v7198_v40 = vunpack.c.l.bf16 %v6685_v31  ;;  %v670_v31 = vld [vmem:[%s8783_s8 + $0x588] sm:$0xf] }
 0x2a9   : > { %v6687_v44 = vmul.bf16 %v4703_v47, %v667_v57  ;;  %v5585_v43 = vrot.slane %v11761_v11, %v8851_v37  ;;  %v5592_v13 = vrot.slane %v1913_v20, %v8848_v36  ;;  %v7199_v33 = vunpack.c.l.bf16 %v6686_v16  ;;  %v671_v16 = vld [vmem:[%s8783_s8 + $0x58c] sm:$0xf] }
 0x2aa   : > { %v7802_v49 = vadd.f32 %v7801_v29, %v7261_v51  ;;  %v7733_v3 = vadd.f32 %v7732_v22, %v7197_v59  ;;  %v6812_v6 = vmul.bf16 %v5578_v48, %v792_v39  ;;  %v5599_v7 = vrot.slane %v1913_v20, %v8851_v37  ;;  %v1920_v20 = vpop.permute.xlu0 %1919  ;;  %v669_v51 = vld [vmem:[%s8783_s8 + $0x584] sm:$0xf] }
 0x2ab   : > { %v7200_v4 = vunpack.c.l.bf16 %v6687_v44  ;;  %v6813_v21 = vmul.bf16 %v5585_v43, %v793_v1  ;;  %v6814_v60 = vmul.bf16 %v5592_v13, %v794_v8  ;;  %v5144_v26 = vrot.slane %v11778_v0, %v8848_v36  ;;  %v1924_v54 = vpop.permute.xlu1 %1923  ;;  %v796_v44 = vld [vmem:[%s8783_s8 + $0x780] sm:$0xf] }
 0x2ac   : > { %v7803_v9 = vadd.f32 %v7802_v49, %v7262_v27  ;;  %v7734_v15 = vadd.f32 %v7733_v3, %v7198_v40  ;;  %v7325_v11 = vunpack.c.l.bf16 %v6812_v6  ;;  %v6815_v53 = vmul.bf16 %v5599_v7, %v795_v12  ;;  %v797_v49 = vld [vmem:[%s8783_s8 + $0x784] sm:$0xf]  ;;  %v798_v7 = vld [vmem:[%s8783_s8 + $0x788] sm:$0xf] }
 0x2ad   : > { %v7326_v2 = vunpack.c.l.bf16 %v6813_v21  ;;  %v7327_v62 = vunpack.c.l.bf16 %v6814_v60  ;;  %v5151_v25 = vrot.slane %v11778_v0, %v8851_v37  ;;  %v6750_v22 = vmul.bf16 %v5144_v26, %v730_v56 }
 0x2ae   : > { %v7735_v38 = vadd.f32 %v7734_v15, %v7199_v33  ;;  %v7871_v17 = vadd.f32 %v7870_v14, %v7325_v11  ;;  %v5158_v50 = vrot.slane %v1780_v35, %v8848_v36  ;;  %v7328_v5 = vunpack.c.l.bf16 %v6815_v53  ;;  %v1784_v47 = vpop.permute.xlu0 %1783  ;;  %v799_v11 = vld [vmem:[%s8783_s8 + $0x78c] sm:$0xf] }
 0x2af   : > { %v6751_v10 = vmul.bf16 %v5151_v25, %v731_v19  ;;  %v5165_v52 = vrot.slane %v1780_v35, %v8851_v37  ;;  %v4710_v45 = vrot.slane %v1640_v58, %v8848_v36  ;;  %v7263_v61 = vunpack.c.l.bf16 %v6750_v22  ;;  %v1788_v33 = vpop.permute.xlu1 %1787 }
 0x2b0   : > { %v7736_v18 = vadd.f32 %v7735_v38, %v7200_v4  ;;  %v7872_v0 = vadd.f32 %v7871_v17, %v7326_v2  ;;  %v6752_v30 = vmul.bf16 %v5158_v50, %v732_v28  ;;  %v4717_v14 = vrot.slane %v1640_v58, %v8851_v37 }
 0x2b1   : > { %v7264_v57 = vunpack.c.l.bf16 %v6751_v10  ;;  %v6753_v32 = vmul.bf16 %v5165_v52, %v733_v42  ;;  %v6688_v27 = vmul.bf16 %v4710_v45, %v668_v55  ;;  %v7804_v29 = vadd.f32 %v7803_v9, %v7263_v61 }
 0x2b2   : > { %v7873_v39 = vadd.f32 %v7872_v0, %v7327_v62  ;;  %v7265_v59 = vunpack.c.l.bf16 %v6752_v30  ;;  %v4724_v1 = vrot.slane %v1644_v24, %v8848_v36  ;;  %v6689_v8 = vmul.bf16 %v4717_v14, %v669_v51  ;;  %v1648_v60 = vpop.permute.xlu0 %1647  ;;  %v734_v62 = vld [vmem:[%s8783_s8 + $0x688] sm:$0xf]  ;;  %v8423_v0 = vld [vmem:[%s8804_s11] sm:$0xff] }
 0x2b3   : > { %v7266_v48 = vunpack.c.l.bf16 %v6753_v32  ;;  %v7201_v35 = vunpack.c.l.bf16 %v6688_v27  ;;  %v4731_v40 = vrot.slane %v1644_v24, %v8851_v37  ;;  %v7805_v13 = vadd.f32 %v7804_v29, %v7264_v57  ;;  %v1652_v22 = vpop.permute.xlu1 %1651  ;;  %v8424_v27 = vld [vmem:[%s8804_s11 + $0x8] sm:$0xff]  ;;  %v737_v29 = vld [vmem:[%s8783_s8 + $0x694] sm:$0xf] }
 0x2b4   : > { %v7874_v43 = vadd.f32 %v7873_v39, %v7328_v5  ;;  %v6690_v58 = vmul.bf16 %v4724_v1, %v670_v31  ;;  %v5606_v3 = vrot.slane %v1920_v20, %v8848_v36  ;;  %v7202_v6 = vunpack.c.l.bf16 %v6689_v8  ;;  %v736_v39 = vld [vmem:[%s8783_s8 + $0x690] sm:$0xf] }
 0x2b5   : > { %v7737_v12 = vadd.f32 %v7736_v18, %v7201_v35  ;;  %v6691_v4 = vmul.bf16 %v4731_v40, %v671_v16  ;;  %v5613_v21 = vrot.slane %v1920_v20, %v8851_v37  ;;  %v7806_v56 = vadd.f32 %v7805_v13, %v7265_v59  ;;  %v735_v20 = vld [vmem:[%s8783_s8 + $0x68c] sm:$0xf]  ;;  %v672_v35 = vld [vmem:[%s8783_s8 + $0x590] sm:$0xf]  ;;  %v673_v40 = vld [vmem:[%s8783_s8 + $0x594] sm:$0xf] }
 0x2b6   : > { %v7203_v9 = vunpack.c.l.bf16 %v6690_v58  ;;  %v6816_v15 = vmul.bf16 %v5606_v3, %v796_v44  ;;  %v5620_v19 = vrot.slane %v1924_v54, %v8848_v36  ;;  %v5627_v53 = vrot.slane %v1924_v54, %v8851_v37  ;;  %v11831_v10 = vpop.permute.xlu0 %1927 }
 0x2b7   : > { %v7738_v26 = vadd.f32 %v7737_v12, %v7202_v6  ;;  %v7204_v24 = vunpack.c.l.bf16 %v6691_v4  ;;  %v6817_v2 = vmul.bf16 %v5613_v21, %v797_v49  ;;  %v7807_v25 = vadd.f32 %v7806_v56, %v7266_v48  ;;  %v1932_v59 = vpop.permute.xlu1 %1931  ;;  %v674_v4 = vld [vmem:[%s8783_s8 + $0x598] sm:$0xf] }
 0x2b8   : > { %v7329_v28 = vunpack.c.l.bf16 %v6816_v15  ;;  %v6818_v38 = vmul.bf16 %v5620_v19, %v798_v7  ;;  %v5172_v17 = vrot.slane %v1784_v47, %v8848_v36  ;;  %v6819_v55 = vmul.bf16 %v5627_v53, %v799_v11  ;;  %v675_v15 = vld [vmem:[%s8783_s8 + $0x59c] sm:$0xf] }
 0x2b9   : > { %v7739_v42 = vadd.f32 %v7738_v26, %v7203_v9  ;;  %v7330_v50 = vunpack.c.l.bf16 %v6817_v2  ;;  %v5179_v5 = vrot.slane %v1784_v47, %v8851_v37  ;;  %v7939_v61 = vunpack.c.l.bf16 %v8423_v0  ;;  %v800_v2 = vld [vmem:[%s8783_s8 + $0x790] sm:$0xf] }
 0x2ba   : > { %v7875_v52 = vadd.f32 %v7874_v43, %v7329_v28  ;;  %v7331_v45 = vunpack.c.l.bf16 %v6818_v38  ;;  %v6754_v18 = vmul.bf16 %v5172_v17, %v734_v62  ;;  %v7332_v51 = vunpack.c.l.bf16 %v6819_v55  ;;  %v11841_v44 = vpop.permute.xlu0 %1791  ;;  %v801_v38 = vld [vmem:[%s8783_s8 + $0x794] sm:$0xf]  ;;  %v802_v17 = vld [vmem:[%s8783_s8 + $0x798] sm:$0xf] }
 0x2bb   : > { %v7740_v30 = vadd.f32 %v7739_v42, %v7204_v24  ;;  %v6755_v54 = vmul.bf16 %v5179_v5, %v735_v20  ;;  %v7940_v57 = vunpack.c.h.bf16 %v8423_v0  ;;  %v7941_v31 = vunpack.c.l.bf16 %v8424_v27  ;;  %v1796_v11 = vpop.permute.xlu1 %1795  ;;  %v803_v5 = vld [vmem:[%s8783_s8 + $0x79c] sm:$0xf] }
 0x2bc   : > { %v7876_v32 = vadd.f32 %v7875_v52, %v7330_v50  ;;  %v7267_v14 = vunpack.c.l.bf16 %v6754_v18  ;;  %v7942_v47 = vunpack.c.h.bf16 %v8424_v27  ;;  %v5186_v48 = vrot.slane %v1788_v33, %v8848_v36 }
 0x2bd   : > { %v7268_v16 = vunpack.c.l.bf16 %v6755_v54  ;;  %v7943_v1 = vadd.f32 %v7940_v57, %v7939_v61  ;;  %v5193_v8 = vrot.slane %v1788_v33, %v8851_v37  ;;  %v4738_v58 = vrot.slane %v1648_v60, %v8848_v36 }
 0x2be   : > { %v7877_v43 = vadd.f32 %v7876_v32, %v7331_v45  ;;  %v7808_v13 = vadd.f32 %v7807_v25, %v7267_v14  ;;  %v4745_v49 = vrot.slane %v1648_v60, %v8851_v37  ;;  %v6756_v6 = vmul.bf16 %v5186_v48, %v736_v39  ;;  %v1656_v53 = vpop.permute.xlu0 %1655  ;;  %v738_v14 = vld [vmem:[%s8783_s8 + $0x698] sm:$0xf]  ;;  %v739_v39 = vld [vmem:[%s8783_s8 + $0x69c] sm:$0xf] }
 0x2bf   : > { %v7944_v3 = vadd.f32 %v7943_v1, %v7941_v31  ;;  %v6757_v12 = vmul.bf16 %v5193_v8, %v737_v29  ;;  %v4752_v21 = vrot.slane %v1652_v22, %v8848_v36  ;;  %v6692_v56 = vmul.bf16 %v4738_v58, %v672_v35  ;;  %v1660_v61 = vpop.permute.xlu1 %1659  ;;  %v740_v29 = vld [vmem:[%s8783_s8 + $0x6a0] sm:$0xf] }
 0x2c0   : > { %v7878_v33 = vadd.f32 %v7877_v43, %v7332_v51  ;;  %v7809_v7 = vadd.f32 %v7808_v13, %v7268_v16  ;;  %v6693_v9 = vmul.bf16 %v4745_v49, %v673_v40  ;;  %v7269_v26 = vunpack.c.l.bf16 %v6756_v6  ;;  %v741_v13 = vld [vmem:[%s8783_s8 + $0x6a4] sm:$0xf]  ;;  %v676_v58 = vld [vmem:[%s8783_s8 + $0x5a0] sm:$0xf] }
 0x2c1   : > { %v7945_v19 = vadd.f32 %v7944_v3, %v7942_v47  ;;  %v7270_v24 = vunpack.c.l.bf16 %v6757_v12  ;;  %v4759_v60 = vrot.slane %v1652_v22, %v8851_v37  ;;  %v7205_v62 = vunpack.c.l.bf16 %v6692_v56 }
 0x2c2   : > { %v7206_v25 = vunpack.c.l.bf16 %v6693_v9  ;;  %v6694_v28 = vmul.bf16 %v4752_v21, %v674_v4  ;;  %v5634_v20 = vrot.slane %v11831_v10, %v8848_v36  ;;  %v7810_v42 = vadd.f32 %v7809_v7, %v7269_v26  ;;  %v11860_v27 = vpop.permute.xlu0 %1935  ;;  %v677_v4 = vld [vmem:[%s8783_s8 + $0x5a4] sm:$0xf] }
 0x2c3   : > { %7946 = vadd.xlane.f32.xlu0 %v7945_v19  ;;  %v6695_v50 = vmul.bf16 %v4759_v60, %v675_v15  ;;  %v5641_v55 = vrot.slane %v11831_v10, %v8851_v37  ;;  %v5648_v22 = vrot.slane %v1932_v59, %v8848_v36  ;;  %v7741_v52 = vadd.f32 %v7740_v30, %v7205_v62  ;;  %v1940_v49 = vpop.permute.xlu1 %1939  ;;  %v678_v60 = vld [vmem:[%s8783_s8 + $0x5a8] sm:$0xf] }
 0x2c4   : > { %v7207_v45 = vunpack.c.l.bf16 %v6694_v28  ;;  %v6820_v18 = vmul.bf16 %v5634_v20, %v800_v2  ;;  %v5655_v0 = vrot.slane %v1932_v59, %v8851_v37  ;;  %v7811_v51 = vadd.f32 %v7810_v42, %v7270_v24 }
 0x2c5   : > { %v7208_v54 = vunpack.c.l.bf16 %v6695_v50  ;;  %v6821_v57 = vmul.bf16 %v5641_v55, %v801_v38  ;;  %v6822_v32 = vmul.bf16 %v5648_v22, %v802_v17  ;;  %v7742_v10 = vadd.f32 %v7741_v52, %v7206_v25  ;;  %v679_v25 = vld [vmem:[%s8783_s8 + $0x5ac] sm:$0xf]  ;;  %v804_v38 = vld [vmem:[%s8783_s8 + $0x7a0] sm:$0xf] }
 0x2c6   : > { %v7333_v31 = vunpack.c.l.bf16 %v6820_v18  ;;  %v6823_v47 = vmul.bf16 %v5655_v0, %v803_v5  ;;  %v5200_v30 = vrot.slane %v11841_v44, %v8848_v36  ;;  %v5207_v1 = vrot.slane %v11841_v44, %v8851_v37  ;;  %v1800_v44 = vpop.permute.xlu0 %1799  ;;  %v805_v18 = vld [vmem:[%s8783_s8 + $0x7a4] sm:$0xf] }
 0x2c7   : > { %v7334_v59 = vunpack.c.l.bf16 %v6821_v57  ;;  %v7335_v16 = vunpack.c.l.bf16 %v6822_v32  ;;  %v5214_v48 = vrot.slane %v1796_v11, %v8848_v36  ;;  %v7743_v8 = vadd.f32 %v7742_v10, %v7207_v45  ;;  %v1804_v20 = vpop.permute.xlu1 %1803  ;;  %v806_v32 = vld [vmem:[%s8783_s8 + $0x7a8] sm:$0xf] }
 0x2c8   : > { %v7879_v35 = vadd.f32 %v7878_v33, %v7333_v31  ;;  %v7336_v40 = vunpack.c.l.bf16 %v6823_v47  ;;  %v6758_v43 = vmul.bf16 %v5200_v30, %v738_v14  ;;  %v6759_v3 = vmul.bf16 %v5207_v1, %v739_v39  ;;  %v807_v14 = vld [vmem:[%s8783_s8 + $0x7ac] sm:$0xf]  ;;  %v742_v1 = vld [vmem:[%s8783_s8 + $0x6a8] sm:$0xf] }
 0x2c9   : > { %v5221_v6 = vrot.slane %v1796_v11, %v8851_v37  ;;  %v6760_v12 = vmul.bf16 %v5214_v48, %v740_v29  ;;  %v4766_v21 = vrot.slane %v1656_v53, %v8848_v36  ;;  %v7744_v7 = vadd.f32 %v7743_v8, %v7208_v54 }
 0x2ca   : > { %v7880_v56 = vadd.f32 %v7879_v35, %v7334_v59  ;;  %v7271_v9 = vunpack.c.l.bf16 %v6758_v43  ;;  %v4773_v33 = vrot.slane %v1656_v53, %v8851_v37  ;;  %v7272_v15 = vunpack.c.l.bf16 %v6759_v3  ;;  %v1664_v55 = vpop.permute.xlu0 %1663  ;;  %v743_v35 = vld [vmem:[%s8783_s8 + $0x6ac] sm:$0xf] }
 0x2cb   : > { %v6761_v19 = vmul.bf16 %v5221_v6, %v741_v13  ;;  %v7273_v26 = vunpack.c.l.bf16 %v6760_v12  ;;  %v6696_v24 = vmul.bf16 %v4766_v21, %v676_v58  ;;  %v4780_v28 = vrot.slane %v1660_v61, %v8848_v36  ;;  %v1668_v39 = vpop.permute.xlu1 %1667  ;;  %v744_v6 = vld [vmem:[%s8783_s8 + $0x6b0] sm:$0xf] }
 0x2cc   : > { %v7881_v2 = vadd.f32 %v7880_v56, %v7335_v16  ;;  %v7812_v11 = vadd.f32 %v7811_v51, %v7271_v9  ;;  %v6697_v62 = vmul.bf16 %v4773_v33, %v677_v4  ;;  %v4787_v53 = vrot.slane %v1660_v61, %v8851_v37 }
 0x2cd   : > { %v7274_v17 = vunpack.c.l.bf16 %v6761_v19  ;;  %v7209_v42 = vunpack.c.l.bf16 %v6696_v24  ;;  %v5662_v50 = vrot.slane %v11860_v27, %v8848_v36  ;;  %v6698_v45 = vmul.bf16 %v4780_v28, %v678_v60  ;;  %v681_v24 = vld [vmem:[%s8783_s8 + $0x5b4] sm:$0xf] }
 0x2ce   : > { %v7882_v5 = vadd.f32 %v7881_v2, %v7336_v40  ;;  %v7813_v22 = vadd.f32 %v7812_v11, %v7272_v15  ;;  %v7210_v52 = vunpack.c.l.bf16 %v6697_v62  ;;  %v6699_v51 = vmul.bf16 %v4787_v53, %v679_v25  ;;  %v1944_v43 = vpop.permute.xlu0 %1943  ;;  %v682_v62 = vld [vmem:[%s8783_s8 + $0x5b8] sm:$0xf] }
 0x2cf   : > { %v7745_v0 = vadd.f32 %v7744_v7, %v7209_v42  ;;  %v5669_v54 = vrot.slane %v11860_v27, %v8851_v37  ;;  %v6824_v57 = vmul.bf16 %v5662_v50, %v804_v38  ;;  %v7211_v10 = vunpack.c.l.bf16 %v6698_v45  ;;  %v745_v7 = vld [vmem:[%s8783_s8 + $0x6b4] sm:$0xf]  ;;  %v1948_v25 = vpop.permute.xlu1 %1947 }
 0x2d0   : > { %v7814_v61 = vadd.f32 %v7813_v22, %v7273_v26  ;;  %v5676_v31 = vrot.slane %v1940_v49, %v8848_v36  ;;  %v5683_v47 = vrot.slane %v1940_v49, %v8851_v37  ;;  %v7212_v29 = vunpack.c.l.bf16 %v6699_v51  ;;  %v680_v26 = vld [vmem:[%s8783_s8 + $0x5b0] sm:$0xf]  ;;  %v683_v22 = vld [vmem:[%s8783_s8 + $0x5bc] sm:$0xf] }
 0x2d1   : > { %v7746_v30 = vadd.f32 %v7745_v0, %v7210_v52  ;;  %v6825_v59 = vmul.bf16 %v5669_v54, %v805_v18  ;;  %v7337_v16 = vunpack.c.l.bf16 %v6824_v57  ;;  %v5228_v40 = vrot.slane %v1800_v44, %v8848_v36  ;;  %v808_v51 = vld [vmem:[%s8783_s8 + $0x7b0] sm:$0xf] }
 0x2d2   : > { %v7815_v48 = vadd.f32 %v7814_v61, %v7274_v17  ;;  %v6826_v27 = vmul.bf16 %v5676_v31, %v806_v32  ;;  %v6827_v8 = vmul.bf16 %v5683_v47, %v807_v14  ;;  %v5235_v3 = vrot.slane %v1800_v44, %v8851_v37  ;;  %v1808_v52 = vpop.permute.xlu0 %1807  ;;  %v809_v14 = vld [vmem:[%s8783_s8 + $0x7b4] sm:$0xf] }
 0x2d3   : > { %v7747_v13 = vadd.f32 %v7746_v30, %v7211_v10  ;;  %v7338_v58 = vunpack.c.l.bf16 %v6825_v59  ;;  %v7883_v49 = vadd.f32 %v7882_v5, %v7337_v16  ;;  %v6762_v21 = vmul.bf16 %v5228_v40, %v742_v1  ;;  %v810_v10 = vld [vmem:[%s8783_s8 + $0x7b8] sm:$0xf] }
 0x2d4   : > { %v7339_v12 = vunpack.c.l.bf16 %v6826_v27  ;;  %v7340_v4 = vunpack.c.l.bf16 %v6827_v8  ;;  %v5242_v56 = vrot.slane %v1804_v20, %v8848_v36  ;;  %v6763_v15 = vmul.bf16 %v5235_v3, %v743_v35  ;;  %v746_v27 = vld [vmem:[%s8783_s8 + $0x6b8] sm:$0xf] }
 0x2d5   : > { %v7748_v9 = vadd.f32 %v7747_v13, %v7212_v29  ;;  %v7884_v33 = vadd.f32 %v7883_v49, %v7338_v58  ;;  %v5249_v19 = vrot.slane %v1804_v20, %v8851_v37  ;;  %v7275_v60 = vunpack.c.l.bf16 %v6762_v21  ;;  %v811_v29 = vld [vmem:[%s8783_s8 + $0x7bc] sm:$0xf] }
 0x2d6   : > { %v6764_v2 = vmul.bf16 %v5242_v56, %v744_v6  ;;  %v4794_v44 = vrot.slane %v1664_v55, %v8848_v36  ;;  %v4801_v11 = vrot.slane %v1664_v55, %v8851_v37  ;;  %v7276_v38 = vunpack.c.l.bf16 %v6763_v15 }
 0x2d7   : > { %v7885_v28 = vadd.f32 %v7884_v33, %v7339_v12  ;;  %v6765_v17 = vmul.bf16 %v5249_v19, %v745_v7  ;;  %v4808_v42 = vrot.slane %v1668_v39, %v8848_v36  ;;  %v7816_v53 = vadd.f32 %v7815_v48, %v7275_v60  ;;  %v747_v12 = vld [vmem:[%s8783_s8 + $0x6bc] sm:$0xf]  ;;  %v748_v33 = vld [vmem:[%s8783_s8 + $0x6c0] sm:$0xf] }
 0x2d8   : > { %v7277_v20 = vunpack.c.l.bf16 %v6764_v2  ;;  %v6700_v50 = vmul.bf16 %v4794_v44, %v680_v26  ;;  %v6701_v5 = vmul.bf16 %v4801_v11, %v681_v24  ;;  %v4815_v55 = vrot.slane %v1668_v39, %v8851_v37  ;;  %v749_v24 = vld [vmem:[%s8783_s8 + $0x6c4] sm:$0xf]  ;;  %v684_v2 = vld [vmem:[%s8783_s8 + $0x5c0] sm:$0xf] }
 0x2d9   : > { %v7886_v45 = vadd.f32 %v7885_v28, %v7340_v4  ;;  %v7278_v18 = vunpack.c.l.bf16 %v6765_v17  ;;  %v6702_v0 = vmul.bf16 %v4808_v42, %v682_v62  ;;  %v7817_v54 = vadd.f32 %v7816_v53, %v7276_v38  ;;  %v1815_v8 = vpop.permute.xlu1 %1814  ;;  %v685_v28 = vld [vmem:[%s8783_s8 + $0x5c4] sm:$0xf] }
 0x2da   : > { %v7213_v57 = vunpack.c.l.bf16 %v6700_v50  ;;  %v7214_v32 = vunpack.c.l.bf16 %v6701_v5  ;;  %v5690_v61 = vrot.slane %v1944_v43, %v8848_v36  ;;  %v6703_v31 = vmul.bf16 %v4815_v55, %v683_v22 }
 0x2db   : > { %v7215_v47 = vunpack.c.l.bf16 %v6702_v0  ;;  %v5697_v30 = vrot.slane %v1944_v43, %v8851_v37  ;;  %v5704_v59 = vrot.slane %v1948_v25, %v8848_v36  ;;  %v7818_v16 = vadd.f32 %v7817_v54, %v7277_v20  ;;  %v1675_v4 = vpop.permute.xlu0 %1674  ;;  %v687_v54 = vld [vmem:[%s8783_s8 + $0x5cc] sm:$0xf] }
 0x2dc   : > { %v7749_v39 = vadd.f32 %v7748_v9, %v7213_v57  ;;  %v6828_v1 = vmul.bf16 %v5690_v61, %v808_v51  ;;  %v5711_v48 = vrot.slane %v1948_v25, %v8851_v37  ;;  %v7216_v35 = vunpack.c.l.bf16 %v6703_v31 }
 0x2dd   : > { %v6829_v40 = vmul.bf16 %v5697_v30, %v809_v14  ;;  %v6830_v13 = vmul.bf16 %v5704_v59, %v810_v10  ;;  %v5256_v58 = vrot.slane %v1808_v52, %v8848_v36  ;;  %v7819_v49 = vadd.f32 %v7818_v16, %v7278_v18  ;;  %v1679_v44 = vpop.permute.xlu1 %1678  ;;  %v686_v18 = vld [vmem:[%s8783_s8 + $0x5c8] sm:$0xf]  ;;  %v813_v16 = vld [vmem:[%s8783_s8 + $0x7c4] sm:$0xf] }
 0x2de   : > { %v7750_v43 = vadd.f32 %v7749_v39, %v7214_v32  ;;  %v7341_v3 = vunpack.c.l.bf16 %v6828_v1  ;;  %v6831_v6 = vmul.bf16 %v5711_v48, %v811_v29  ;;  %v5263_v56 = vrot.slane %v1808_v52, %v8851_v37 }
 0x2df   : > { %v7342_v21 = vunpack.c.l.bf16 %v6829_v40  ;;  %v7343_v7 = vunpack.c.l.bf16 %v6830_v13  ;;  %v6766_v9 = vmul.bf16 %v5256_v58, %v746_v27  ;;  %v5270_v60 = vrot.slane %v1815_v8, %v8848_v36  ;;  %v1955_v50 = vpop.permute.xlu0 %1954  ;;  %v814_v40 = vld [vmem:[%s8783_s8 + $0x7c8] sm:$0xf]  ;;  %v815_v13 = vld [vmem:[%s8783_s8 + $0x7cc] sm:$0xf] }
 0x2e0   : > { %v7751_v15 = vadd.f32 %v7750_v43, %v7215_v47  ;;  %v7887_v19 = vadd.f32 %v7886_v45, %v7341_v3  ;;  %v7344_v26 = vunpack.c.l.bf16 %v6831_v6  ;;  %v6767_v11 = vmul.bf16 %v5263_v56, %v747_v12  ;;  %v812_v47 = vld [vmem:[%s8783_s8 + $0x7c0] sm:$0xf] }
 0x2e1   : > { %v7279_v62 = vunpack.c.l.bf16 %v6766_v9  ;;  %v5277_v25 = vrot.slane %v1815_v8, %v8851_v37  ;;  %v4822_v38 = vrot.slane %v1675_v4, %v8848_v36  ;;  %v6768_v53 = vmul.bf16 %v5270_v60, %v748_v33  ;;  %v1959_v32 = vpop.permute.xlu1 %1958  ;;  %v751_v9 = vld [vmem:[%s8783_s8 + $0x6cc] sm:$0xf] }
 0x2e2   : > { %v7752_v17 = vadd.f32 %v7751_v15, %v7216_v35  ;;  %v7888_v42 = vadd.f32 %v7887_v19, %v7342_v21  ;;  %v4829_v20 = vrot.slane %v1675_v4, %v8851_v37  ;;  %v7280_v5 = vunpack.c.l.bf16 %v6767_v11  ;;  %v750_v4 = vld [vmem:[%s8783_s8 + $0x6c8] sm:$0xf]  ;;  %v752_v15 = vld [vmem:[%s8783_s8 + $0x6d0] sm:$0xf] }
 0x2e3   : > { %v7820_v22 = vadd.f32 %v7819_v49, %v7279_v62  ;;  %v6769_v52 = vmul.bf16 %v5277_v25, %v749_v24  ;;  %v6704_v45 = vmul.bf16 %v4822_v38, %v684_v2  ;;  %v7281_v0 = vunpack.c.l.bf16 %v6768_v53  ;;  %v1819_v1 = vpop.permute.xlu0 %1818 }
 0x2e4   : > { %v7889_v55 = vadd.f32 %v7888_v42, %v7343_v7  ;;  %v6705_v51 = vmul.bf16 %v4829_v20, %v685_v28  ;;  %v4836_v57 = vrot.slane %v1679_v44, %v8848_v36  ;;  %v4843_v31 = vrot.slane %v1679_v44, %v8851_v37  ;;  %v753_v28 = vld [vmem:[%s8783_s8 + $0x6d4] sm:$0xf] }
 0x2e5   : > { %v7821_v14 = vadd.f32 %v7820_v22, %v7280_v5  ;;  %v7282_v61 = vunpack.c.l.bf16 %v6769_v52  ;;  %v7217_v10 = vunpack.c.l.bf16 %v6704_v45  ;;  %v11933_v30 = vadd.f32 %v11688_v23, %v7168_v41  ;;  %v1823_v49 = vpop.permute.xlu1 %1822  ;;  %v689_v5 = vld [vmem:[%s8783_s8 + $0x5d4] sm:$0xf] }
 0x2e6   : > { %v7218_v29 = vunpack.c.l.bf16 %v6705_v51  ;;  %v6706_v59 = vmul.bf16 %v4836_v57, %v686_v18  ;;  %v5718_v39 = vrot.slane %v1955_v50, %v8848_v36  ;;  %v6707_v8 = vmul.bf16 %v4843_v31, %v687_v54 }
 0x2e7   : > { %v7822_v48 = vadd.f32 %v7821_v14, %v7281_v0  ;;  %v7753_v27 = vadd.f32 %v7752_v17, %v7217_v10  ;;  %v5725_v35 = vrot.slane %v1955_v50, %v8851_v37  ;;  %v5732_v41 = vrot.slane %v1959_v32, %v8848_v36  ;;  %v1683_v19 = vpop.permute.xlu0 %1682  ;;  %v688_v50 = vld [vmem:[%s8783_s8 + $0x5d0] sm:$0xf] }
 0x2e8   : > { %v7219_v63 = vunpack.c.l.bf16 %v6706_v59  ;;  %v6832_v58 = vmul.bf16 %v5718_v39, %v812_v47  ;;  %v5739_v23 = vrot.slane %v1959_v32, %v8851_v37  ;;  %v7890_v43 = vadd.f32 %v7889_v55, %v7344_v26  ;;  %v690_v55 = vld [vmem:[%s8783_s8 + $0x5d8] sm:$0xf]  ;;  %v691_v47 = vld [vmem:[%s8783_s8 + $0x5dc] sm:$0xf] }
 0x2e9   : > { %v7823_v3 = vadd.f32 %v7822_v48, %v7282_v61  ;;  %v7754_v6 = vadd.f32 %v7753_v27, %v7218_v29  ;;  %v6833_v12 = vmul.bf16 %v5725_v35, %v813_v16  ;;  %v6834_v7 = vmul.bf16 %v5732_v41, %v814_v40  ;;  %v1687_v38 = vpop.permute.xlu1 %1686  ;;  %v816_v29 = vld [vmem:[%s8783_s8 + $0x7d0] sm:$0xf] }
 0x2ea   : > { %v7345_v21 = vunpack.c.l.bf16 %v6832_v58  ;;  %v6835_v56 = vmul.bf16 %v5739_v23, %v815_v13  ;;  %v5284_v33 = vrot.slane %v1819_v1, %v8848_v36  ;;  %v7220_v24 = vunpack.c.l.bf16 %v6707_v8  ;;  %v817_v13 = vld [vmem:[%s8783_s8 + $0x7d4] sm:$0xf] }
 0x2eb   : > { %v7755_v60 = vadd.f32 %v7754_v6, %v7219_v63  ;;  %v5291_v2 = vrot.slane %v1819_v1, %v8851_v37  ;;  %v5298_v26 = vrot.slane %v1823_v49, %v8848_v36  ;;  %v7346_v44 = vunpack.c.l.bf16 %v6833_v12  ;;  %v1963_v0 = vpop.permute.xlu0 %1962 }
 0x2ec   : > { %v7891_v11 = vadd.f32 %v7890_v43, %v7345_v21  ;;  %v7347_v62 = vunpack.c.l.bf16 %v6834_v7  ;;  %v6770_v25 = vmul.bf16 %v5284_v33, %v750_v4  ;;  %v7348_v17 = vunpack.c.l.bf16 %v6835_v56  ;;  %v818_v43 = vld [vmem:[%s8783_s8 + $0x7d8] sm:$0xf] }
 0x2ed   : > { %v6771_v42 = vmul.bf16 %v5291_v2, %v751_v9  ;;  %v5305_v53 = vrot.slane %v1823_v49, %v8851_v37  ;;  %v6772_v20 = vmul.bf16 %v5298_v26, %v752_v15  ;;  %v4850_v45 = vrot.slane %v1683_v19, %v8848_v36  ;;  %v1967_v59 = vpop.permute.xlu1 %1966  ;;  %v754_v7 = vld [vmem:[%s8783_s8 + $0x6d8] sm:$0xf] }
 0x2ee   : > { %v7892_v22 = vadd.f32 %v7891_v11, %v7346_v44  ;;  %v7283_v52 = vunpack.c.l.bf16 %v6770_v25  ;;  %v4857_v18 = vrot.slane %v1683_v19, %v8851_v37  ;;  %v7756_v51 = vadd.f32 %v7755_v60, %v7220_v24  ;;  %v755_v44 = vld [vmem:[%s8783_s8 + $0x6dc] sm:$0xf] }
 0x2ef   : > { %v7284_v54 = vunpack.c.l.bf16 %v6771_v42  ;;  %v6773_v57 = vmul.bf16 %v5305_v53, %v753_v28  ;;  %v4864_v32 = vrot.slane %v1687_v38, %v8848_v36  ;;  %v7285_v61 = vunpack.c.l.bf16 %v6772_v20  ;;  %v1827_v63 = vpop.permute.xlu0 %1826 }
 0x2f0   : > { %v7824_v14 = vadd.f32 %v7823_v3, %v7283_v52  ;;  %v6708_v10 = vmul.bf16 %v4850_v45, %v688_v50  ;;  %v6709_v31 = vmul.bf16 %v4857_v18, %v689_v5  ;;  %v7893_v16 = vadd.f32 %v7892_v22, %v7347_v62  ;;  %v819_v3 = vld [vmem:[%s8783_s8 + $0x7dc] sm:$0xf]  ;;  %v757_v50 = vld [vmem:[%s8783_s8 + $0x6e4] sm:$0xf] }
 0x2f1   : > { %v4871_v39 = vrot.slane %v1687_v38, %v8851_v37  ;;  %v6710_v1 = vmul.bf16 %v4864_v32, %v690_v55  ;;  %v5746_v48 = vrot.slane %v1963_v0, %v8848_v36  ;;  %v7286_v8 = vunpack.c.l.bf16 %v6773_v57  ;;  %v1831_v56 = vpop.permute.xlu1 %1830 }
 0x2f2   : > { %v7825_v27 = vadd.f32 %v7824_v14, %v7284_v54  ;;  %v7221_v35 = vunpack.c.l.bf16 %v6708_v10  ;;  %v7222_v40 = vunpack.c.l.bf16 %v6709_v31  ;;  %v5753_v23 = vrot.slane %v1963_v0, %v8851_v37  ;;  %v692_v0 = vld [vmem:[%s8783_s8 + $0x5e0] sm:$0xf] }
 0x2f3   : > { %v6711_v58 = vmul.bf16 %v4871_v39, %v691_v47  ;;  %v7223_v41 = vunpack.c.l.bf16 %v6710_v1  ;;  %v6836_v49 = vmul.bf16 %v5746_v48, %v816_v29  ;;  %v5760_v4 = vrot.slane %v1967_v59, %v8848_v36  ;;  %v1691_v11 = vpop.permute.xlu0 %1690  ;;  %v695_v48 = vld [vmem:[%s8783_s8 + $0x5ec] sm:$0xf] }
 0x2f4   : > { %v7826_v6 = vadd.f32 %v7825_v27, %v7285_v61  ;;  %v7757_v12 = vadd.f32 %v7756_v51, %v7221_v35  ;;  %v5767_v21 = vrot.slane %v1967_v59, %v8851_v37  ;;  %v7894_v9 = vadd.f32 %v7893_v16, %v7348_v17  ;;  %v756_v17 = vld [vmem:[%s8783_s8 + $0x6e0] sm:$0xf]  ;;  %v693_v51 = vld [vmem:[%s8783_s8 + $0x5e4] sm:$0xf]  ;;  %v694_v59 = vld [vmem:[%s8783_s8 + $0x5e8] sm:$0xf] }
 0x2f5   : > { %v6837_v33 = vmul.bf16 %v5753_v23, %v817_v13  ;;  %v7349_v15 = vunpack.c.l.bf16 %v6836_v49  ;;  %v5312_v19 = vrot.slane %v1827_v63, %v8848_v36  ;;  %v7224_v60 = vunpack.c.l.bf16 %v6711_v58  ;;  %v1695_v22 = vpop.permute.xlu1 %1694  ;;  %v820_v58 = vld [vmem:[%s8783_s8 + $0x7e0] sm:$0xf] }
 0x2f6   : > { %v7758_v24 = vadd.f32 %v7757_v12, %v7222_v40  ;;  %v6838_v2 = vmul.bf16 %v5760_v4, %v818_v43  ;;  %v11968_v26 = vmul.bf16 %v5767_v21, %v819_v3  ;;  %v5319_v28 = vrot.slane %v1827_v63, %v8851_v37  ;;  %v821_v43 = vld [vmem:[%s8783_s8 + $0x7e4] sm:$0xf] }
 0x2f7   : > { %v7350_v62 = vunpack.c.l.bf16 %v6837_v33  ;;  %v7895_v25 = vadd.f32 %v7894_v9, %v7349_v15  ;;  %v6774_v38 = vmul.bf16 %v5312_v19, %v754_v7  ;;  %v7827_v42 = vadd.f32 %v7826_v6, %v7286_v8  ;;  %v1971_v61 = vpop.permute.xlu0 %1970  ;;  %v822_v6 = vld [vmem:[%s8783_s8 + $0x7e8] sm:$0xf]  ;;  %v823_v19 = vld [vmem:[%s8783_s8 + $0x7ec] sm:$0xf] }
 0x2f8   : > { %v7759_v53 = vadd.f32 %v7758_v24, %v7223_v41  ;;  %v7351_v20 = vunpack.c.l.bf16 %v6838_v2  ;;  %v5326_v5 = vrot.slane %v1831_v56, %v8848_v36  ;;  %v6775_v45 = vmul.bf16 %v5319_v28, %v755_v44 }
 0x2f9   : > { %v7896_v52 = vadd.f32 %v7895_v25, %v7350_v62  ;;  %v7287_v18 = vunpack.c.l.bf16 %v6774_v38  ;;  %v5333_v55 = vrot.slane %v1831_v56, %v8851_v37  ;;  %v7700_v54 = vrot.slane %v11933_v30, 4  ;;  %v1975_v8 = vpop.permute.xlu1 %1974  ;;  %v758_v62 = vld [vmem:[%s8783_s8 + $0x6e8] sm:$0xf] }
 0x2fa   : > { %v6776_v57 = vmul.bf16 %v5326_v5, %v756_v17  ;;  %v4878_v32 = vrot.slane %v1691_v11, %v8848_v36  ;;  %v4885_v14 = vrot.slane %v1691_v11, %v8851_v37  ;;  %v7352_v10 = vunpack.c.l.bf16 %v11968_v26  ;;  %v759_v17 = vld [vmem:[%s8783_s8 + $0x6ec] sm:$0xf] }
 0x2fb   : > { %v7288_v31 = vunpack.c.l.bf16 %v6775_v45  ;;  %v7828_v47 = vadd.f32 %v7827_v42, %v7287_v18  ;;  %v6777_v29 = vmul.bf16 %v5333_v55, %v757_v50  ;;  %v4892_v27 = vrot.slane %v1695_v22, %v8848_v36  ;;  %v1835_v12 = vpop.permute.xlu0 %1834  ;;  %v696_v55 = vld [vmem:[%s8783_s8 + $0x5f0] sm:$0xf] }
 0x2fc   : > { %v7289_v16 = vunpack.c.l.bf16 %v6776_v57  ;;  %v6712_v39 = vmul.bf16 %v4878_v32, %v692_v0  ;;  %v6713_v1 = vmul.bf16 %v4885_v14, %v693_v51  ;;  %v7760_v35 = vadd.f32 %v7759_v53, %v7224_v60  ;;  %v760_v32 = vld [vmem:[%s8783_s8 + $0x6f0] sm:$0xf]  ;;  %v697_v14 = vld [vmem:[%s8783_s8 + $0x5f4] sm:$0xf] }
 0x2fd   : > { %v7897_v40 = vadd.f32 %v7896_v52, %v7351_v20  ;;  %v7829_v13 = vadd.f32 %v7828_v47, %v7288_v31  ;;  %v4899_v63 = vrot.slane %v1695_v22, %v8851_v37  ;;  %v7290_v41 = vunpack.c.l.bf16 %v6777_v29  ;;  %v1839_v60 = vpop.permute.xlu1 %1838 }
 0x2fe   : > { %v7225_v23 = vunpack.c.l.bf16 %v6712_v39  ;;  %v6714_v49 = vmul.bf16 %v4892_v27, %v694_v59  ;;  %v5774_v3 = vrot.slane %v1971_v61, %v8848_v36  ;;  %v5781_v7 = vrot.slane %v1971_v61, %v8851_v37  ;;  %v12453_v59 = vld [vmem:[#allocation34_spill] sm:$0xff] }
 0x2ff   : > { %v7830_v4 = vadd.f32 %v7829_v13, %v7289_v16  ;;  %v6715_v21 = vmul.bf16 %v4899_v63, %v695_v48  ;;  %v5788_v56 = vrot.slane %v1975_v8, %v8848_v36  ;;  %v7226_v9 = vunpack.c.l.bf16 %v6713_v1  ;;  %v1699_v53 = vpop.permute.xlu0 %1698  ;;  %v12455_v1 = vld [vmem:[#allocation28_spill] sm:$0xff] }
 0x300   : > { %v7761_v33 = vadd.f32 %v7760_v35, %v7225_v23  ;;  %v6840_v15 = vmul.bf16 %v5774_v3, %v820_v58  ;;  %v5795_v24 = vrot.slane %v1975_v8, %v8851_v37  ;;  %v11995_v2 = vadd.f32 %v7700_v54, %v11933_v30  ;;  %v761_v35 = vld [vmem:[%s8783_s8 + $0x6f4] sm:$0xf] }
 0x301   : > { %v7227_v26 = vunpack.c.l.bf16 %v6714_v49  ;;  %v6841_v44 = vmul.bf16 %v5781_v7, %v821_v43  ;;  %v6842_v11 = vmul.bf16 %v5788_v56, %v822_v6  ;;  %v7898_v25 = vadd.f32 %v7897_v40, %v7352_v10  ;;  %v1703_v0 = vpop.permute.xlu1 %1702  ;;  %v698_v49 = vld [vmem:[%s8783_s8 + $0x5f8] sm:$0xf]  ;;  %v824_v56 = vld [vmem:[%s8783_s8 + $0x7f0] sm:$0xf] }
 0x302   : > { %v7762_v28 = vadd.f32 %v7761_v33, %v7226_v9  ;;  %v7353_v38 = vunpack.c.l.bf16 %v6840_v15  ;;  %v5340_v42 = vrot.slane %v1835_v12, %v8848_v36  ;;  %v7831_v20 = vadd.f32 %v7830_v4, %v7290_v41 }
 0x303   : > { %v7228_v50 = vunpack.c.l.bf16 %v6715_v21  ;;  %v6843_v5 = vmul.bf16 %v5795_v24, %v823_v19  ;;  %v5347_v30 = vrot.slane %v1835_v12, %v8851_v37  ;;  %v7354_v22 = vunpack.c.l.bf16 %v6841_v44  ;;  %v1979_v13 = vpop.permute.xlu0 %1978  ;;  %v699_v12 = vld [vmem:[%s8783_s8 + $0x5fc] sm:$0xf]  ;;  %v825_v24 = vld [vmem:[%s8783_s8 + $0x7f4] sm:$0xf] }
 0x304   : > { %v7899_v52 = vadd.f32 %v7898_v25, %v7353_v38  ;;  %v6778_v45 = vmul.bf16 %v5340_v42, %v758_v62  ;;  %v5354_v18 = vrot.slane %v1839_v60, %v8848_v36  ;;  %v7763_v51 = vadd.f32 %v7762_v28, %v7227_v26  ;;  %v826_v25 = vld [vmem:[%s8783_s8 + $0x7f8] sm:$0xf]  ;;  %v827_v42 = vld [vmem:[%s8783_s8 + $0x7fc] sm:$0xf] }
 0x305   : > { %v7355_v54 = vunpack.c.l.bf16 %v6842_v11  ;;  %v6779_v57 = vmul.bf16 %v5347_v30, %v759_v17  ;;  %v4906_v61 = vrot.slane %v1699_v53, %v8848_v36  ;;  %v5361_v47 = vrot.slane %v1839_v60, %v8851_v37  ;;  %v1983_v9 = vpop.permute.xlu1 %1982 }
 0x306   : > { %v7900_v10 = vadd.f32 %v7899_v52, %v7354_v22  ;;  %v7291_v31 = vunpack.c.l.bf16 %v6778_v45  ;;  %v4913_v29 = vrot.slane %v1699_v53, %v8851_v37  ;;  %v12454_v16 = vrot.slane %v12453_v59, 2 }
 0x307   : > { %v12456_v48 = vrot.slane %v12455_v1, 2  ;;  %v12021_v8 = vadd.f32 %v7633_v46, %v11403_v34  ;;  %v6716_v40 = vmul.bf16 %v4906_v61, %v696_v55  ;;  %v7702_v63 = vrot.slane %v11995_v2, 2 }
 0x308   : > { %v12011_v39 = vadd.f32 %v12454_v16, %v12453_v59  ;;  %v7832_v58 = vadd.f32 %v7831_v20, %v7291_v31  ;;  %v6780_v41 = vmul.bf16 %v5354_v18, %v760_v32  ;;  %v6717_v23 = vmul.bf16 %v4913_v29, %v697_v14  ;;  %v1843_v20 = vpop.permute.xlu0 %1842  ;;  %v763_v32 = vld [vmem:[%s8783_s8 + $0x6fc] sm:$0xf] }
 0x309   : > { %v12016_v27 = vadd.f32 %v12456_v48, %v12455_v1  ;;  %v7764_v43 = vadd.f32 %v7763_v51, %v7228_v50  ;;  %v7356_v3 = vunpack.c.l.bf16 %v6843_v5  ;;  %v7229_v6 = vunpack.c.l.bf16 %v6716_v40 }
 0x30a   : > { %v4920_v4 = vrot.slane %v1703_v0, %v8848_v36  ;;  %v7901_v34 = vadd.f32 %v7900_v10, %v7355_v54  ;;  %v7292_v46 = vunpack.c.l.bf16 %v6779_v57  ;;  %v6781_v21 = vmul.bf16 %v5361_v47, %v761_v35 }
 0x30b   : > { %v4927_v7 = vrot.slane %v1703_v0, %v8851_v37  ;;  %v7230_v33 = vunpack.c.l.bf16 %v6717_v23  ;;  %v7765_v15 = vadd.f32 %v7764_v43, %v7229_v6  ;;  %v5802_v60 = vrot.slane %v1979_v13, %v8848_v36  ;;  %v762_v0 = vld [vmem:[%s8783_s8 + $0x6f8] sm:$0xf] }
 0x30c   : > { %v6718_v19 = vmul.bf16 %v4920_v4, %v698_v49  ;;  %v7833_v26 = vadd.f32 %v7832_v58, %v7292_v46  ;;  %v7293_v44 = vunpack.c.l.bf16 %v6780_v41  ;;  %v5809_v62 = vrot.slane %v1979_v13, %v8851_v37  ;;  %v12457_v13 = vld [vmem:[#allocation36_spill] sm:$0xff] }
 0x30d   : > { %v6719_v11 = vmul.bf16 %v4927_v7, %v699_v12  ;;  %v7766_v28 = vadd.f32 %v7765_v15, %v7230_v33  ;;  %v6844_v17 = vmul.bf16 %v5802_v60, %v824_v56  ;;  %v5816_v53 = vrot.slane %v1983_v9, %v8848_v36 }
 0x30e   : > { %v7231_v38 = vunpack.c.l.bf16 %v6718_v19  ;;  %v7294_v50 = vunpack.c.l.bf16 %v6781_v21  ;;  %v6845_v30 = vmul.bf16 %v5809_v62, %v825_v24  ;;  %v5823_v22 = vrot.slane %v1983_v9, %v8851_v37 }
 0x30f   : > { %v7232_v5 = vunpack.c.l.bf16 %v6719_v11  ;;  %v7902_v52 = vadd.f32 %v7901_v34, %v7356_v3  ;;  %v7357_v18 = vunpack.c.l.bf16 %v6844_v17  ;;  %v6846_v55 = vmul.bf16 %v5816_v53, %v826_v25 }
 0x310   : > { %v7767_v45 = vadd.f32 %v7766_v28, %v7231_v38  ;;  %v7834_v51 = vadd.f32 %v7833_v26, %v7293_v44  ;;  %v7358_v54 = vunpack.c.l.bf16 %v6845_v30  ;;  %v6847_v57 = vmul.bf16 %v5823_v22, %v827_v42 }
 0x311   : > { %v5368_v14 = vrot.slane %v1843_v20, %v8848_v36  ;;  %v7903_v10 = vadd.f32 %v7902_v52, %v7357_v18  ;;  %v7359_v31 = vunpack.c.l.bf16 %v6846_v55  ;;  %v5375_v47 = vrot.slane %v1843_v20, %v8851_v37  ;;  %v7938_v52 = vld [vmem:[#allocation3] sm:$0xff] }
 0x312   : > { %v7768_v61 = vadd.f32 %v7767_v45, %v7232_v5  ;;  %v7497_v29 = vrot.slane %v12011_v39, 1  ;;  %v7703_v59 = vadd.f32 %v7702_v63, %v11995_v2  ;;  %v7360_v35 = vunpack.c.l.bf16 %v6847_v57 }
 0x313   : > { %v6782_v16 = vmul.bf16 %v5368_v14, %v762_v0  ;;  %v7904_v48 = vadd.f32 %v7903_v10, %v7358_v54  ;;  %v6783_v40 = vmul.bf16 %v5375_v47, %v763_v32  ;;  %v7428_v58 = vrot.slane %v12457_v13, 1  ;;  %v7964_v0 = vld [vmem:[%s12167_s2] sm:$0xff] (!%p8209_p11)  ;;  %v7966_v14 = vld [vmem:[%s12167_s2 + $0x10] sm:$0xff] (!%p8209_p11) }
 0x314   : > { %v7769_v1 = vrot.slane %v7768_v61, 4  ;;  %v7566_v41 = vrot.slane %v12016_v27, 1  ;;  %v7835_v23 = vadd.f32 %v7834_v51, %v7294_v50  ;;  %v7635_v49 = vrot.slane %v12021_v8, 1  ;;  %v6848_v50 = vld [vmem:[#allocation2] sm:$0xff]  ;;  %v7965_v51 = vld [vmem:[%s12167_s2 + $0x8] sm:$0xff] (!%p8209_p11) }
 0x315   : > { %v7295_v36 = vunpack.c.l.bf16 %v6782_v16  ;;  %v7905_v3 = vadd.f32 %v7904_v48, %v7359_v31  ;;  %v7704_v37 = vrot.slane %v7703_v59, 1  ;;  %v7296_v6 = vunpack.c.l.bf16 %v6783_v40  ;;  %v7968_v47 = vld [vmem:[%s12167_s2 + $0x20] sm:$0xff] (!%p8209_p11)  ;;  %v7970_v16 = vld [vmem:[%s12167_s2 + $0x30] sm:$0xff] (!%p8209_p11)  ;;  %v7973_v40 = vld [vmem:[%s12167_s2 + $0x48] sm:$0xff] (!%p8209_p11) }
 0x316   : > { %v7770_v43 = vadd.f32 %v7769_v1, %v7768_v61  ;;  %v7498_v2 = vadd.f32 %v7497_v29, %v12011_v39  ;;  %v7429_v34 = vadd.f32 %v7428_v58, %v12457_v13  ;;  %v7567_v46 = vadd.f32 %v7566_v41, %v12016_v27  ;;  %v7967_v61 = vld [vmem:[%s12167_s2 + $0x18] sm:$0xff] (!%p8209_p11)  ;;  %v7969_v29 = vld [vmem:[%s12167_s2 + $0x28] sm:$0xff] (!%p8209_p11)  ;;  %v7974_v58 = vld [vmem:[%s12167_s2 + $0x50] sm:$0xff] (!%p8209_p11) }
 0x317   : > { %v7836_v12 = vadd.f32 %v7835_v23, %v7295_v36  ;;  %v7906_v4 = vadd.f32 %v7905_v3, %v7360_v35  ;;  %v7636_v7 = vadd.f32 %v7635_v49, %v12021_v8  ;;  %v7705_v33 = vadd.f32 %v7704_v37, %v7703_v59  ;;  %v7971_v1 = vld [vmem:[%s12167_s2 + $0x38] sm:$0xff] (!%p8209_p11)  ;;  %v7972_v35 = vld [vmem:[%s12167_s2 + $0x40] sm:$0xff] (!%p8209_p11)  ;;  %v7977_v49 = vld [vmem:[%s12167_s2 + $0x68] sm:$0xff] (!%p8209_p11) }
 0x318   : > { %v7771_v63 = vrot.slane %v7770_v43, 2  ;;  %v7922_v19 = vsel %vm7921_vm1, %v7498_v2, %v7429_v34  ;;  %v8593_v54 = vmov (!%p8209_p11), 0   ;;  %v8594_v57 = vmov (!%p8209_p11), 0.0|0.0   ;;  %v7975_v41 = vld [vmem:[%s12167_s2 + $0x58] sm:$0xff] (!%p8209_p11)  ;;  %v7976_v36 = vld [vmem:[%s12167_s2 + $0x60] sm:$0xff] (!%p8209_p11)  ;;  %v7978_v3 = vld [vmem:[%s12167_s2 + $0x70] sm:$0xff] (!%p8209_p11) }
 0x319   : > { %v7837_v21 = vadd.f32 %v7836_v12, %v7296_v6  ;;  %v7907_v9 = vrot.slane %v7906_v4, 4  ;;  %v7924_v60 = vsel %vm7923_vm2, %v7567_v46, %v7922_v19  ;;  %8425 = vset.pattern.permute.xlu0 (!%p8209_p11), %v8593_v54  ;;  %8268 = vmatprep.subr.bf16.mxu0 (!%p8209_p11), %v8594_v57  ;;  %v8269_v32 = vpack.c.bf16 (!%p8209_p11), %v7965_v51, %v7964_v0  ;;  %v7979_v37 = vld [vmem:[%s12167_s2 + $0x78] sm:$0xff] (!%p8209_p11)  ;;  %v8210_v34 = vld [vmem:[#allocation7] ss:$0 sm:$0xff] (!%p8209_p11) }
 0x31a   : > { %v7772_v56 = vadd.f32 %v7771_v63, %v7770_v43  ;;  %v7926_v11 = vsel %vm7925_vm3, %v7636_v7, %v7924_v60  ;;  %v8272_v10 = vpack.c.bf16 (!%p8209_p11), %v7967_v61, %v7966_v14  ;;  %v8596_v31 = vmov (!%p8209_p11), 0.0  }
 0x31b   : > { %v7838_v15 = vrot.slane %v7837_v21, 4  ;;  %v7908_v39 = vadd.f32 %v7907_v9, %v7906_v4  ;;  %v7928_v27 = vsel %vm7927_vm4, %v7705_v33, %v7926_v11  ;;  %8270 = vmatpush3.bf16.msra.mxu0 (!%p8209_p11), %v8269_v32  ;;  %8265 = vmatprep.mubr.msk.f32.mxu0 (!%p8209_p11), %vm8595_vm9, %v8596_v31  ;;  %v8275_v59 = vpack.c.bf16 (!%p8209_p11), %v7969_v29, %v7968_v47 }
 0x31c   : > { %v7773_v24 = vrot.slane %v7772_v56, 1  ;;  %8271 = vmatprep.subr.bf16.mxu0 (!%p8209_p11), %v8594_v57  ;;  %v8278_v48 = vpack.c.bf16 (!%p8209_p11), %v7971_v1, %v7970_v16  ;;  %v8281_v13 = vpack.c.bf16 (!%p8209_p11), %v7973_v40, %v7972_v35  ;;  %v8284_v23 = vpack.c.bf16 (!%p8209_p11), %v7975_v41, %v7974_v58 }
 0x31d   : > { %v7839_v26 = vadd.f32 %v7838_v15, %v7837_v21  ;;  %v7909_v62 = vrot.slane %v7908_v39, 2  ;;  %v8287_v43 = vpack.c.bf16 (!%p8209_p11), %v7977_v49, %v7976_v36  ;;  %v8290_v6 = vpack.c.bf16 (!%p8209_p11), %v7979_v37, %v7978_v3 }
 0x31e   : > { %v7774_v44 = vadd.f32 %v7773_v24, %v7772_v56 }
 0x31f   : > { %v7840_v25 = vrot.slane %v7839_v26, 2  ;;  %v7910_v38 = vadd.f32 %v7909_v62, %v7908_v39  ;;  %8273 = vmatpush3.bf16.msra.mxu0 (!%p8209_p11), %v8272_v10 }
 0x320   : > { %v7930_v28 = vsel %vm7929_vm5, %v7774_v44, %v7928_v27  ;;  %8274 = vmatprep.subr.bf16.mxu0 (!%p8209_p11), %v8594_v57 }
 0x321   : > { %v7841_v8 = vadd.f32 %v7840_v25, %v7839_v26  ;;  %v7911_v17 = vrot.slane %v7910_v38, 1 }
 0x323   : > { %v7842_v42 = vrot.slane %v7841_v8, 1  ;;  %v7912_v53 = vadd.f32 %v7911_v17, %v7910_v38  ;;  %8276 = vmatpush3.bf16.msra.mxu0 (!%p8209_p11), %v8275_v59 }
 0x324   : > { %8277 = vmatprep.subr.bf16.mxu0 (!%p8209_p11), %v8594_v57 }
 0x325   : > { %v7843_v20 = vadd.f32 %v7842_v42, %v7841_v8 }
 0x327   : > { %v7932_v5 = vsel %vm7931_vm6, %v7843_v20, %v7930_v28  ;;  %8279 = vmatpush3.bf16.msra.mxu0 (!%p8209_p11), %v8278_v48 }
 0x328   : > { %v7934_v30 = vsel %vm7933_vm7, %v7912_v53, %v7932_v5  ;;  %8280 = vmatprep.subr.bf16.mxu0 (!%p8209_p11), %v8594_v57 }
 0x329   : > { %v7936_v22 = vadd.f32 %v7934_v30, %v6848_v50 }
 0x32b   : > { %7937 = vst [vmem:[#allocation2] sm:$0xff] %v7936_v22  ;;  %8282 = vmatpush3.bf16.msra.mxu0 (!%p8209_p11), %v8281_v13 }
 0x32c   : > { %8283 = vmatprep.subr.bf16.mxu0 (!%p8209_p11), %v8594_v57 }
 0x32f   : > { %8285 = vmatpush3.bf16.msra.mxu0 (!%p8209_p11), %v8284_v23 }
 0x330   : > { %8286 = vmatprep.subr.bf16.mxu0 (!%p8209_p11), %v8594_v57 }
 0x332   : > { %v7955_v2 = vld [vmem:[#allocation2] sm:$0xff] (!%p8209_p11) }
 0x333   : > { %8288 = vmatpush3.bf16.msra.mxu0 (!%p8209_p11), %v8287_v43 }
 0x334   : > { %8289 = vmatprep.subr.bf16.mxu0 (!%p8209_p11), %v8594_v57 }
 0x337   : > { %8291 = vmatpush3.bf16.msra.mxu0 (!%p8209_p11), %v8290_v6 }
 0x34d   : > { %7954 = sbr.rel (%p8209_p11) target bundleno = 1215 (0x4bf), region = 52 }
 0x350   : > { %v7947_v45 = vpop.xlane.xlu0 %7946 }
 0x351   : > { %v7948_v18 = vadd.f32 %v7947_v45, %v7938_v52 }
 0x353   : > { %7950 = vst.msk [vmem:[#allocation3] sm:$0xff] %vm7949_vm8, %v7948_v18 }
 0x35a   : > { %v7956_v55 = vld [vmem:[#allocation3] sm:$0xff] }
 0x35b   : > { %7959 = vperm.xlu0 %8425, %v7956_v55  }
 0x3da   : > { %v7960_v12 = vpop.permute.xlu0 %7959 }
 0x3db   : > { %8426 = vrcp.f32 %v7960_v12 }
 0x3e5   : > { %v8427_v63 = vpop.eup %8426 }
 0x3e6   : > { %v7963_v4 = vmul.f32 %v8427_v63, %v7955_v2 }
 0x3e8   : > { %8266 = vmatmul.mubr.f32.vlgmr.msra.gmra.mrb[0].mxu0 %v7963_v4 }
 0x4bb   : > { %v8053_v46 = vpop.f32.mrb[0].mxu0 }
 0x4bc   : > { %v8054_v21 = vadd.f32 %v8210_v34, %v8053_v46  ;;  %v8267_v7 = vpop.f32.mrb[1].mxu0 }
 0x4be   : > { %8058 = vst.msk [vmem:[%s296_s5] sm:$0xff] %vm8057_vm10, %v8054_v21 }
 0x4bf PF: > { %s8212_s27 = sshll.u32 %s8570_s22, 7  ;;  %s8073_s14 = sshll.u32 %s296_s5, 4  ;;  %s8074_s14 = int_to_ptr.vmem [resolvable:$true] %s8073_s14 }
 0x4c0   : > { %s12105_s30 = scalar_lea.hbm %s12169_s4, %s8212_s27  ;;  %s8060_s20 = scalar_lea.sflag [#allocation6], %s294_s17 }
 0x4c1   : > { %s8456_s21 = scalar_lea.vmem %s8074_s14, 128  ;;  %p12458_p0 = scmp.ne.s32.totalorder %s12218_s12, 0 }
 0x4c2   : > { %p8457_p13 = scmp.ne.s32.totalorder %s8074_s14, %s8456_s21  ;;  %s8597_s8 = smov [#allocation9]  }
 0x4c3   : > { %s8460_s24 = sshll.u32 %s8597_s8, 4  ;;  %s8461_s24 = int_to_ptr.vmem [resolvable:$false] %s8460_s24 }
 0x4c4   : > { %p8458_p1 = pnand %p8457_p13, %p12458_p0  ;;  %s8462_s9 = scalar_lea.vmem %s8461_s24, 256 }
 0x4c5   : > { %p8463_p8 = scmp.lt.s32.totalorder %s8074_s14, %s8461_s24  ;;  %p8464_p10 = scmp.lt.s32.totalorder %s8462_s9, %s8456_s21 }
 0x4c6   : > { %p8459_p2 = pneg %p8458_p1 }
 0x4c7   : > { %p8465_p3 = por %p8464_p10, %p8463_p8 }
 0x4c9   : > { %p8466_p6 = pnand %p8465_p3, %p8459_p2 }
 0x4cb   : > { %8469 = shalt.err (!%p8466_p6)
}
 0x4cc   : > { %s8470_s22 = scalar_lea.hbm %s12105_s30, 128  ;;  %s8474_s5 = scalar_lea.hbm %s12169_s4, 256 }
 0x4cd   : > { %p8471_p7 = scmp.ne.s32.totalorder %s12105_s30, %s8470_s22  ;;  %p8475_p5 = scmp.lt.u32.totalorder %s12105_s30, %s12169_s4 }
 0x4ce   : > { %p8476_p9 = scmp.lt.u32.totalorder %s8474_s5, %s8470_s22  ;;  %p8478_p13 = scmp.lt.u32.totalorder %s8470_s22, %s12105_s30 }
 0x4cf   : > { %p8472_p12 = pnand %p8471_p7, %p12458_p0 }
 0x4d0   : > { %p8477_p11 = por %p8476_p9, %p8475_p5 }
 0x4d1   : > { %p8473_p4 = pneg %p8472_p12 }
 0x4d2   : > { %p8479_p1 = por %p8478_p13, %p8477_p11 }
 0x4d4   : > { %p8480_p2 = pnand %p8479_p1, %p8473_p4 }
 0x4d6   : > { %8483 = shalt.err (!%p8480_p2)
}
 0x4d7   : > { %8305 = dma.vmem_to_hbm [thread:$0]  (%p12458_p0), %s8074_s14, 128, %s12105_s30, %s8060_s20  }
 0x4d8 PF: > { %p8317_p8 = scmp.ge.s32.totalorder %s8582_s25, 2  ;;  %s8085_s10 = sand.u32 1, %s8542_s15  }
 0x4d9   : > { %p12459_p10 = scmp.ne.s32.totalorder %s12221_s18, 0  ;;  %s8086_s7 = scalar_lea.sflag [#allocation6], %s8085_s10 }
 0x4db   : > { %p8312_p3 = pnand %p8317_p8, %p12459_p10 }
 0x4dd   : > { %8537 = dma.done.wait (!%p8312_p3), %s8086_s7, 128  }
 0x4de   : > { %8539 = vsyncadd (!%p8312_p3), %s8086_s7, 4294967168  ;;  %s21_s25 = sadd.s32 1, %s8582_s25   ;;  %s12460_s29 = sld [smem:[#allocation16_spill]] }
 0x4df   : > { %p18_p6 = scmp.ge.s32.totalorder %s21_s25, 6   ;;  %s12461_s17 = sld [smem:[#allocation21_spill]] }
 0x4e0   : > { %s12462_s12 = sld [smem:[#allocation17_spill]]  ;;  %s12463_s20 = sld [smem:[#allocation22_spill]] }
 0x4e1   : > { %s12464_s22 = sld [smem:[#allocation18_spill]]  ;;  %s12465_s11 = sld [smem:[#allocation19_spill]] }
 0x4e2   : > { %s12466_s24 = sld [smem:[#allocation20_spill]]  ;;  %s12467_s15 = smov %s8546_s16 }
 0x4e3   : > { %s12469_s18 = smov %s8558_s19  ;;  %s12471_s21 = smov %s8574_s23 }
 0x4e4   : > { %s12468_s16 = smov %s12460_s29  ;;  %20 = sbr.rel (!%p18_p6) target bundleno = 12 (0xc), region = 101 }
 0x4e6   : > { %s12470_s19 = smov %s12462_s12 }
 0x4e7   : > { %s12472_s23 = smov %s12465_s11 }
 0x4eb   :  { %8091 = vsyncpa [#allocation5], 1 }
 0x4ec   :  { %8093 = vsyncpa [#allocation5 + $0x1], 1 }
 0x4ed   :  { %8094 = vsyncpa [#allocation8], 1 }
 0x4ee   :  { %8095 = vsyncpa [#allocation6], 1 }
 0x4ef   :  { %8097 = vsyncpa [#allocation6 + $0x1], 1 }

</bundles_post_ra>
